<compile_context>
chip_gen: v7x
topology: tpu7x:2x2x1
jax: 0.10.0
libtpu: 0.0.40
codegen_flags: <defaults>
</compile_context>

<pallas_src>
import numpy as np

import jax
import jax.numpy as jnp
from jax.experimental import pallas as pl
from jax.experimental.pallas import tpu as pltpu

# ----------------------------------------------------------------------------
# Model sizes (resnet18-style) -- all lane dims are multiples of 128.
# ----------------------------------------------------------------------------
NUM_FTRS = 512          # resnet18 fc.in_features
CNN_OUT = 512           # cnn_output_size for resnet18
GNN_HIDDEN = 256        # GraphConv hidden_channels
GCN_OUT = 128           # gcn_output_size
FC1_OUT = 1024
FC2_OUT = 512
NUM_CLASSES = 10
FC3_PAD = 128           # fc3 output padded to a lane-dense width

# GNNLayer.edge_index (constant copied verbatim from the module; node ids 0..8).
# NOTE: both rows are identical in the original PyTorch module, so the resulting
# adjacency is diagonal (self-aggregation with multiplicity). Kept faithfully.
EDGE_INDEX = np.array(
    [[1, 0, 3, 0, 4, 0, 2, 1, 4, 1, 4, 3, 6, 3, 5, 4, 7, 4, 7, 6, 8, 7, 4, 2, 6, 4, 4, 5, 8, 4],
     [1, 0, 3, 0, 4, 0, 2, 1, 4, 1, 4, 3, 6, 3, 5, 4, 7, 4, 7, 6, 8, 7, 4, 2, 6, 4, 4, 5, 8, 4]],
    dtype=np.int32)
MAX_NODE = int(EDGE_INDEX.max())  # 8 -> batch must be >= 9


def _build_adjacency_tiles(num_tiles: int, tile_m: int) -> np.ndarray:
    """Per-tile adjacency blocks, stacked row-wise: shape (num_tiles*tile_m, tile_m).

    Block t is A[t*tile_m:(t+1)*tile_m, t*tile_m:(t+1)*tile_m] of the dense adjacency
    with A[dst, src] += 1. All edges involve nodes 0..8 < tile_m, so the off-diagonal
    blocks of the full dense adjacency are zero and this block-diagonal restriction is
    exact. Counts are small integers -> exact in bf16.
    """
    assert tile_m >= MAX_NODE + 1
    a = np.zeros((num_tiles * tile_m, tile_m), dtype=np.float32)
    np.add.at(a, (EDGE_INDEX[1], EDGE_INDEX[0]), 1.0)   # edges live entirely in tile 0
    return a


# ----------------------------------------------------------------------------
# Fused Pallas kernel: whole GCF forward per M-tile (weights are full VMEM blocks)
# ----------------------------------------------------------------------------
def _gcf_fused_kernel(
    x_ref, adj_ref,
    wb_ref, bb_ref,                 # backbone stand-in (Linear + ReLU)
    wc_ref, bc_ref,                 # fc_cnn
    wroot_ref, wrel_ref, brel_ref,  # GraphConv (lin_root no bias, lin_rel with bias)
    wg_ref, bg_ref,                 # fc_gcn
    wfa_ref, wfb_ref, bf_ref,       # fc on concat(cnn, gcn), weight split by row block
    w2_ref, b2_ref,                 # fc2
    w3_ref, b3_ref,                 # fc3 (N padded to 128)
    o_ref,
):
    f32 = jnp.float32
    bf16 = jnp.bfloat16

    # ---- CNN backbone stand-in: ReLU(flatten(x) @ Wb + bb) ----
    h = jnp.dot(x_ref[...], wb_ref[...], preferred_element_type=f32) + bb_ref[...]
    h = jnp.maximum(h, 0.0)

    # ---- fc_cnn ----
    cnn = jnp.dot(h.astype(bf16), wc_ref[...], preferred_element_type=f32) + bc_ref[...]
    cnn_bf = cnn.astype(bf16)       # hoisted once, reused for aggr / lin_root / fc paths

    # ---- GNNLayer: ReLU(GraphConv(cnn, edge_index)) ----
    # aggr_i = sum_{j in N(i)} cnn_j  ==  (per-tile bf16 adjacency block) @ cnn
    aggr = jnp.dot(adj_ref[...], cnn_bf, preferred_element_type=f32)
    gcn = jnp.dot(aggr.astype(bf16), wrel_ref[...], preferred_element_type=f32) + brel_ref[...]
    gcn = gcn + jnp.dot(cnn_bf, wroot_ref[...], preferred_element_type=f32)
    gcn = jnp.maximum(gcn, 0.0)

    # ---- fc_gcn ----
    gcn = jnp.dot(gcn.astype(bf16), wg_ref[...], preferred_element_type=f32) + bg_ref[...]

    # ---- fc on concat(cnn, gcn): cat(c,g) @ W == c @ W[:512] + g @ W[512:] ----
    out = jnp.dot(cnn_bf, wfa_ref[...], preferred_element_type=f32)
    out = out + jnp.dot(gcn.astype(bf16), wfb_ref[...], preferred_element_type=f32)
    out = out + bf_ref[...]

    # ---- fc2 + ReLU ----
    out = jnp.dot(out.astype(bf16), w2_ref[...], preferred_element_type=f32) + b2_ref[...]
    out = jnp.maximum(out, 0.0)

    # ---- dropout(p=0.5): identity in eval mode ----

    # ---- fc3 (output padded to 128 lanes; sliced to num_classes in the wrapper) ----
    o_ref[...] = jnp.dot(out.astype(bf16), w3_ref[...], preferred_element_type=f32) + b3_ref[...]


# ----------------------------------------------------------------------------
# Parameters: weights stored (K, N) bf16, biases (1, N) f32, fc3 pre-padded.
# ----------------------------------------------------------------------------
def init_params(key, in_features):
    ks = jax.random.split(key, 16)
    s = 0.02

    def w(k, kin, kout):
        return (s * jax.random.normal(k, (kin, kout), jnp.float32)).astype(jnp.bfloat16)

    def b(k, kout):
        return s * jax.random.normal(k, (1, kout), jnp.float32)

    p = {}
    p["backbone_w"] = w(ks[0], in_features, NUM_FTRS)      # backbone stand-in
    p["backbone_b"] = b(ks[1], NUM_FTRS)
    p["fc_cnn_w"] = w(ks[2], NUM_FTRS, CNN_OUT)            # fc_cnn
    p["fc_cnn_b"] = b(ks[3], CNN_OUT)
    p["gnn_w_rel"] = w(ks[4], CNN_OUT, GNN_HIDDEN)         # GraphConv lin_rel (has bias)
    p["gnn_b_rel"] = b(ks[5], GNN_HIDDEN)
    p["gnn_w_root"] = w(ks[6], CNN_OUT, GNN_HIDDEN)        # GraphConv lin_root (no bias)
    p["fc_gcn_w"] = w(ks[7], GNN_HIDDEN, GCN_OUT)          # fc_gcn
    p["fc_gcn_b"] = b(ks[8], GCN_OUT)
    # fc on concat(cnn, gcn): (640, 1024) weight stored split by row block -> no concat needed
    p["fc_w_cnn"] = w(ks[9], CNN_OUT, FC1_OUT)
    p["fc_w_gcn"] = w(ks[10], GCN_OUT, FC1_OUT)
    p["fc_b"] = b(ks[11], FC1_OUT)
    p["fc2_w"] = w(ks[12], FC1_OUT, FC2_OUT)               # fc2
    p["fc2_b"] = b(ks[13], FC2_OUT)
    # fc3: pad N from NUM_CLASSES to 128 lanes once, keeping padded columns zero
    w3 = s * jax.random.normal(ks[14], (FC2_OUT, NUM_CLASSES), jnp.float32)
    b3 = s * jax.random.normal(ks[15], (1, NUM_CLASSES), jnp.float32)
    p["fc3_w"] = jnp.pad(w3, ((0, 0), (0, FC3_PAD - NUM_CLASSES))).astype(jnp.bfloat16)
    p["fc3_b"] = jnp.pad(b3, ((0, 0), (0, FC3_PAD - NUM_CLASSES)))
    return p


# ----------------------------------------------------------------------------
# Forward: one pallas_call for the whole model, tiled over rows
# ----------------------------------------------------------------------------
@jax.jit
def gcf_forward(params, images):
    B = images.shape[0]
    # edge_index references graph nodes 0..8 (node index == batch index)
    assert B >= MAX_NODE + 1, "batch size must be >= 9 for the fixed edge_index"

    x = images.reshape(B, -1).astype(jnp.bfloat16)
    in_features = x.shape[1]

    # Row tiling: one 16-aligned tile for small batches; 128-row tiles for large ones
    # (lifts MXU row utilization and lets the parallel grid use both v7x TensorCores).
    tile_m = 128 if B > 128 else ((B + 15) // 16) * 16
    mp = ((B + tile_m - 1) // tile_m) * tile_m
    num_tiles = mp // tile_m
    if mp != B:
        x = jnp.pad(x, ((0, mp - B), (0, 0)))

    # Per-tile bf16 adjacency blocks (exact: all edges live inside tile 0).
    adj = jnp.asarray(_build_adjacency_tiles(num_tiles, tile_m), dtype=jnp.bfloat16)

    # Weights: full-array VMEM blocks with a constant block index -> DMA'd once,
    # resident across all row tiles.
    def wspec(shape):
        return pl.BlockSpec(shape, lambda i: (0, 0))

    out = pl.pallas_call(
        _gcf_fused_kernel,
        out_shape=jax.ShapeDtypeStruct((mp, FC3_PAD), jnp.float32),
        grid=(num_tiles,),
        in_specs=[
            pl.BlockSpec((tile_m, in_features), lambda i: (i, 0)),   # x row tile
            pl.BlockSpec((tile_m, tile_m), lambda i: (i, 0)),        # per-tile adjacency block
            wspec((in_features, NUM_FTRS)), wspec((1, NUM_FTRS)),    # backbone stand-in
            wspec((NUM_FTRS, CNN_OUT)), wspec((1, CNN_OUT)),         # fc_cnn
            wspec((CNN_OUT, GNN_HIDDEN)),                            # gnn lin_root
            wspec((CNN_OUT, GNN_HIDDEN)), wspec((1, GNN_HIDDEN)),    # gnn lin_rel (+bias)
            wspec((GNN_HIDDEN, GCN_OUT)), wspec((1, GCN_OUT)),       # fc_gcn
            wspec((CNN_OUT, FC1_OUT)), wspec((GCN_OUT, FC1_OUT)),    # fc (split rows)
            wspec((1, FC1_OUT)),
            wspec((FC1_OUT, FC2_OUT)), wspec((1, FC2_OUT)),          # fc2
            wspec((FC2_OUT, FC3_PAD)), wspec((1, FC3_PAD)),          # fc3 (padded)
        ],
        out_specs=pl.BlockSpec((tile_m, FC3_PAD), lambda i: (i, 0)),
        compiler_params=pltpu.CompilerParams(
            dimension_semantics=("parallel",),
            vmem_limit_bytes=32 * 1024 * 1024,
        ),
    )(
        x, adj,
        params["backbone_w"], params["backbone_b"],
        params["fc_cnn_w"], params["fc_cnn_b"],
        params["gnn_w_root"], params["gnn_w_rel"], params["gnn_b_rel"],
        params["fc_gcn_w"], params["fc_gcn_b"],
        params["fc_w_cnn"], params["fc_w_gcn"], params["fc_b"],
        params["fc2_w"], params["fc2_b"],
        params["fc3_w"], params["fc3_b"],
    )
    # single final slice: drop padded rows and padded class lanes
    return out[:B, :NUM_CLASSES]


if __name__ == "__main__":
    key = jax.random.PRNGKey(0)
    k_img, k_par = jax.random.split(key)

    # edge_index references graph nodes 0..8, so batch >= 9.
    B, C, H, W = 9, 4, 16, 16
    images = jax.random.normal(k_img, (B, C, H, W), dtype=jnp.float32)

    params = init_params(k_par, C * H * W)
    out = gcf_forward(params, images)
    out = jax.block_until_ready(out)
    assert out.shape == (B, NUM_CLASSES) and out.dtype == jnp.float32
    print("KERNEL_OK")
</pallas_src>

<mosaic_0001>
module attributes {stable_mosaic.version = 11 : i64} {
  func.func @_gcf_fused_kernel(%arg0: i32, %arg1: memref<16x1024xbf16, #tpu.memory_space<vmem>>, %arg2: memref<16x16xbf16, #tpu.memory_space<vmem>>, %arg3: memref<1024x512xbf16, #tpu.memory_space<vmem>>, %arg4: memref<1x512xf32, #tpu.memory_space<vmem>>, %arg5: memref<512x512xbf16, #tpu.memory_space<vmem>>, %arg6: memref<1x512xf32, #tpu.memory_space<vmem>>, %arg7: memref<512x256xbf16, #tpu.memory_space<vmem>>, %arg8: memref<512x256xbf16, #tpu.memory_space<vmem>>, %arg9: memref<1x256xf32, #tpu.memory_space<vmem>>, %arg10: memref<256x128xbf16, #tpu.memory_space<vmem>>, %arg11: memref<1x128xf32, #tpu.memory_space<vmem>>, %arg12: memref<512x1024xbf16, #tpu.memory_space<vmem>>, %arg13: memref<128x1024xbf16, #tpu.memory_space<vmem>>, %arg14: memref<1x1024xf32, #tpu.memory_space<vmem>>, %arg15: memref<1024x512xbf16, #tpu.memory_space<vmem>>, %arg16: memref<1x512xf32, #tpu.memory_space<vmem>>, %arg17: memref<512x128xbf16, #tpu.memory_space<vmem>>, %arg18: memref<1x128xf32, #tpu.memory_space<vmem>>, %arg19: memref<16x128xf32, #tpu.memory_space<vmem>>) attributes {dimension_semantics = [#tpu.dimension_semantics<parallel>], iteration_bounds = array<i64: 1>, scalar_prefetch = 0 : i64, scratch_operands = 0 : i64, tpu.core_type = #tpu.core_type<tc>, window_params = [{transform_indices = @transform_0, window_bounds = array<i64: 16, 1024>}, {transform_indices = @transform_1, window_bounds = array<i64: 16, 16>}, {pipeline_mode = #tpu.pipeline_mode<synchronous>, transform_indices = @transform_2, window_bounds = array<i64: 1024, 512>}, {pipeline_mode = #tpu.pipeline_mode<synchronous>, transform_indices = @transform_3, window_bounds = array<i64: 1, 512>}, {pipeline_mode = #tpu.pipeline_mode<synchronous>, transform_indices = @transform_4, window_bounds = array<i64: 512, 512>}, {pipeline_mode = #tpu.pipeline_mode<synchronous>, transform_indices = @transform_5, window_bounds = array<i64: 1, 512>}, {pipeline_mode = #tpu.pipeline_mode<synchronous>, transform_indices = @transform_6, window_bounds = array<i64: 512, 256>}, {pipeline_mode = #tpu.pipeline_mode<synchronous>, transform_indices = @transform_7, window_bounds = array<i64: 512, 256>}, {pipeline_mode = #tpu.pipeline_mode<synchronous>, transform_indices = @transform_8, window_bounds = array<i64: 1, 256>}, {pipeline_mode = #tpu.pipeline_mode<synchronous>, transform_indices = @transform_9, window_bounds = array<i64: 256, 128>}, {pipeline_mode = #tpu.pipeline_mode<synchronous>, transform_indices = @transform_10, window_bounds = array<i64: 1, 128>}, {pipeline_mode = #tpu.pipeline_mode<synchronous>, transform_indices = @transform_11, window_bounds = array<i64: 512, 1024>}, {pipeline_mode = #tpu.pipeline_mode<synchronous>, transform_indices = @transform_12, window_bounds = array<i64: 128, 1024>}, {pipeline_mode = #tpu.pipeline_mode<synchronous>, transform_indices = @transform_13, window_bounds = array<i64: 1, 1024>}, {pipeline_mode = #tpu.pipeline_mode<synchronous>, transform_indices = @transform_14, window_bounds = array<i64: 1024, 512>}, {pipeline_mode = #tpu.pipeline_mode<synchronous>, transform_indices = @transform_15, window_bounds = array<i64: 1, 512>}, {pipeline_mode = #tpu.pipeline_mode<synchronous>, transform_indices = @transform_16, window_bounds = array<i64: 512, 128>}, {pipeline_mode = #tpu.pipeline_mode<synchronous>, transform_indices = @transform_17, window_bounds = array<i64: 1, 128>}, {transform_indices = @transform_18, window_bounds = array<i64: 16, 128>}]} {
    %c0 = arith.constant 0 : index
    %c0_0 = arith.constant 0 : index
    %0 = vector.load %arg1[%c0, %c0_0] : memref<16x1024xbf16, #tpu.memory_space<vmem>>, vector<16x1024xbf16>
    %c0_1 = arith.constant 0 : index
    %c0_2 = arith.constant 0 : index
    %1 = vector.load %arg3[%c0_1, %c0_2] : memref<1024x512xbf16, #tpu.memory_space<vmem>>, vector<1024x512xbf16>
    %cst = arith.constant dense<0.000000e+00> : vector<16x512xf32>
    %2 = tpu.matmul %0, %1, %cst {dimension_numbers = #tpu.dot_dimension_numbers<[1], [0], [0], [1], [0, 0, 1, 1], [], []>} : vector<16x1024xbf16>, vector<1024x512xbf16>, vector<16x512xf32> -> vector<16x512xf32>
    %c0_3 = arith.constant 0 : index
    %c0_4 = arith.constant 0 : index
    %3 = vector.load %arg4[%c0_3, %c0_4] : memref<1x512xf32, #tpu.memory_space<vmem>>, vector<1x512xf32>
    %4 = vector.broadcast %3 : vector<1x512xf32> to vector<16x512xf32>
    %5 = arith.addf %2, %4 : vector<16x512xf32>
    %cst_5 = arith.constant 0.000000e+00 : f32
    %6 = vector.broadcast %cst_5 : f32 to vector<16x512xf32>
    %7 = arith.maximumf %5, %6 : vector<16x512xf32>
    %8 = arith.truncf %7 : vector<16x512xf32> to vector<16x512xbf16>
    %c0_6 = arith.constant 0 : index
    %c0_7 = arith.constant 0 : index
    %9 = vector.load %arg5[%c0_6, %c0_7] : memref<512x512xbf16, #tpu.memory_space<vmem>>, vector<512x512xbf16>
    %cst_8 = arith.constant dense<0.000000e+00> : vector<16x512xf32>
    %10 = tpu.matmul %8, %9, %cst_8 {dimension_numbers = #tpu.dot_dimension_numbers<[1], [0], [0], [1], [0, 0, 1, 1], [], []>} : vector<16x512xbf16>, vector<512x512xbf16>, vector<16x512xf32> -> vector<16x512xf32>
    %c0_9 = arith.constant 0 : index
    %c0_10 = arith.constant 0 : index
    %11 = vector.load %arg6[%c0_9, %c0_10] : memref<1x512xf32, #tpu.memory_space<vmem>>, vector<1x512xf32>
    %12 = vector.broadcast %11 : vector<1x512xf32> to vector<16x512xf32>
    %13 = arith.addf %10, %12 : vector<16x512xf32>
    %14 = arith.truncf %13 : vector<16x512xf32> to vector<16x512xbf16>
    %c0_11 = arith.constant 0 : index
    %c0_12 = arith.constant 0 : index
    %15 = vector.load %arg2[%c0_11, %c0_12] : memref<16x16xbf16, #tpu.memory_space<vmem>>, vector<16x16xbf16>
    %cst_13 = arith.constant dense<0.000000e+00> : vector<16x512xf32>
    %16 = tpu.matmul %15, %14, %cst_13 {dimension_numbers = #tpu.dot_dimension_numbers<[1], [0], [0], [1], [0, 0, 1, 1], [], []>} : vector<16x16xbf16>, vector<16x512xbf16>, vector<16x512xf32> -> vector<16x512xf32>
    %17 = arith.truncf %16 : vector<16x512xf32> to vector<16x512xbf16>
    %c0_14 = arith.constant 0 : index
    %c0_15 = arith.constant 0 : index
    %18 = vector.load %arg8[%c0_14, %c0_15] : memref<512x256xbf16, #tpu.memory_space<vmem>>, vector<512x256xbf16>
    %cst_16 = arith.constant dense<0.000000e+00> : vector<16x256xf32>
    %19 = tpu.matmul %17, %18, %cst_16 {dimension_numbers = #tpu.dot_dimension_numbers<[1], [0], [0], [1], [0, 0, 1, 1], [], []>} : vector<16x512xbf16>, vector<512x256xbf16>, vector<16x256xf32> -> vector<16x256xf32>
    %c0_17 = arith.constant 0 : index
    %c0_18 = arith.constant 0 : index
    %20 = vector.load %arg9[%c0_17, %c0_18] : memref<1x256xf32, #tpu.memory_space<vmem>>, vector<1x256xf32>
    %21 = vector.broadcast %20 : vector<1x256xf32> to vector<16x256xf32>
    %22 = arith.addf %19, %21 : vector<16x256xf32>
    %c0_19 = arith.constant 0 : index
    %c0_20 = arith.constant 0 : index
    %23 = vector.load %arg7[%c0_19, %c0_20] : memref<512x256xbf16, #tpu.memory_space<vmem>>, vector<512x256xbf16>
    %cst_21 = arith.constant dense<0.000000e+00> : vector<16x256xf32>
    %24 = tpu.matmul %14, %23, %cst_21 {dimension_numbers = #tpu.dot_dimension_numbers<[1], [0], [0], [1], [0, 0, 1, 1], [], []>} : vector<16x512xbf16>, vector<512x256xbf16>, vector<16x256xf32> -> vector<16x256xf32>
    %25 = arith.addf %22, %24 : vector<16x256xf32>
    %cst_22 = arith.constant 0.000000e+00 : f32
    %26 = vector.broadcast %cst_22 : f32 to vector<16x256xf32>
    %27 = arith.maximumf %25, %26 : vector<16x256xf32>
    %28 = arith.truncf %27 : vector<16x256xf32> to vector<16x256xbf16>
    %c0_23 = arith.constant 0 : index
    %c0_24 = arith.constant 0 : index
    %29 = vector.load %arg10[%c0_23, %c0_24] : memref<256x128xbf16, #tpu.memory_space<vmem>>, vector<256x128xbf16>
    %cst_25 = arith.constant dense<0.000000e+00> : vector<16x128xf32>
    %30 = tpu.matmul %28, %29, %cst_25 {dimension_numbers = #tpu.dot_dimension_numbers<[1], [0], [0], [1], [0, 0, 1, 1], [], []>} : vector<16x256xbf16>, vector<256x128xbf16>, vector<16x128xf32> -> vector<16x128xf32>
    %c0_26 = arith.constant 0 : index
    %c0_27 = arith.constant 0 : index
    %31 = vector.load %arg11[%c0_26, %c0_27] : memref<1x128xf32, #tpu.memory_space<vmem>>, vector<1x128xf32>
    %32 = vector.broadcast %31 : vector<1x128xf32> to vector<16x128xf32>
    %33 = arith.addf %30, %32 : vector<16x128xf32>
    %c0_28 = arith.constant 0 : index
    %c0_29 = arith.constant 0 : index
    %34 = vector.load %arg12[%c0_28, %c0_29] : memref<512x1024xbf16, #tpu.memory_space<vmem>>, vector<512x1024xbf16>
    %cst_30 = arith.constant dense<0.000000e+00> : vector<16x1024xf32>
    %35 = tpu.matmul %14, %34, %cst_30 {dimension_numbers = #tpu.dot_dimension_numbers<[1], [0], [0], [1], [0, 0, 1, 1], [], []>} : vector<16x512xbf16>, vector<512x1024xbf16>, vector<16x1024xf32> -> vector<16x1024xf32>
    %36 = arith.truncf %33 : vector<16x128xf32> to vector<16x128xbf16>
    %c0_31 = arith.constant 0 : index
    %c0_32 = arith.constant 0 : index
    %37 = vector.load %arg13[%c0_31, %c0_32] : memref<128x1024xbf16, #tpu.memory_space<vmem>>, vector<128x1024xbf16>
    %cst_33 = arith.constant dense<0.000000e+00> : vector<16x1024xf32>
    %38 = tpu.matmul %36, %37, %cst_33 {dimension_numbers = #tpu.dot_dimension_numbers<[1], [0], [0], [1], [0, 0, 1, 1], [], []>} : vector<16x128xbf16>, vector<128x1024xbf16>, vector<16x1024xf32> -> vector<16x1024xf32>
    %39 = arith.addf %35, %38 : vector<16x1024xf32>
    %c0_34 = arith.constant 0 : index
    %c0_35 = arith.constant 0 : index
    %40 = vector.load %arg14[%c0_34, %c0_35] : memref<1x1024xf32, #tpu.memory_space<vmem>>, vector<1x1024xf32>
    %41 = vector.broadcast %40 : vector<1x1024xf32> to vector<16x1024xf32>
    %42 = arith.addf %39, %41 : vector<16x1024xf32>
    %43 = arith.truncf %42 : vector<16x1024xf32> to vector<16x1024xbf16>
    %c0_36 = arith.constant 0 : index
    %c0_37 = arith.constant 0 : index
    %44 = vector.load %arg15[%c0_36, %c0_37] : memref<1024x512xbf16, #tpu.memory_space<vmem>>, vector<1024x512xbf16>
    %cst_38 = arith.constant dense<0.000000e+00> : vector<16x512xf32>
    %45 = tpu.matmul %43, %44, %cst_38 {dimension_numbers = #tpu.dot_dimension_numbers<[1], [0], [0], [1], [0, 0, 1, 1], [], []>} : vector<16x1024xbf16>, vector<1024x512xbf16>, vector<16x512xf32> -> vector<16x512xf32>
    %c0_39 = arith.constant 0 : index
    %c0_40 = arith.constant 0 : index
    %46 = vector.load %arg16[%c0_39, %c0_40] : memref<1x512xf32, #tpu.memory_space<vmem>>, vector<1x512xf32>
    %47 = vector.broadcast %46 : vector<1x512xf32> to vector<16x512xf32>
    %48 = arith.addf %45, %47 : vector<16x512xf32>
    %cst_41 = arith.constant 0.000000e+00 : f32
    %49 = vector.broadcast %cst_41 : f32 to vector<16x512xf32>
    %50 = arith.maximumf %48, %49 : vector<16x512xf32>
    %51 = arith.truncf %50 : vector<16x512xf32> to vector<16x512xbf16>
    %c0_42 = arith.constant 0 : index
    %c0_43 = arith.constant 0 : index
    %52 = vector.load %arg17[%c0_42, %c0_43] : memref<512x128xbf16, #tpu.memory_space<vmem>>, vector<512x128xbf16>
    %cst_44 = arith.constant dense<0.000000e+00> : vector<16x128xf32>
    %53 = tpu.matmul %51, %52, %cst_44 {dimension_numbers = #tpu.dot_dimension_numbers<[1], [0], [0], [1], [0, 0, 1, 1], [], []>} : vector<16x512xbf16>, vector<512x128xbf16>, vector<16x128xf32> -> vector<16x128xf32>
    %c0_45 = arith.constant 0 : index
    %c0_46 = arith.constant 0 : index
    %54 = vector.load %arg18[%c0_45, %c0_46] : memref<1x128xf32, #tpu.memory_space<vmem>>, vector<1x128xf32>
    %55 = vector.broadcast %54 : vector<1x128xf32> to vector<16x128xf32>
    %56 = arith.addf %53, %55 : vector<16x128xf32>
    %c0_47 = arith.constant 0 : index
    %c0_48 = arith.constant 0 : index
    %57 = vector.load %arg19[%c0_47, %c0_48] : memref<16x128xf32, #tpu.memory_space<vmem>>, vector<16x128xf32>
    tpu.vector_store %arg19[%c0_47, %c0_48], %56 {strides = array<i32>} : memref<16x128xf32, #tpu.memory_space<vmem>>, vector<16x128xf32>,
    return
  }
  func.func @transform_0(%arg0: i32) -> (i32, i32) {
    %c0_i32 = arith.constant 0 : i32
    %c0_i32_0 = arith.constant 0 : i32
    return %arg0, %c0_i32 : i32, i32
  }
  func.func @transform_1(%arg0: i32) -> (i32, i32) {
    %c0_i32 = arith.constant 0 : i32
    %c0_i32_0 = arith.constant 0 : i32
    return %arg0, %c0_i32 : i32, i32
  }
  func.func @transform_2(%arg0: i32) -> (i32, i32) {
    %c0_i32 = arith.constant 0 : i32
    %c0_i32_0 = arith.constant 0 : i32
    %c0_i32_1 = arith.constant 0 : i32
    return %c0_i32, %c0_i32_0 : i32, i32
  }
  func.func @transform_3(%arg0: i32) -> (i32, i32) {
    %c0_i32 = arith.constant 0 : i32
    %c0_i32_0 = arith.constant 0 : i32
    %c0_i32_1 = arith.constant 0 : i32
    return %c0_i32, %c0_i32_0 : i32, i32
  }
  func.func @transform_4(%arg0: i32) -> (i32, i32) {
    %c0_i32 = arith.constant 0 : i32
    %c0_i32_0 = arith.constant 0 : i32
    %c0_i32_1 = arith.constant 0 : i32
    return %c0_i32, %c0_i32_0 : i32, i32
  }
  func.func @transform_5(%arg0: i32) -> (i32, i32) {
    %c0_i32 = arith.constant 0 : i32
    %c0_i32_0 = arith.constant 0 : i32
    %c0_i32_1 = arith.constant 0 : i32
    return %c0_i32, %c0_i32_0 : i32, i32
  }
  func.func @transform_6(%arg0: i32) -> (i32, i32) {
    %c0_i32 = arith.constant 0 : i32
    %c0_i32_0 = arith.constant 0 : i32
    %c0_i32_1 = arith.constant 0 : i32
    return %c0_i32, %c0_i32_0 : i32, i32
  }
  func.func @transform_7(%arg0: i32) -> (i32, i32) {
    %c0_i32 = arith.constant 0 : i32
    %c0_i32_0 = arith.constant 0 : i32
    %c0_i32_1 = arith.constant 0 : i32
    return %c0_i32, %c0_i32_0 : i32, i32
  }
  func.func @transform_8(%arg0: i32) -> (i32, i32) {
    %c0_i32 = arith.constant 0 : i32
    %c0_i32_0 = arith.constant 0 : i32
    %c0_i32_1 = arith.constant 0 : i32
    return %c0_i32, %c0_i32_0 : i32, i32
  }
  func.func @transform_9(%arg0: i32) -> (i32, i32) {
    %c0_i32 = arith.constant 0 : i32
    %c0_i32_0 = arith.constant 0 : i32
    %c0_i32_1 = arith.constant 0 : i32
    return %c0_i32, %c0_i32_0 : i32, i32
  }
  func.func @transform_10(%arg0: i32) -> (i32, i32) {
    %c0_i32 = arith.constant 0 : i32
    %c0_i32_0 = arith.constant 0 : i32
    %c0_i32_1 = arith.constant 0 : i32
    return %c0_i32, %c0_i32_0 : i32, i32
  }
  func.func @transform_11(%arg0: i32) -> (i32, i32) {
    %c0_i32 = arith.constant 0 : i32
    %c0_i32_0 = arith.constant 0 : i32
    %c0_i32_1 = arith.constant 0 : i32
    return %c0_i32, %c0_i32_0 : i32, i32
  }
  func.func @transform_12(%arg0: i32) -> (i32, i32) {
    %c0_i32 = arith.constant 0 : i32
    %c0_i32_0 = arith.constant 0 : i32
    %c0_i32_1 = arith.constant 0 : i32
    return %c0_i32, %c0_i32_0 : i32, i32
  }
  func.func @transform_13(%arg0: i32) -> (i32, i32) {
    %c0_i32 = arith.constant 0 : i32
    %c0_i32_0 = arith.constant 0 : i32
    %c0_i32_1 = arith.constant 0 : i32
    return %c0_i32, %c0_i32_0 : i32, i32
  }
  func.func @transform_14(%arg0: i32) -> (i32, i32) {
    %c0_i32 = arith.constant 0 : i32
    %c0_i32_0 = arith.constant 0 : i32
    %c0_i32_1 = arith.constant 0 : i32
    return %c0_i32, %c0_i32_0 : i32, i32
  }
  func.func @transform_15(%arg0: i32) -> (i32, i32) {
    %c0_i32 = arith.constant 0 : i32
    %c0_i32_0 = arith.constant 0 : i32
    %c0_i32_1 = arith.constant 0 : i32
    return %c0_i32, %c0_i32_0 : i32, i32
  }
  func.func @transform_16(%arg0: i32) -> (i32, i32) {
    %c0_i32 = arith.constant 0 : i32
    %c0_i32_0 = arith.constant 0 : i32
    %c0_i32_1 = arith.constant 0 : i32
    return %c0_i32, %c0_i32_0 : i32, i32
  }
  func.func @transform_17(%arg0: i32) -> (i32, i32) {
    %c0_i32 = arith.constant 0 : i32
    %c0_i32_0 = arith.constant 0 : i32
    %c0_i32_1 = arith.constant 0 : i32
    return %c0_i32, %c0_i32_0 : i32, i32
  }
  func.func @transform_18(%arg0: i32) -> (i32, i32) {
    %c0_i32 = arith.constant 0 : i32
    %c0_i32_0 = arith.constant 0 : i32
    return %arg0, %c0_i32 : i32, i32
  }
}

</mosaic_0001>

<bundles_post_ra>
// kernel: gcf_forward.1
= control target key start
LH: loop header
LB: loop body
LE: loop exit
PB: predicated region body
PF: predicated region fallthrough
CT: control target
= control target key end

     0   :  { %s12790_s0 = inlined_call_operand.vmem [shape: bf16[16,1024], index: 0, kind: input, shape index: {}]   ;;  %s12791_s1 = inlined_call_operand.vmem [shape: bf16[16,16], index: 1, kind: input, shape index: {}]   ;;  %s12792_s2 = inlined_call_operand.hbm [shape: bf16[1024,512], index: 2, kind: input, shape index: {}]   ;;  %s12793_s3 = inlined_call_operand.vmem [shape: f32[1,512], index: 3, kind: input, shape index: {}]   ;;  %s12794_s4 = inlined_call_operand.vmem [shape: bf16[512,512], index: 4, kind: input, shape index: {}]   ;;  %s12795_s5 = inlined_call_operand.vmem [shape: f32[1,512], index: 5, kind: input, shape index: {}]   ;;  %s12796_s6 = inlined_call_operand.hbm [shape: bf16[512,256], index: 6, kind: input, shape index: {}]   ;;  %s12797_s7 = inlined_call_operand.hbm [shape: bf16[512,256], index: 7, kind: input, shape index: {}]   ;;  %s12798_s8 = inlined_call_operand.vmem [shape: f32[1,256], index: 8, kind: input, shape index: {}]   ;;  %s12799_s9 = inlined_call_operand.hbm [shape: bf16[256,128], index: 9, kind: input, shape index: {}]   ;;  %s12800_s10 = inlined_call_operand.vmem [shape: f32[1,128], index: 10, kind: input, shape index: {}]   ;;  %s12801_s11 = inlined_call_operand.hbm [shape: bf16[512,1024], index: 11, kind: input, shape index: {}]   ;;  %s12802_s12 = inlined_call_operand.hbm [shape: bf16[128,1024], index: 12, kind: input, shape index: {}]   ;;  %s12803_s13 = inlined_call_operand.vmem [shape: f32[1,1024], index: 13, kind: input, shape index: {}]   ;;  %s12804_s14 = inlined_call_operand.hbm [shape: bf16[1024,512], index: 14, kind: input, shape index: {}]   ;;  %s12805_s15 = inlined_call_operand.vmem [shape: f32[1,512], index: 15, kind: input, shape index: {}]   ;;  %s12806_s16 = inlined_call_operand.vmem [shape: bf16[512,128], index: 16, kind: input, shape index: {}]   ;;  %s12807_s17 = inlined_call_operand.vmem [shape: f32[1,128], index: 17, kind: input, shape index: {}]   ;;  %s12808_s18 = inlined_call_operand.hbm [shape: f32[16,128], index: 18, kind: output, shape index: {}]  }
   0x1   :  { %12816 = sst [smem:[#allocation20_spill]] %s12790_s0 }
   0x2   :  { %12817 = sst [smem:[#allocation21_spill]] %s12791_s1 }
   0x3   :  { %12818 = sst [smem:[#allocation22_spill]] %s12792_s2 }
   0x4   :  { %23 = vsyncpa [#allocation3], 0 }
   0x5   :  { %24 = vsyncpa [#allocation6], 0 }
   0x6   :  { %25 = vsyncpa [#allocation9], 0 }
   0x7   :  { %26 = vsyncpa [#allocation12], 0 }
   0x8   :  { %27 = vsyncpa [#allocation4], 0  ;;  %s11854_s27 = smov [#allocation5]   ;;  %s11668_s0 = scalar_lea.hbm %s12796_s6, 8192 }
   0x9   :  { %s55_s28 = sshll.u32 %s11854_s27, 4  ;;  %p11669_p0 = scmp.ne.s32.totalorder %s12796_s6, %s11668_s0  ;;  %s56_s28 = int_to_ptr.vmem [resolvable:$true] %s55_s28 }
   0xa   :  { %p11672_p1 = scmp.lt.u32.totalorder %s11668_s0, %s12796_s6 }
   0xc   :  { %p11674_p2 = pnand %p11672_p1, %p11669_p0 }
   0xe   :  { %11677 = shalt.err (!%p11674_p2)
}
   0xf   :  { %s11678_s22 = scalar_lea.vmem %s56_s28, 8192  ;;  %p11683_p4 = scmp.lt.s32.totalorder %s56_s28, %s56_s28 }
  0x10   :  { %p11679_p3 = scmp.ne.s32.totalorder %s56_s28, %s11678_s22  ;;  %p11684_p5 = scmp.lt.s32.totalorder %s11678_s22, %s11678_s22 }
  0x12   :  { %p11685_p6 = por %p11684_p5, %p11683_p4 }
  0x14   :  { %p11686_p7 = pnand %p11685_p6, %p11679_p3 }
  0x16   :  { %11689 = shalt.err (!%p11686_p7)
}
  0x17   :  { %s12811_s2 = smov 128   ;;  %s12813_s23 = smov 8  }
  0x18   :  { %61 = dma.hbm_to_vmem [thread:$0]  %s12796_s6, 8192, %s56_s28, [#allocation6], %s12811_s2, %s12811_s2, %s12813_s23  }
  0x19   :  { %s11857_s26 = smov [#allocation8]   ;;  %s11690_s0 = scalar_lea.hbm %s12799_s9, 2048 }
  0x1a   :  { %s81_s27 = sshll.u32 %s11857_s26, 4  ;;  %p11691_p8 = scmp.ne.s32.totalorder %s12799_s9, %s11690_s0  ;;  %s82_s27 = int_to_ptr.vmem [resolvable:$true] %s81_s27 }
  0x1b   :  { %p11694_p9 = scmp.lt.u32.totalorder %s11690_s0, %s12799_s9 }
  0x1d   :  { %p11696_p10 = pnand %p11694_p9, %p11691_p8 }
  0x1f   :  { %11699 = shalt.err (!%p11696_p10)
}
  0x20   :  { %s11700_s22 = scalar_lea.vmem %s82_s27, 2048  ;;  %p11705_p12 = scmp.lt.s32.totalorder %s82_s27, %s82_s27 }
  0x21   :  { %p11701_p11 = scmp.ne.s32.totalorder %s82_s27, %s11700_s22  ;;  %p11706_p13 = scmp.lt.s32.totalorder %s11700_s22, %s11700_s22 }
  0x23   :  { %p11707_p0 = por %p11706_p13, %p11705_p12 }
  0x25   :  { %p11708_p1 = pnand %p11707_p0, %p11701_p11 }
  0x27   :  { %11711 = shalt.err (!%p11708_p1)
}
  0x28   :  { %s11858_s6 = smov 64   ;;  %s11859_s28 = smov 4  }
  0x29   :  { %87 = dma.hbm_to_vmem [thread:$0]  %s12799_s9, 2048, %s82_s27, [#allocation9], %s11858_s6, %s11858_s6, %s11859_s28  }
  0x2a   :  { %s11860_s26 = smov [#allocation11]   ;;  %s11861_s30 = smov [#allocation2]  }
  0x2b   :  { %s107_s29 = sshll.u32 %s11860_s26, 4  ;;  %s37_s19 = sshll.u32 %s11861_s30, 4  ;;  %s108_s29 = int_to_ptr.vmem [resolvable:$true] %s107_s29  ;;  %s11993_s19 = int_to_ptr.vmem [resolvable:$true] %s37_s19 }
  0x2c   :  { %s11712_s20 = scalar_lea.hbm %s12802_s12, 8192 }
  0x2d   :  { %p11713_p2 = scmp.ne.s32.totalorder %s12802_s12, %s11712_s20  ;;  %p11716_p3 = scmp.lt.u32.totalorder %s11712_s20, %s12802_s12 }
  0x2f   :  { %p11718_p4 = pnand %p11716_p3, %p11713_p2 }
  0x31   :  { %11721 = shalt.err (!%p11718_p4)
}
  0x32   :  { %s11722_s9 = scalar_lea.vmem %s108_s29, 8192  ;;  %p11727_p6 = scmp.lt.s32.totalorder %s108_s29, %s108_s29 }
  0x33   :  { %p11723_p5 = scmp.ne.s32.totalorder %s108_s29, %s11722_s9  ;;  %p11728_p7 = scmp.lt.s32.totalorder %s11722_s9, %s11722_s9 }
  0x35   :  { %p11729_p8 = por %p11728_p7, %p11727_p6 }
  0x37   :  { %p11730_p9 = pnand %p11729_p8, %p11723_p5 }
  0x39   :  { %11733 = shalt.err (!%p11730_p9)
}
  0x3a   :  { %s12815_s27 = smov 512   ;;  %s11863_s6 = smov 32  }
  0x3b   :  { %113 = dma.hbm_to_vmem [thread:$0]  %s12802_s12, 8192, %s108_s29, [#allocation12], %s12815_s27, %s12815_s27, %s11863_s6  }
  0x3c   :  { %s12819_s25 = sld [smem:[#allocation22_spill]] }
  0x42   :  { %s11734_s26 = scalar_lea.hbm %s12819_s25, 32768 }
  0x43   :  { %p11735_p10 = scmp.ne.s32.totalorder %s12819_s25, %s11734_s26  ;;  %p11738_p11 = scmp.lt.u32.totalorder %s11734_s26, %s12819_s25 }
  0x45   :  { %p11740_p12 = pnand %p11738_p11, %p11735_p10 }
  0x47   :  { %11743 = shalt.err (!%p11740_p12)
}
  0x48   :  { %s11744_s21 = scalar_lea.vmem %s11993_s19, 32768  ;;  %p11749_p0 = scmp.lt.s32.totalorder %s11993_s19, %s11993_s19 }
  0x49   :  { %p11745_p13 = scmp.ne.s32.totalorder %s11993_s19, %s11744_s21  ;;  %p11750_p1 = scmp.lt.s32.totalorder %s11744_s21, %s11744_s21 }
  0x4b   :  { %p11751_p2 = por %p11750_p1, %p11749_p0 }
  0x4d   :  { %p11752_p3 = pnand %p11751_p2, %p11745_p13 }
  0x4f   :  { %11755 = shalt.err (!%p11752_p3)
}
  0x50   :  { %s11864_s12 = smov 256   ;;  %s11865_s29 = smov 16  }
  0x51   :  { %43 = dma.hbm_to_vmem [thread:$0]  %s12819_s25, 32768, %s11993_s19, [#allocation3], %s11864_s12, %s11864_s12, %s11865_s29  }
  0x52   :  { %s11866_s28 = smov [#allocation7]   ;;  %s11867_s2 = smov [#allocation10]  }
  0x53   :  { %s67_s24 = sshll.u32 %s11866_s28, 4  ;;  %s95_s23 = sshll.u32 %s11867_s2, 4  ;;  %s68_s24 = int_to_ptr.vmem [resolvable:$true] %s67_s24  ;;  %s12030_s23 = int_to_ptr.vmem [resolvable:$true] %s95_s23 }
  0x54   :  { %s11756_s0 = scalar_lea.hbm %s12797_s7, 8192 }
  0x55   :  { %p11757_p4 = scmp.ne.s32.totalorder %s12797_s7, %s11756_s0  ;;  %p11760_p5 = scmp.lt.u32.totalorder %s11756_s0, %s12797_s7 }
  0x57   :  { %p11762_p6 = pnand %p11760_p5, %p11757_p4 }
  0x59   :  { %11765 = shalt.err (!%p11762_p6)
}
  0x5a   :  { %s11766_s19 = scalar_lea.vmem %s68_s24, 8192  ;;  %p11771_p8 = scmp.lt.s32.totalorder %s68_s24, %s68_s24 }
  0x5b   :  { %p11767_p7 = scmp.ne.s32.totalorder %s68_s24, %s11766_s19  ;;  %p11772_p9 = scmp.lt.s32.totalorder %s11766_s19, %s11766_s19 }
  0x5d   :  { %p11773_p10 = por %p11772_p9, %p11771_p8 }
  0x5f   :  { %p11774_p11 = pnand %p11773_p10, %p11767_p7 }
  0x61   :  { %11777 = shalt.err (!%p11774_p11)
}
  0x62   :  { %s12820_s25 = smov 8   ;;  %s12821_s22 = smov 128  }
  0x63   :  { %73 = dma.hbm_to_vmem [thread:$0]  %s12797_s7, 8192, %s68_s24, [#allocation6], %s12821_s22, %s12821_s22, %s12820_s25  }
  0x64   :  { %s11778_s27 = scalar_lea.hbm %s12801_s11, 32768 }
  0x65   :  { %p11779_p12 = scmp.ne.s32.totalorder %s12801_s11, %s11778_s27  ;;  %p11782_p13 = scmp.lt.u32.totalorder %s11778_s27, %s12801_s11 }
  0x67   :  { %p11784_p0 = pnand %p11782_p13, %p11779_p12 }
  0x69   :  { %11787 = shalt.err (!%p11784_p0)
}
  0x6a   :  { %s11788_s21 = scalar_lea.vmem %s12030_s23, 32768  ;;  %p11793_p2 = scmp.lt.s32.totalorder %s12030_s23, %s12030_s23 }
  0x6b   :  { %p11789_p1 = scmp.ne.s32.totalorder %s12030_s23, %s11788_s21  ;;  %p11794_p3 = scmp.lt.s32.totalorder %s11788_s21, %s11788_s21 }
  0x6d   :  { %p11795_p4 = por %p11794_p3, %p11793_p2 }
  0x6f   :  { %p11796_p5 = pnand %p11795_p4, %p11789_p1 }
  0x71   :  { %11799 = shalt.err (!%p11796_p5)
}
  0x72   :  { %s12822_s7 = smov 512   ;;  %s11868_s9 = smov [#allocation13]  }
  0x73   :  { %101 = dma.hbm_to_vmem [thread:$0]  %s12801_s11, 32768, %s12030_s23, [#allocation9], %s12822_s7, %s12822_s7, %s11863_s6  }
  0x74   :  { %s121_s28 = sshll.u32 %s11868_s9, 4  ;;  %s11800_s27 = scalar_lea.hbm %s12804_s14, 32768  ;;  %s122_s28 = int_to_ptr.vmem [resolvable:$true] %s121_s28 }
  0x75   :  { %p11801_p6 = scmp.ne.s32.totalorder %s12804_s14, %s11800_s27  ;;  %p11804_p7 = scmp.lt.u32.totalorder %s11800_s27, %s12804_s14 }
  0x77   :  { %p11806_p8 = pnand %p11804_p7, %p11801_p6 }
  0x79   :  { %11809 = shalt.err (!%p11806_p8)
}
  0x7a   :  { %s11810_s21 = scalar_lea.vmem %s122_s28, 32768  ;;  %p11815_p10 = scmp.lt.s32.totalorder %s122_s28, %s122_s28 }
  0x7b   :  { %p11811_p9 = scmp.ne.s32.totalorder %s122_s28, %s11810_s21  ;;  %p11816_p11 = scmp.lt.s32.totalorder %s11810_s21, %s11810_s21 }
  0x7d   :  { %p11817_p12 = por %p11816_p11, %p11815_p10 }
  0x7f   :  { %p11818_p13 = pnand %p11817_p12, %p11811_p9 }
  0x81   :  { %11821 = shalt.err (!%p11818_p13)
}
  0x82   :  { %127 = dma.hbm_to_vmem [thread:$0]  %s12804_s14, 32768, %s122_s28, [#allocation12], %s11864_s12, %s11864_s12, %s11865_s29  }
  0x83   :  { %11844 = dma.done.wait [#allocation3], 32768  }
  0x84   :  { %11845 = vsyncadd [#allocation3], 4294934528 }
  0x85   :  { %11846 = dma.done.wait [#allocation6], 16384  }
  0x86   :  { %11847 = vsyncadd [#allocation6], 4294950912 }
  0x87   :  { %11848 = dma.done.wait [#allocation9], 34816  }
  0x88   :  { %11849 = vsyncadd [#allocation9], 4294932480 }
  0x89   :  { %11850 = dma.done.wait [#allocation12], 40960  }
  0x8a   :  { %11851 = vsyncadd [#allocation12], 4294926336  ;;  %v10467_v0 = vld [vmem:[#allocation2 + $0x4] ss:$16 sps:$4 sm:$0xff]   ;;  %v10469_v1 = vld [vmem:[#allocation2 + $0xc] ss:$16 sps:$4 sm:$0xff]  }
  0x8b   :  { %1762 = vmatprep.subr.bf16.mxu0 %v10467_v0  ;;  %v10471_v2 = vld [vmem:[#allocation2] ss:$16 sps:$4 sm:$0xff]   ;;  %v10472_v3 = vld [vmem:[#allocation2 + $0x8] ss:$16 sps:$4 sm:$0xff]   ;;  %1934 = vmatprep.subr.bf16.mxu1 %v10469_v1  ;;  %v10473_v4 = vld [vmem:[#allocation2 + $0x24] ss:$16 sps:$4 sm:$0xff]  }
  0x8c   :  { %1763 = vmatpush1.bf16.msra.mxu0 %v10471_v2  ;;  %1935 = vmatpush1.bf16.msra.mxu1 %v10472_v3  ;;  %v10475_v5 = vld [vmem:[#allocation2 + $0x2c] ss:$16 sps:$4 sm:$0xff]   ;;  %v10477_v6 = vld [vmem:[#allocation2 + $0x20] ss:$16 sps:$4 sm:$0xff]   ;;  %v10478_v7 = vld [vmem:[#allocation2 + $0x28] ss:$16 sps:$4 sm:$0xff]  }
  0x8d   :  { %1764 = vmatprep.subr.bf16.mxu0 %v10473_v4  ;;  %1936 = vmatprep.subr.bf16.mxu1 %v10475_v5  ;;  %v10479_v8 = vld [vmem:[#allocation2 + $0x44] ss:$16 sps:$4 sm:$0xff]   ;;  %v10481_v9 = vld [vmem:[#allocation2 + $0x4c] ss:$16 sps:$4 sm:$0xff]   ;;  %v10483_v10 = vld [vmem:[#allocation2 + $0x40] ss:$16 sps:$4 sm:$0xff]  }
  0x8e   :  { %v10484_v11 = vld [vmem:[#allocation2 + $0x48] ss:$16 sps:$4 sm:$0xff]   ;;  %v10485_v12 = vld [vmem:[#allocation2 + $0x64] ss:$16 sps:$4 sm:$0xff]   ;;  %v10487_v13 = vld [vmem:[#allocation2 + $0x6c] ss:$16 sps:$4 sm:$0xff]  }
  0x8f   :  { %v10489_v14 = vld [vmem:[#allocation2 + $0x60] ss:$16 sps:$4 sm:$0xff]   ;;  %v10490_v15 = vld [vmem:[#allocation2 + $0x68] ss:$16 sps:$4 sm:$0xff]   ;;  %v10491_v16 = vld [vmem:[#allocation2 + $0x84] ss:$16 sps:$4 sm:$0xff]  }
  0x90   :  { %1765 = vmatpush1.bf16.msra.mxu0 %v10477_v6  ;;  %1937 = vmatpush1.bf16.msra.mxu1 %v10478_v7  ;;  %v10493_v17 = vld [vmem:[#allocation2 + $0x8c] ss:$16 sps:$4 sm:$0xff]   ;;  %v10495_v18 = vld [vmem:[#allocation2 + $0x80] ss:$16 sps:$4 sm:$0xff]   ;;  %v10496_v19 = vld [vmem:[#allocation2 + $0x88] ss:$16 sps:$4 sm:$0xff]  }
  0x91   :  { %1766 = vmatprep.subr.bf16.mxu0 %v10479_v8  ;;  %1938 = vmatprep.subr.bf16.mxu1 %v10481_v9  ;;  %v10497_v20 = vld [vmem:[#allocation2 + $0xa4] ss:$16 sps:$4 sm:$0xff]   ;;  %v10499_v21 = vld [vmem:[#allocation2 + $0xac] ss:$16 sps:$4 sm:$0xff]   ;;  %v10501_v22 = vld [vmem:[#allocation2 + $0xa0] ss:$16 sps:$4 sm:$0xff]  }
  0x92   :  { %v10502_v23 = vld [vmem:[#allocation2 + $0xa8] ss:$16 sps:$4 sm:$0xff]   ;;  %v10503_v24 = vld [vmem:[#allocation2 + $0xc4] ss:$16 sps:$4 sm:$0xff]   ;;  %v10505_v25 = vld [vmem:[#allocation2 + $0xcc] ss:$16 sps:$4 sm:$0xff]  }
  0x93   :  { %v10507_v26 = vld [vmem:[#allocation2 + $0xc0] ss:$16 sps:$4 sm:$0xff]   ;;  %v10508_v27 = vld [vmem:[#allocation2 + $0xc8] ss:$16 sps:$4 sm:$0xff]   ;;  %v10509_v28 = vld [vmem:[#allocation2 + $0xe4] ss:$16 sps:$4 sm:$0xff]  }
  0x94   :  { %1767 = vmatpush1.bf16.msra.mxu0 %v10483_v10  ;;  %1939 = vmatpush1.bf16.msra.mxu1 %v10484_v11  ;;  %v10511_v29 = vld [vmem:[#allocation2 + $0xec] ss:$16 sps:$4 sm:$0xff]   ;;  %v10513_v30 = vld [vmem:[#allocation2 + $0xe0] ss:$16 sps:$4 sm:$0xff]   ;;  %v10514_v31 = vld [vmem:[#allocation2 + $0xe8] ss:$16 sps:$4 sm:$0xff]  }
  0x95   :  { %1768 = vmatprep.subr.bf16.mxu0 %v10485_v12  ;;  %1940 = vmatprep.subr.bf16.mxu1 %v10487_v13  ;;  %v10515_v32 = vld [vmem:[#allocation2 + $0x104] ss:$16 sps:$4 sm:$0xff]   ;;  %v10517_v33 = vld [vmem:[#allocation2 + $0x10c] ss:$16 sps:$4 sm:$0xff]   ;;  %v10519_v34 = vld [vmem:[#allocation2 + $0x100] ss:$16 sps:$4 sm:$0xff]  }
  0x96   :  { %v10520_v35 = vld [vmem:[#allocation2 + $0x108] ss:$16 sps:$4 sm:$0xff]   ;;  %v10521_v36 = vld [vmem:[#allocation2 + $0x124] ss:$16 sps:$4 sm:$0xff]   ;;  %v10523_v37 = vld [vmem:[#allocation2 + $0x12c] ss:$16 sps:$4 sm:$0xff]  }
  0x97   :  { %v10525_v38 = vld [vmem:[#allocation2 + $0x120] ss:$16 sps:$4 sm:$0xff]   ;;  %v10526_v39 = vld [vmem:[#allocation2 + $0x128] ss:$16 sps:$4 sm:$0xff]   ;;  %v10527_v40 = vld [vmem:[#allocation2 + $0x144] ss:$16 sps:$4 sm:$0xff]  }
  0x98   :  { %1769 = vmatpush1.bf16.msra.mxu0 %v10489_v14  ;;  %1941 = vmatpush1.bf16.msra.mxu1 %v10490_v15  ;;  %v10529_v41 = vld [vmem:[#allocation2 + $0x14c] ss:$16 sps:$4 sm:$0xff]   ;;  %v10531_v42 = vld [vmem:[#allocation2 + $0x140] ss:$16 sps:$4 sm:$0xff]   ;;  %v10532_v43 = vld [vmem:[#allocation2 + $0x148] ss:$16 sps:$4 sm:$0xff]  }
  0x99   :  { %1770 = vmatprep.subr.bf16.mxu0 %v10491_v16  ;;  %1942 = vmatprep.subr.bf16.mxu1 %v10493_v17  ;;  %v10533_v44 = vld [vmem:[#allocation2 + $0x164] ss:$16 sps:$4 sm:$0xff]   ;;  %v10535_v45 = vld [vmem:[#allocation2 + $0x16c] ss:$16 sps:$4 sm:$0xff]   ;;  %s12823_s29 = sld [smem:[#allocation20_spill]]  ;;  %s12824_s7 = sld [smem:[#allocation21_spill]] }
  0x9a   :  { %v10537_v48 = vld [vmem:[#allocation2 + $0x160] ss:$16 sps:$4 sm:$0xff]   ;;  %v10538_v49 = vld [vmem:[#allocation2 + $0x168] ss:$16 sps:$4 sm:$0xff]   ;;  %v10539_v51 = vld [vmem:[#allocation2 + $0x184] ss:$16 sps:$4 sm:$0xff]  }
  0x9b   :  { %v10541_v52 = vld [vmem:[#allocation2 + $0x18c] ss:$16 sps:$4 sm:$0xff]   ;;  %v10543_v53 = vld [vmem:[#allocation2 + $0x180] ss:$16 sps:$4 sm:$0xff]   ;;  %v10544_v54 = vld [vmem:[#allocation2 + $0x188] ss:$16 sps:$4 sm:$0xff]  }
  0x9c   :  { %1771 = vmatpush1.bf16.msra.mxu0 %v10495_v18  ;;  %1943 = vmatpush1.bf16.msra.mxu1 %v10496_v19  ;;  %v10545_v55 = vld [vmem:[#allocation2 + $0x1a4] ss:$16 sps:$4 sm:$0xff]   ;;  %v10547_v56 = vld [vmem:[#allocation2 + $0x1ac] ss:$16 sps:$4 sm:$0xff]   ;;  %v10549_v57 = vld [vmem:[#allocation2 + $0x1a0] ss:$16 sps:$4 sm:$0xff]  }
  0x9d   :  { %1772 = vmatprep.subr.bf16.mxu0 %v10497_v20  ;;  %1944 = vmatprep.subr.bf16.mxu1 %v10499_v21  ;;  %v10550_v58 = vld [vmem:[#allocation2 + $0x1a8] ss:$16 sps:$4 sm:$0xff]   ;;  %v10551_v59 = vld [vmem:[#allocation2 + $0x1c4] ss:$16 sps:$4 sm:$0xff]   ;;  %v10553_v60 = vld [vmem:[#allocation2 + $0x1cc] ss:$16 sps:$4 sm:$0xff]  }
  0x9e   :  { %v10555_v61 = vld [vmem:[#allocation2 + $0x1c0] ss:$16 sps:$4 sm:$0xff]   ;;  %v10556_v62 = vld [vmem:[#allocation2 + $0x1c8] ss:$16 sps:$4 sm:$0xff]   ;;  %v10557_v63 = vld [vmem:[#allocation2 + $0x1e4] ss:$16 sps:$4 sm:$0xff]  }
  0x9f   :  { %v156_v46 = vld [vmem:[%s12823_s29] sm:$0xff]  ;;  %v10559_v0 = vld [vmem:[#allocation2 + $0x1ec] ss:$16 sps:$4 sm:$0xff]   ;;  %v10562_v2 = vld [vmem:[#allocation2 + $0x1e8] ss:$16 sps:$4 sm:$0xff]   ;;  %vm3091_vm0 = vcmask 130048  }
  0xa0   :  { %1773 = vmatpush1.bf16.msra.mxu0 %v10501_v22  ;;  %1945 = vmatpush1.bf16.msra.mxu1 %v10502_v23  ;;  %v160_v47 = vld [vmem:[%s12823_s29 + $0x20] sm:$0xff]  ;;  %v10568_v4 = vld [vmem:[#allocation2 + $0x20c] ss:$16 sps:$4 sm:$0xff]   ;;  %v10566_v7 = vld [vmem:[#allocation2 + $0x208] ss:$16 sps:$4 sm:$0xff]  }
  0xa1   :  { %1774 = vmatprep.subr.bf16.mxu0 %v10503_v24  ;;  %1946 = vmatprep.subr.bf16.mxu1 %v10505_v25  ;;  %v9108_v50 = vcombine.high %v156_v46, %v160_v47  ;;  %v10561_v1 = vld [vmem:[#allocation2 + $0x1e0] ss:$16 sps:$4 sm:$0xff]   ;;  %v10565_v3 = vld [vmem:[#allocation2 + $0x204] ss:$16 sps:$4 sm:$0xff]   ;;  %v9107_v5 = vcombine.low %v156_v46, %v160_v47  ;;  %v10574_v9 = vld [vmem:[#allocation2 + $0x22c] ss:$16 sps:$4 sm:$0xff]  }
  0xa2   :  { %v10563_v6 = vld [vmem:[#allocation2 + $0x200] ss:$16 sps:$4 sm:$0xff]   ;;  %v10571_v8 = vld [vmem:[#allocation2 + $0x224] ss:$16 sps:$4 sm:$0xff]   ;;  %v10572_v11 = vld [vmem:[#allocation2 + $0x228] ss:$16 sps:$4 sm:$0xff]  }
  0xa3   :  { %1794 = vmatprep.mubr.bf16.mxu0 %v9108_v50  ;;  %1966 = vmatprep.mubr.bf16.mxu1 %v9108_v50  ;;  %v10569_v10 = vld [vmem:[#allocation2 + $0x220] ss:$16 sps:$4 sm:$0xff]   ;;  %v10577_v12 = vld [vmem:[#allocation2 + $0x244] ss:$16 sps:$4 sm:$0xff]   ;;  %v10580_v13 = vld [vmem:[#allocation2 + $0x24c] ss:$16 sps:$4 sm:$0xff]  }
  0xa4   :  { %1775 = vmatpush1.bf16.msra.mxu0 %v10507_v26  ;;  %1947 = vmatpush1.bf16.msra.mxu1 %v10508_v27  ;;  %v10575_v14 = vld [vmem:[#allocation2 + $0x240] ss:$16 sps:$4 sm:$0xff]   ;;  %v10578_v15 = vld [vmem:[#allocation2 + $0x248] ss:$16 sps:$4 sm:$0xff]   ;;  %v10583_v16 = vld [vmem:[#allocation2 + $0x264] ss:$16 sps:$4 sm:$0xff]  }
  0xa5   :  { %1776 = vmatprep.subr.bf16.mxu0 %v10509_v28  ;;  %1948 = vmatprep.subr.bf16.mxu1 %v10511_v29  ;;  %v10586_v17 = vld [vmem:[#allocation2 + $0x26c] ss:$16 sps:$4 sm:$0xff]   ;;  %v10581_v18 = vld [vmem:[#allocation2 + $0x260] ss:$16 sps:$4 sm:$0xff]   ;;  %v10584_v19 = vld [vmem:[#allocation2 + $0x268] ss:$16 sps:$4 sm:$0xff]  }
  0xa6   :  { %v10589_v20 = vld [vmem:[#allocation2 + $0x284] ss:$16 sps:$4 sm:$0xff]   ;;  %v10592_v21 = vld [vmem:[#allocation2 + $0x28c] ss:$16 sps:$4 sm:$0xff]   ;;  %v10587_v22 = vld [vmem:[#allocation2 + $0x280] ss:$16 sps:$4 sm:$0xff]  }
  0xa7   :  { %v10590_v23 = vld [vmem:[#allocation2 + $0x288] ss:$16 sps:$4 sm:$0xff]   ;;  %v10595_v24 = vld [vmem:[#allocation2 + $0x2a4] ss:$16 sps:$4 sm:$0xff]   ;;  %v10598_v25 = vld [vmem:[#allocation2 + $0x2ac] ss:$16 sps:$4 sm:$0xff]  }
  0xa8   :  { %1777 = vmatpush1.bf16.msra.mxu0 %v10513_v30  ;;  %1949 = vmatpush1.bf16.msra.mxu1 %v10514_v31  ;;  %v10593_v26 = vld [vmem:[#allocation2 + $0x2a0] ss:$16 sps:$4 sm:$0xff]   ;;  %v10596_v27 = vld [vmem:[#allocation2 + $0x2a8] ss:$16 sps:$4 sm:$0xff]   ;;  %v10601_v28 = vld [vmem:[#allocation2 + $0x2c4] ss:$16 sps:$4 sm:$0xff]  }
  0xa9   :  { %1778 = vmatprep.subr.bf16.mxu0 %v10515_v32  ;;  %1950 = vmatprep.subr.bf16.mxu1 %v10517_v33  ;;  %v10604_v29 = vld [vmem:[#allocation2 + $0x2cc] ss:$16 sps:$4 sm:$0xff]   ;;  %v10599_v32 = vld [vmem:[#allocation2 + $0x2c0] ss:$16 sps:$4 sm:$0xff]   ;;  %v10602_v33 = vld [vmem:[#allocation2 + $0x2c8] ss:$16 sps:$4 sm:$0xff]  }
  0xaa   :  { %v12091_v30 = vld [vmem:[%s12823_s29 + $0x8] sm:$0xff]  ;;  %v10625_v47 = vld [vmem:[#allocation2 + $0x344] ss:$16 sps:$4 sm:$0xff]  }
  0xab   :  { %v12096_v31 = vld [vmem:[%s12823_s29 + $0x28] sm:$0xff] }
  0xac   :  { %1779 = vmatpush1.bf16.msra.mxu0 %v10519_v34  ;;  %1951 = vmatpush1.bf16.msra.mxu1 %v10520_v35  ;;  %v9110_v34 = vcombine.high %v12091_v30, %v12096_v31  ;;  %v10607_v35 = vld [vmem:[#allocation2 + $0x2e4] ss:$16 sps:$4 sm:$0xff]   ;;  %v10620_v46 = vld [vmem:[#allocation2 + $0x328] ss:$16 sps:$4 sm:$0xff]  }
  0xad   :  { %1780 = vmatprep.subr.bf16.mxu0 %v10521_v36  ;;  %1952 = vmatprep.subr.bf16.mxu1 %v10523_v37  ;;  %v10610_v36 = vld [vmem:[#allocation2 + $0x2ec] ss:$16 sps:$4 sm:$0xff]   ;;  %v10605_v37 = vld [vmem:[#allocation2 + $0x2e0] ss:$16 sps:$4 sm:$0xff]   ;;  %v10626_v50 = vld [vmem:[#allocation2 + $0x348] ss:$16 sps:$4 sm:$0xff]  }
  0xb0   :  { %1781 = vmatpush1.bf16.msra.mxu0 %v10525_v38  ;;  %1953 = vmatpush1.bf16.msra.mxu1 %v10526_v39  ;;  %v10608_v38 = vld [vmem:[#allocation2 + $0x2e8] ss:$16 sps:$4 sm:$0xff]   ;;  %v10613_v39 = vld [vmem:[#allocation2 + $0x304] ss:$16 sps:$4 sm:$0xff]  }
  0xb1   :  { %1782 = vmatprep.subr.bf16.mxu0 %v10527_v40  ;;  %1954 = vmatprep.subr.bf16.mxu1 %v10529_v41  ;;  %v10616_v40 = vld [vmem:[#allocation2 + $0x30c] ss:$16 sps:$4 sm:$0xff]   ;;  %v10611_v41 = vld [vmem:[#allocation2 + $0x300] ss:$16 sps:$4 sm:$0xff]  }
  0xb4   :  { %1783 = vmatpush1.bf16.msra.mxu0 %v10531_v42  ;;  %1955 = vmatpush1.bf16.msra.mxu1 %v10532_v43  ;;  %v10614_v42 = vld [vmem:[#allocation2 + $0x308] ss:$16 sps:$4 sm:$0xff]   ;;  %v10619_v43 = vld [vmem:[#allocation2 + $0x324] ss:$16 sps:$4 sm:$0xff]  }
  0xb5   :  { %1784 = vmatprep.subr.bf16.mxu0 %v10533_v44  ;;  %1956 = vmatprep.subr.bf16.mxu1 %v10535_v45  ;;  %v10622_v44 = vld [vmem:[#allocation2 + $0x32c] ss:$16 sps:$4 sm:$0xff]   ;;  %v10617_v45 = vld [vmem:[#allocation2 + $0x320] ss:$16 sps:$4 sm:$0xff]  }
  0xb8   :  { %1785 = vmatpush1.bf16.msra.mxu0 %v10537_v48  ;;  %1957 = vmatpush1.bf16.msra.mxu1 %v10538_v49  ;;  %v10628_v48 = vld [vmem:[#allocation2 + $0x34c] ss:$16 sps:$4 sm:$0xff]   ;;  %v10623_v49 = vld [vmem:[#allocation2 + $0x340] ss:$16 sps:$4 sm:$0xff]  }
  0xb9   :  { %1786 = vmatprep.subr.bf16.mxu0 %v10539_v51  ;;  %1958 = vmatprep.subr.bf16.mxu1 %v10541_v52  ;;  %v10631_v51 = vld [vmem:[#allocation2 + $0x364] ss:$16 sps:$4 sm:$0xff]   ;;  %v10634_v52 = vld [vmem:[#allocation2 + $0x36c] ss:$16 sps:$4 sm:$0xff]  }
  0xbc   :  { %1787 = vmatpush1.bf16.msra.mxu0 %v10543_v53  ;;  %1959 = vmatpush1.bf16.msra.mxu1 %v10544_v54  ;;  %v10629_v53 = vld [vmem:[#allocation2 + $0x360] ss:$16 sps:$4 sm:$0xff]   ;;  %v10632_v54 = vld [vmem:[#allocation2 + $0x368] ss:$16 sps:$4 sm:$0xff]  }
  0xbd   :  { %1788 = vmatprep.subr.bf16.mxu0 %v10545_v55  ;;  %1960 = vmatprep.subr.bf16.mxu1 %v10547_v56  ;;  %v10637_v55 = vld [vmem:[#allocation2 + $0x384] ss:$16 sps:$4 sm:$0xff]   ;;  %v10640_v56 = vld [vmem:[#allocation2 + $0x38c] ss:$16 sps:$4 sm:$0xff]  }
  0xc0   :  { %1789 = vmatpush1.bf16.msra.mxu0 %v10549_v57  ;;  %1961 = vmatpush1.bf16.msra.mxu1 %v10550_v58  ;;  %v10635_v57 = vld [vmem:[#allocation2 + $0x380] ss:$16 sps:$4 sm:$0xff]   ;;  %v10638_v58 = vld [vmem:[#allocation2 + $0x388] ss:$16 sps:$4 sm:$0xff]  }
  0xc1   :  { %1790 = vmatprep.subr.bf16.mxu0 %v10551_v59  ;;  %1962 = vmatprep.subr.bf16.mxu1 %v10553_v60  ;;  %v10643_v59 = vld [vmem:[#allocation2 + $0x3a4] ss:$16 sps:$4 sm:$0xff]   ;;  %v10646_v60 = vld [vmem:[#allocation2 + $0x3ac] ss:$16 sps:$4 sm:$0xff]  }
  0xc4   :  { %1791 = vmatpush1.bf16.msra.mxu0 %v10555_v61  ;;  %1963 = vmatpush1.bf16.msra.mxu1 %v10556_v62  ;;  %v10641_v61 = vld [vmem:[#allocation2 + $0x3a0] ss:$16 sps:$4 sm:$0xff]   ;;  %v10644_v62 = vld [vmem:[#allocation2 + $0x3a8] ss:$16 sps:$4 sm:$0xff]  }
  0xc5   :  { %1792 = vmatprep.subr.bf16.mxu0 %v10557_v63  ;;  %1964 = vmatprep.subr.bf16.mxu1 %v10559_v0  ;;  %v10649_v63 = vld [vmem:[#allocation2 + $0x3c4] ss:$16 sps:$4 sm:$0xff]   ;;  %v10652_v0 = vld [vmem:[#allocation2 + $0x3cc] ss:$16 sps:$4 sm:$0xff]  }
  0xc8   :  { %1793 = vmatpush1.bf16.msra.mxu0 %v10561_v1  ;;  %1965 = vmatpush1.bf16.msra.mxu1 %v10562_v2  ;;  %v10647_v1 = vld [vmem:[#allocation2 + $0x3c0] ss:$16 sps:$4 sm:$0xff]   ;;  %v10650_v2 = vld [vmem:[#allocation2 + $0x3c8] ss:$16 sps:$4 sm:$0xff]  }
  0xc9   :  { %1805 = vmatprep.subr.bf16.mxu0 %v10565_v3  ;;  %1977 = vmatprep.subr.bf16.mxu1 %v10568_v4  ;;  %v10655_v3 = vld [vmem:[#allocation2 + $0x3e4] ss:$16 sps:$4 sm:$0xff]   ;;  %v10658_v4 = vld [vmem:[#allocation2 + $0x3ec] ss:$16 sps:$4 sm:$0xff]  }
  0xcb   :  { %1795 = vmatmul.mubr.bf16.vlgmr.msra.gmra.mrb[0].mxu0 %v9107_v5  ;;  %1967 = vmatmul.mubr.bf16.vlgmr.msra.gmra.mrb[0].mxu1 %v9107_v5  ;;  %v10653_v5 = vld [vmem:[#allocation2 + $0x3e0] ss:$16 sps:$4 sm:$0xff]  }
  0xcc   :  { %1806 = vmatpush1.bf16.msra.mxu0 %v10563_v6  ;;  %1978 = vmatpush1.bf16.msra.mxu1 %v10566_v7  ;;  %v10656_v6 = vld [vmem:[#allocation2 + $0x3e8] ss:$16 sps:$4 sm:$0xff]   ;;  %v10661_v7 = vld [vmem:[#allocation2 + $0x404] ss:$16 sps:$4 sm:$0xff]  }
  0xcd   :  { %1807 = vmatprep.subr.bf16.mxu0 %v10571_v8  ;;  %1979 = vmatprep.subr.bf16.mxu1 %v10574_v9  ;;  %v10664_v8 = vld [vmem:[#allocation2 + $0x40c] ss:$16 sps:$4 sm:$0xff]   ;;  %v9109_v9 = vcombine.low %v12091_v30, %v12096_v31  ;;  %v10686_v30 = vld [vmem:[#allocation2 + $0x488] ss:$16 sps:$4 sm:$0xff]   ;;  %v10691_v31 = vld [vmem:[#allocation2 + $0x4a4] ss:$16 sps:$4 sm:$0xff]  }
  0xce   :  { %1837 = vmatprep.mubr.bf16.mxu0 %v9110_v34  ;;  %2009 = vmatprep.mubr.bf16.mxu1 %v9110_v34  ;;  %v10692_v34 = vld [vmem:[#allocation2 + $0x4a8] ss:$16 sps:$4 sm:$0xff]  }
  0xd0   :  { %1808 = vmatpush1.bf16.msra.mxu0 %v10569_v10  ;;  %1980 = vmatpush1.bf16.msra.mxu1 %v10572_v11  ;;  %v10659_v10 = vld [vmem:[#allocation2 + $0x400] ss:$16 sps:$4 sm:$0xff]   ;;  %v10662_v11 = vld [vmem:[#allocation2 + $0x408] ss:$16 sps:$4 sm:$0xff]  }
  0xd1   :  { %1809 = vmatprep.subr.bf16.mxu0 %v10577_v12  ;;  %1981 = vmatprep.subr.bf16.mxu1 %v10580_v13  ;;  %v10667_v12 = vld [vmem:[#allocation2 + $0x424] ss:$16 sps:$4 sm:$0xff]   ;;  %v10670_v13 = vld [vmem:[#allocation2 + $0x42c] ss:$16 sps:$4 sm:$0xff]  }
  0xd4   :  { %1810 = vmatpush1.bf16.msra.mxu0 %v10575_v14  ;;  %1982 = vmatpush1.bf16.msra.mxu1 %v10578_v15  ;;  %v12105_v14 = vld [vmem:[%s12823_s29 + $0x10] sm:$0xff] }
  0xd5   :  { %1811 = vmatprep.subr.bf16.mxu0 %v10583_v16  ;;  %1983 = vmatprep.subr.bf16.mxu1 %v10586_v17  ;;  %v12110_v15 = vld [vmem:[%s12823_s29 + $0x30] sm:$0xff] }
  0xd6   :  { %v9112_v16 = vcombine.high %v12105_v14, %v12110_v15  ;;  %v10665_v17 = vld [vmem:[#allocation2 + $0x420] ss:$16 sps:$4 sm:$0xff]  }
  0xd8   :  { %1812 = vmatpush1.bf16.msra.mxu0 %v10581_v18  ;;  %1984 = vmatpush1.bf16.msra.mxu1 %v10584_v19  ;;  %v10668_v18 = vld [vmem:[#allocation2 + $0x428] ss:$16 sps:$4 sm:$0xff]   ;;  %v10673_v19 = vld [vmem:[#allocation2 + $0x444] ss:$16 sps:$4 sm:$0xff]  }
  0xd9   :  { %1813 = vmatprep.subr.bf16.mxu0 %v10589_v20  ;;  %1985 = vmatprep.subr.bf16.mxu1 %v10592_v21  ;;  %v10676_v20 = vld [vmem:[#allocation2 + $0x44c] ss:$16 sps:$4 sm:$0xff]   ;;  %v10671_v21 = vld [vmem:[#allocation2 + $0x440] ss:$16 sps:$4 sm:$0xff]  }
  0xdc   :  { %1814 = vmatpush1.bf16.msra.mxu0 %v10587_v22  ;;  %1986 = vmatpush1.bf16.msra.mxu1 %v10590_v23  ;;  %v10674_v22 = vld [vmem:[#allocation2 + $0x448] ss:$16 sps:$4 sm:$0xff]   ;;  %v10679_v23 = vld [vmem:[#allocation2 + $0x464] ss:$16 sps:$4 sm:$0xff]  }
  0xdd   :  { %1815 = vmatprep.subr.bf16.mxu0 %v10595_v24  ;;  %1987 = vmatprep.subr.bf16.mxu1 %v10598_v25  ;;  %v10682_v24 = vld [vmem:[#allocation2 + $0x46c] ss:$16 sps:$4 sm:$0xff]   ;;  %v10677_v25 = vld [vmem:[#allocation2 + $0x460] ss:$16 sps:$4 sm:$0xff]  }
  0xe0   :  { %1816 = vmatpush1.bf16.msra.mxu0 %v10593_v26  ;;  %1988 = vmatpush1.bf16.msra.mxu1 %v10596_v27  ;;  %v10680_v26 = vld [vmem:[#allocation2 + $0x468] ss:$16 sps:$4 sm:$0xff]   ;;  %v10685_v27 = vld [vmem:[#allocation2 + $0x484] ss:$16 sps:$4 sm:$0xff]  }
  0xe1   :  { %1817 = vmatprep.subr.bf16.mxu0 %v10601_v28  ;;  %1989 = vmatprep.subr.bf16.mxu1 %v10604_v29  ;;  %v10688_v28 = vld [vmem:[#allocation2 + $0x48c] ss:$16 sps:$4 sm:$0xff]   ;;  %v10683_v29 = vld [vmem:[#allocation2 + $0x480] ss:$16 sps:$4 sm:$0xff]  }
  0xe4   :  { %1818 = vmatpush1.bf16.msra.mxu0 %v10599_v32  ;;  %1990 = vmatpush1.bf16.msra.mxu1 %v10602_v33  ;;  %v10694_v32 = vld [vmem:[#allocation2 + $0x4ac] ss:$16 sps:$4 sm:$0xff]   ;;  %v10689_v33 = vld [vmem:[#allocation2 + $0x4a0] ss:$16 sps:$4 sm:$0xff]  }
  0xe5   :  { %1819 = vmatprep.subr.bf16.mxu0 %v10607_v35  ;;  %1991 = vmatprep.subr.bf16.mxu1 %v10610_v36  ;;  %v10697_v35 = vld [vmem:[#allocation2 + $0x4c4] ss:$16 sps:$4 sm:$0xff]   ;;  %v10700_v36 = vld [vmem:[#allocation2 + $0x4cc] ss:$16 sps:$4 sm:$0xff]  }
  0xe8   :  { %1820 = vmatpush1.bf16.msra.mxu0 %v10605_v37  ;;  %1992 = vmatpush1.bf16.msra.mxu1 %v10608_v38  ;;  %v10695_v37 = vld [vmem:[#allocation2 + $0x4c0] ss:$16 sps:$4 sm:$0xff]   ;;  %v10698_v38 = vld [vmem:[#allocation2 + $0x4c8] ss:$16 sps:$4 sm:$0xff]  }
  0xe9   :  { %1821 = vmatprep.subr.bf16.mxu0 %v10613_v39  ;;  %1993 = vmatprep.subr.bf16.mxu1 %v10616_v40  ;;  %v10703_v39 = vld [vmem:[#allocation2 + $0x4e4] ss:$16 sps:$4 sm:$0xff]   ;;  %v10706_v40 = vld [vmem:[#allocation2 + $0x4ec] ss:$16 sps:$4 sm:$0xff]  }
  0xec   :  { %1822 = vmatpush1.bf16.msra.mxu0 %v10611_v41  ;;  %1994 = vmatpush1.bf16.msra.mxu1 %v10614_v42  ;;  %v10701_v41 = vld [vmem:[#allocation2 + $0x4e0] ss:$16 sps:$4 sm:$0xff]   ;;  %v10704_v42 = vld [vmem:[#allocation2 + $0x4e8] ss:$16 sps:$4 sm:$0xff]  }
  0xed   :  { %1823 = vmatprep.subr.bf16.mxu0 %v10619_v43  ;;  %1995 = vmatprep.subr.bf16.mxu1 %v10622_v44  ;;  %v10709_v43 = vld [vmem:[#allocation2 + $0x504] ss:$16 sps:$4 sm:$0xff]   ;;  %v10712_v44 = vld [vmem:[#allocation2 + $0x50c] ss:$16 sps:$4 sm:$0xff]  }
  0xf0   :  { %1824 = vmatpush1.bf16.msra.mxu0 %v10617_v45  ;;  %1996 = vmatpush1.bf16.msra.mxu1 %v10620_v46  ;;  %v10707_v45 = vld [vmem:[#allocation2 + $0x500] ss:$16 sps:$4 sm:$0xff]   ;;  %v10710_v46 = vld [vmem:[#allocation2 + $0x508] ss:$16 sps:$4 sm:$0xff]  }
  0xf1   :  { %1825 = vmatprep.subr.bf16.mxu0 %v10625_v47  ;;  %1997 = vmatprep.subr.bf16.mxu1 %v10628_v48  ;;  %v10715_v47 = vld [vmem:[#allocation2 + $0x524] ss:$16 sps:$4 sm:$0xff]   ;;  %v10718_v48 = vld [vmem:[#allocation2 + $0x52c] ss:$16 sps:$4 sm:$0xff]  }
  0xf4   :  { %1826 = vmatpush1.bf16.msra.mxu0 %v10623_v49  ;;  %1998 = vmatpush1.bf16.msra.mxu1 %v10626_v50  ;;  %v10713_v49 = vld [vmem:[#allocation2 + $0x520] ss:$16 sps:$4 sm:$0xff]   ;;  %v10716_v50 = vld [vmem:[#allocation2 + $0x528] ss:$16 sps:$4 sm:$0xff]  }
  0xf5   :  { %1827 = vmatprep.subr.bf16.mxu0 %v10631_v51  ;;  %1999 = vmatprep.subr.bf16.mxu1 %v10634_v52  ;;  %v10721_v51 = vld [vmem:[#allocation2 + $0x544] ss:$16 sps:$4 sm:$0xff]   ;;  %v10724_v52 = vld [vmem:[#allocation2 + $0x54c] ss:$16 sps:$4 sm:$0xff]  }
  0xf8   :  { %1828 = vmatpush1.bf16.msra.mxu0 %v10629_v53  ;;  %2000 = vmatpush1.bf16.msra.mxu1 %v10632_v54  ;;  %v10719_v53 = vld [vmem:[#allocation2 + $0x540] ss:$16 sps:$4 sm:$0xff]   ;;  %v10722_v54 = vld [vmem:[#allocation2 + $0x548] ss:$16 sps:$4 sm:$0xff]  }
  0xf9   :  { %1829 = vmatprep.subr.bf16.mxu0 %v10637_v55  ;;  %2001 = vmatprep.subr.bf16.mxu1 %v10640_v56  ;;  %v10727_v55 = vld [vmem:[#allocation2 + $0x564] ss:$16 sps:$4 sm:$0xff]   ;;  %v10730_v56 = vld [vmem:[#allocation2 + $0x56c] ss:$16 sps:$4 sm:$0xff]  }
  0xfc   :  { %1830 = vmatpush1.bf16.msra.mxu0 %v10635_v57  ;;  %2002 = vmatpush1.bf16.msra.mxu1 %v10638_v58  ;;  %v10725_v57 = vld [vmem:[#allocation2 + $0x560] ss:$16 sps:$4 sm:$0xff]   ;;  %v10728_v58 = vld [vmem:[#allocation2 + $0x568] ss:$16 sps:$4 sm:$0xff]  }
  0xfd   :  { %1831 = vmatprep.subr.bf16.mxu0 %v10643_v59  ;;  %2003 = vmatprep.subr.bf16.mxu1 %v10646_v60  ;;  %v10733_v59 = vld [vmem:[#allocation2 + $0x584] ss:$16 sps:$4 sm:$0xff]   ;;  %v10736_v60 = vld [vmem:[#allocation2 + $0x58c] ss:$16 sps:$4 sm:$0xff]  }
 0x100   :  { %1832 = vmatpush1.bf16.msra.mxu0 %v10641_v61  ;;  %2004 = vmatpush1.bf16.msra.mxu1 %v10644_v62  ;;  %v10731_v61 = vld [vmem:[#allocation2 + $0x580] ss:$16 sps:$4 sm:$0xff]   ;;  %v10734_v62 = vld [vmem:[#allocation2 + $0x588] ss:$16 sps:$4 sm:$0xff]  }
 0x101   :  { %1833 = vmatprep.subr.bf16.mxu0 %v10649_v63  ;;  %2005 = vmatprep.subr.bf16.mxu1 %v10652_v0  ;;  %v10739_v63 = vld [vmem:[#allocation2 + $0x5a4] ss:$16 sps:$4 sm:$0xff]   ;;  %v10742_v0 = vld [vmem:[#allocation2 + $0x5ac] ss:$16 sps:$4 sm:$0xff]  }
 0x104   :  { %1834 = vmatpush1.bf16.msra.mxu0 %v10647_v1  ;;  %2006 = vmatpush1.bf16.msra.mxu1 %v10650_v2  ;;  %v10737_v1 = vld [vmem:[#allocation2 + $0x5a0] ss:$16 sps:$4 sm:$0xff]   ;;  %v10740_v2 = vld [vmem:[#allocation2 + $0x5a8] ss:$16 sps:$4 sm:$0xff]  }
 0x105   :  { %1835 = vmatprep.subr.bf16.mxu0 %v10655_v3  ;;  %2007 = vmatprep.subr.bf16.mxu1 %v10658_v4  ;;  %v10745_v3 = vld [vmem:[#allocation2 + $0x5c4] ss:$16 sps:$4 sm:$0xff]   ;;  %v10748_v4 = vld [vmem:[#allocation2 + $0x5cc] ss:$16 sps:$4 sm:$0xff]  }
 0x108   :  { %1836 = vmatpush1.bf16.msra.mxu0 %v10653_v5  ;;  %2008 = vmatpush1.bf16.msra.mxu1 %v10656_v6  ;;  %v10743_v5 = vld [vmem:[#allocation2 + $0x5c0] ss:$16 sps:$4 sm:$0xff]   ;;  %v10746_v6 = vld [vmem:[#allocation2 + $0x5c8] ss:$16 sps:$4 sm:$0xff]  }
 0x109   :  { %1848 = vmatprep.subr.bf16.mxu0 %v10661_v7  ;;  %2020 = vmatprep.subr.bf16.mxu1 %v10664_v8  ;;  %v10751_v7 = vld [vmem:[#allocation2 + $0x5e4] ss:$16 sps:$4 sm:$0xff]   ;;  %v10754_v8 = vld [vmem:[#allocation2 + $0x5ec] ss:$16 sps:$4 sm:$0xff]  }
 0x10b   :  { %1838 = vmatmul.mubr.bf16.vlgmr.msra.gmra.mrb[0].mxu0 %v9109_v9  ;;  %2010 = vmatmul.mubr.bf16.vlgmr.msra.gmra.mrb[0].mxu1 %v9109_v9  ;;  %v10749_v9 = vld [vmem:[#allocation2 + $0x5e0] ss:$16 sps:$4 sm:$0xff]  }
 0x10c   :  { %1849 = vmatpush1.bf16.msra.mxu0 %v10659_v10  ;;  %2021 = vmatpush1.bf16.msra.mxu1 %v10662_v11  ;;  %v10752_v10 = vld [vmem:[#allocation2 + $0x5e8] ss:$16 sps:$4 sm:$0xff]   ;;  %v10757_v11 = vld [vmem:[#allocation2 + $0x604] ss:$16 sps:$4 sm:$0xff]  }
 0x10d   :  { %1850 = vmatprep.subr.bf16.mxu0 %v10667_v12  ;;  %2022 = vmatprep.subr.bf16.mxu1 %v10670_v13  ;;  %v10760_v12 = vld [vmem:[#allocation2 + $0x60c] ss:$16 sps:$4 sm:$0xff]   ;;  %v10755_v13 = vld [vmem:[#allocation2 + $0x600] ss:$16 sps:$4 sm:$0xff]  }
 0x10e   :  { %1880 = vmatprep.mubr.bf16.mxu0 %v9112_v16  ;;  %2052 = vmatprep.mubr.bf16.mxu1 %v9112_v16  ;;  %v10758_v16 = vld [vmem:[#allocation2 + $0x608] ss:$16 sps:$4 sm:$0xff]  }
 0x110   :  { %1851 = vmatpush1.bf16.msra.mxu0 %v10665_v17  ;;  %2023 = vmatpush1.bf16.msra.mxu1 %v10668_v18  ;;  %v9111_v17 = vcombine.low %v12105_v14, %v12110_v15  ;;  %v12119_v18 = vld [vmem:[%s12823_s29 + $0x18] sm:$0xff]  ;;  %v10761_v14 = vld [vmem:[#allocation2 + $0x620] ss:$16 sps:$4 sm:$0xff]  }
 0x111   :  { %1852 = vmatprep.subr.bf16.mxu0 %v10673_v19  ;;  %2024 = vmatprep.subr.bf16.mxu1 %v10676_v20  ;;  %v12124_v19 = vld [vmem:[%s12823_s29 + $0x38] sm:$0xff]  ;;  %v10763_v20 = vld [vmem:[#allocation2 + $0x624] ss:$16 sps:$4 sm:$0xff]   ;;  %s11870_s29 = smov [#allocation14]  }
 0x112   :  { %v10764_v15 = vld [vmem:[#allocation2 + $0x628] ss:$16 sps:$4 sm:$0xff]  }
 0x114   :  { %1853 = vmatpush1.bf16.msra.mxu0 %v10671_v21  ;;  %2025 = vmatpush1.bf16.msra.mxu1 %v10674_v22  ;;  %v10766_v21 = vld [vmem:[#allocation2 + $0x62c] ss:$16 sps:$4 sm:$0xff]   ;;  %v9114_v22 = vcombine.high %v12119_v18, %v12124_v19 }
 0x115   :  { %1854 = vmatprep.subr.bf16.mxu0 %v10679_v23  ;;  %2026 = vmatprep.subr.bf16.mxu1 %v10682_v24  ;;  %v10769_v23 = vld [vmem:[#allocation2 + $0x644] ss:$16 sps:$4 sm:$0xff]   ;;  %v10772_v24 = vld [vmem:[#allocation2 + $0x64c] ss:$16 sps:$4 sm:$0xff]  }
 0x118   :  { %1855 = vmatpush1.bf16.msra.mxu0 %v10677_v25  ;;  %2027 = vmatpush1.bf16.msra.mxu1 %v10680_v26  ;;  %v10767_v25 = vld [vmem:[#allocation2 + $0x640] ss:$16 sps:$4 sm:$0xff]   ;;  %v10770_v26 = vld [vmem:[#allocation2 + $0x648] ss:$16 sps:$4 sm:$0xff]  }
 0x119   :  { %1856 = vmatprep.subr.bf16.mxu0 %v10685_v27  ;;  %2028 = vmatprep.subr.bf16.mxu1 %v10688_v28  ;;  %v10775_v27 = vld [vmem:[#allocation2 + $0x664] ss:$16 sps:$4 sm:$0xff]   ;;  %v10778_v28 = vld [vmem:[#allocation2 + $0x66c] ss:$16 sps:$4 sm:$0xff]  }
 0x11c   :  { %1857 = vmatpush1.bf16.msra.mxu0 %v10683_v29  ;;  %2029 = vmatpush1.bf16.msra.mxu1 %v10686_v30  ;;  %v10773_v29 = vld [vmem:[#allocation2 + $0x660] ss:$16 sps:$4 sm:$0xff]   ;;  %v10776_v30 = vld [vmem:[#allocation2 + $0x668] ss:$16 sps:$4 sm:$0xff]  }
 0x11d   :  { %1858 = vmatprep.subr.bf16.mxu0 %v10691_v31  ;;  %2030 = vmatprep.subr.bf16.mxu1 %v10694_v32  ;;  %v10781_v31 = vld [vmem:[#allocation2 + $0x684] ss:$16 sps:$4 sm:$0xff]   ;;  %v10784_v32 = vld [vmem:[#allocation2 + $0x68c] ss:$16 sps:$4 sm:$0xff]  }
 0x120   :  { %1859 = vmatpush1.bf16.msra.mxu0 %v10689_v33  ;;  %2031 = vmatpush1.bf16.msra.mxu1 %v10692_v34  ;;  %v10779_v33 = vld [vmem:[#allocation2 + $0x680] ss:$16 sps:$4 sm:$0xff]   ;;  %v10782_v34 = vld [vmem:[#allocation2 + $0x688] ss:$16 sps:$4 sm:$0xff]  }
 0x121   :  { %1860 = vmatprep.subr.bf16.mxu0 %v10697_v35  ;;  %2032 = vmatprep.subr.bf16.mxu1 %v10700_v36  ;;  %v10787_v35 = vld [vmem:[#allocation2 + $0x6a4] ss:$16 sps:$4 sm:$0xff]   ;;  %v10790_v36 = vld [vmem:[#allocation2 + $0x6ac] ss:$16 sps:$4 sm:$0xff]  }
 0x124   :  { %1861 = vmatpush1.bf16.msra.mxu0 %v10695_v37  ;;  %2033 = vmatpush1.bf16.msra.mxu1 %v10698_v38  ;;  %v10785_v37 = vld [vmem:[#allocation2 + $0x6a0] ss:$16 sps:$4 sm:$0xff]   ;;  %v10788_v38 = vld [vmem:[#allocation2 + $0x6a8] ss:$16 sps:$4 sm:$0xff]  }
 0x125   :  { %1862 = vmatprep.subr.bf16.mxu0 %v10703_v39  ;;  %2034 = vmatprep.subr.bf16.mxu1 %v10706_v40  ;;  %v10793_v39 = vld [vmem:[#allocation2 + $0x6c4] ss:$16 sps:$4 sm:$0xff]   ;;  %v10796_v40 = vld [vmem:[#allocation2 + $0x6cc] ss:$16 sps:$4 sm:$0xff]  }
 0x128   :  { %1863 = vmatpush1.bf16.msra.mxu0 %v10701_v41  ;;  %2035 = vmatpush1.bf16.msra.mxu1 %v10704_v42  ;;  %v10791_v41 = vld [vmem:[#allocation2 + $0x6c0] ss:$16 sps:$4 sm:$0xff]   ;;  %v10794_v42 = vld [vmem:[#allocation2 + $0x6c8] ss:$16 sps:$4 sm:$0xff]  }
 0x129   :  { %1864 = vmatprep.subr.bf16.mxu0 %v10709_v43  ;;  %2036 = vmatprep.subr.bf16.mxu1 %v10712_v44  ;;  %v10799_v43 = vld [vmem:[#allocation2 + $0x6e4] ss:$16 sps:$4 sm:$0xff]   ;;  %v10802_v44 = vld [vmem:[#allocation2 + $0x6ec] ss:$16 sps:$4 sm:$0xff]  }
 0x12c   :  { %1865 = vmatpush1.bf16.msra.mxu0 %v10707_v45  ;;  %2037 = vmatpush1.bf16.msra.mxu1 %v10710_v46  ;;  %v10797_v45 = vld [vmem:[#allocation2 + $0x6e0] ss:$16 sps:$4 sm:$0xff]   ;;  %v10800_v46 = vld [vmem:[#allocation2 + $0x6e8] ss:$16 sps:$4 sm:$0xff]  }
 0x12d   :  { %1866 = vmatprep.subr.bf16.mxu0 %v10715_v47  ;;  %2038 = vmatprep.subr.bf16.mxu1 %v10718_v48  ;;  %v10805_v47 = vld [vmem:[#allocation2 + $0x704] ss:$16 sps:$4 sm:$0xff]   ;;  %v10808_v48 = vld [vmem:[#allocation2 + $0x70c] ss:$16 sps:$4 sm:$0xff]  }
 0x130   :  { %1867 = vmatpush1.bf16.msra.mxu0 %v10713_v49  ;;  %2039 = vmatpush1.bf16.msra.mxu1 %v10716_v50  ;;  %v10803_v49 = vld [vmem:[#allocation2 + $0x700] ss:$16 sps:$4 sm:$0xff]   ;;  %v10806_v50 = vld [vmem:[#allocation2 + $0x708] ss:$16 sps:$4 sm:$0xff]  }
 0x131   :  { %1868 = vmatprep.subr.bf16.mxu0 %v10721_v51  ;;  %2040 = vmatprep.subr.bf16.mxu1 %v10724_v52  ;;  %v10811_v51 = vld [vmem:[#allocation2 + $0x724] ss:$16 sps:$4 sm:$0xff]   ;;  %v10814_v52 = vld [vmem:[#allocation2 + $0x72c] ss:$16 sps:$4 sm:$0xff]  }
 0x134   :  { %1869 = vmatpush1.bf16.msra.mxu0 %v10719_v53  ;;  %2041 = vmatpush1.bf16.msra.mxu1 %v10722_v54  ;;  %v10809_v53 = vld [vmem:[#allocation2 + $0x720] ss:$16 sps:$4 sm:$0xff]   ;;  %v10812_v54 = vld [vmem:[#allocation2 + $0x728] ss:$16 sps:$4 sm:$0xff]  }
 0x135   :  { %1870 = vmatprep.subr.bf16.mxu0 %v10727_v55  ;;  %2042 = vmatprep.subr.bf16.mxu1 %v10730_v56  ;;  %v10817_v55 = vld [vmem:[#allocation2 + $0x744] ss:$16 sps:$4 sm:$0xff]   ;;  %v10820_v56 = vld [vmem:[#allocation2 + $0x74c] ss:$16 sps:$4 sm:$0xff]  }
 0x138   :  { %1871 = vmatpush1.bf16.msra.mxu0 %v10725_v57  ;;  %2043 = vmatpush1.bf16.msra.mxu1 %v10728_v58  ;;  %v10815_v57 = vld [vmem:[#allocation2 + $0x740] ss:$16 sps:$4 sm:$0xff]   ;;  %v10818_v58 = vld [vmem:[#allocation2 + $0x748] ss:$16 sps:$4 sm:$0xff]  }
 0x139   :  { %1872 = vmatprep.subr.bf16.mxu0 %v10733_v59  ;;  %2044 = vmatprep.subr.bf16.mxu1 %v10736_v60  ;;  %v10823_v59 = vld [vmem:[#allocation2 + $0x764] ss:$16 sps:$4 sm:$0xff]   ;;  %v10826_v60 = vld [vmem:[#allocation2 + $0x76c] ss:$16 sps:$4 sm:$0xff]  }
 0x13c   :  { %1873 = vmatpush1.bf16.msra.mxu0 %v10731_v61  ;;  %2045 = vmatpush1.bf16.msra.mxu1 %v10734_v62  ;;  %v10821_v61 = vld [vmem:[#allocation2 + $0x760] ss:$16 sps:$4 sm:$0xff]   ;;  %v10824_v62 = vld [vmem:[#allocation2 + $0x768] ss:$16 sps:$4 sm:$0xff]  }
 0x13d   :  { %1874 = vmatprep.subr.bf16.mxu0 %v10739_v63  ;;  %2046 = vmatprep.subr.bf16.mxu1 %v10742_v0  ;;  %v10829_v63 = vld [vmem:[#allocation2 + $0x784] ss:$16 sps:$4 sm:$0xff]   ;;  %v10832_v0 = vld [vmem:[#allocation2 + $0x78c] ss:$16 sps:$4 sm:$0xff]  }
 0x140   :  { %1875 = vmatpush1.bf16.msra.mxu0 %v10737_v1  ;;  %2047 = vmatpush1.bf16.msra.mxu1 %v10740_v2  ;;  %v10827_v1 = vld [vmem:[#allocation2 + $0x780] ss:$16 sps:$4 sm:$0xff]   ;;  %v10830_v2 = vld [vmem:[#allocation2 + $0x788] ss:$16 sps:$4 sm:$0xff]  }
 0x141   :  { %1876 = vmatprep.subr.bf16.mxu0 %v10745_v3  ;;  %2048 = vmatprep.subr.bf16.mxu1 %v10748_v4  ;;  %v10835_v3 = vld [vmem:[#allocation2 + $0x7a4] ss:$16 sps:$4 sm:$0xff]   ;;  %v10838_v4 = vld [vmem:[#allocation2 + $0x7ac] ss:$16 sps:$4 sm:$0xff]  }
 0x144   :  { %1877 = vmatpush1.bf16.msra.mxu0 %v10743_v5  ;;  %2049 = vmatpush1.bf16.msra.mxu1 %v10746_v6  ;;  %v10833_v5 = vld [vmem:[#allocation2 + $0x7a0] ss:$16 sps:$4 sm:$0xff]   ;;  %v10836_v6 = vld [vmem:[#allocation2 + $0x7a8] ss:$16 sps:$4 sm:$0xff]  }
 0x145   :  { %1878 = vmatprep.subr.bf16.mxu0 %v10751_v7  ;;  %2050 = vmatprep.subr.bf16.mxu1 %v10754_v8  ;;  %v10841_v7 = vld [vmem:[#allocation2 + $0x7c4] ss:$16 sps:$4 sm:$0xff]   ;;  %v10844_v8 = vld [vmem:[#allocation2 + $0x7cc] ss:$16 sps:$4 sm:$0xff]  }
 0x148   :  { %1879 = vmatpush1.bf16.msra.mxu0 %v10749_v9  ;;  %2051 = vmatpush1.bf16.msra.mxu1 %v10752_v10  ;;  %v10839_v9 = vld [vmem:[#allocation2 + $0x7c0] ss:$16 sps:$4 sm:$0xff]   ;;  %v10842_v10 = vld [vmem:[#allocation2 + $0x7c8] ss:$16 sps:$4 sm:$0xff]  }
 0x149   :  { %1891 = vmatprep.subr.bf16.mxu0 %v10757_v11  ;;  %2063 = vmatprep.subr.bf16.mxu1 %v10760_v12  ;;  %v10847_v11 = vld [vmem:[#allocation2 + $0x7e4] ss:$16 sps:$4 sm:$0xff]   ;;  %v10850_v12 = vld [vmem:[#allocation2 + $0x7ec] ss:$16 sps:$4 sm:$0xff]  }
 0x14b   :  { %1881 = vmatmul.mubr.bf16.vlgmr.msra.gmra.mrb[0].mxu0 %v9111_v17  ;;  %2053 = vmatmul.mubr.bf16.vlgmr.msra.gmra.mrb[0].mxu1 %v9111_v17  ;;  %v10853_v17 = vld [vmem:[%s12794_s4 + $0x4] ss:$16 sps:$4 sm:$0xff]  }
 0x14c   :  { %1892 = vmatpush1.bf16.msra.mxu0 %v10755_v13  ;;  %2064 = vmatpush1.bf16.msra.mxu1 %v10758_v16  ;;  %v10845_v13 = vld [vmem:[#allocation2 + $0x7e0] ss:$16 sps:$4 sm:$0xff]   ;;  %v10848_v16 = vld [vmem:[#allocation2 + $0x7e8] ss:$16 sps:$4 sm:$0xff]  }
 0x14d   :  { %1893 = vmatprep.subr.bf16.mxu0 %v10763_v20  ;;  %2065 = vmatprep.subr.bf16.mxu1 %v10766_v21  ;;  %v10856_v20 = vld [vmem:[%s12794_s4 + $0xc] ss:$16 sps:$4 sm:$0xff]   ;;  %v10851_v21 = vld [vmem:[%s12794_s4] ss:$16 sps:$4 sm:$0xff]  }
 0x14e   :  { %1923 = vmatprep.mubr.bf16.mxu0 %v9114_v22  ;;  %2095 = vmatprep.mubr.bf16.mxu1 %v9114_v22  ;;  %v10854_v22 = vld [vmem:[%s12794_s4 + $0x8] ss:$16 sps:$4 sm:$0xff]  }
 0x150   :  { %1894 = vmatpush1.bf16.msra.mxu0 %v10761_v14  ;;  %2066 = vmatpush1.bf16.msra.mxu1 %v10764_v15  ;;  %v9113_v14 = vcombine.low %v12119_v18, %v12124_v19  ;;  %v10859_v15 = vld [vmem:[%s12794_s4 + $0x24] ss:$16 sps:$4 sm:$0xff]   ;;  %v10860_v18 = vld [vmem:[%s12794_s4 + $0x28] ss:$16 sps:$4 sm:$0xff]  }
 0x151   :  { %1895 = vmatprep.subr.bf16.mxu0 %v10769_v23  ;;  %2067 = vmatprep.subr.bf16.mxu1 %v10772_v24  ;;  %v10862_v23 = vld [vmem:[%s12794_s4 + $0x2c] ss:$16 sps:$4 sm:$0xff]   ;;  %v10857_v24 = vld [vmem:[%s12794_s4 + $0x20] ss:$16 sps:$4 sm:$0xff]   ;;  %v10865_v19 = vld [vmem:[%s12794_s4 + $0x44] ss:$16 sps:$4 sm:$0xff]  }
 0x154   :  { %1896 = vmatpush1.bf16.msra.mxu0 %v10767_v25  ;;  %2068 = vmatpush1.bf16.msra.mxu1 %v10770_v26  ;;  %v10868_v25 = vld [vmem:[%s12794_s4 + $0x4c] ss:$16 sps:$4 sm:$0xff]   ;;  %v10863_v26 = vld [vmem:[%s12794_s4 + $0x40] ss:$16 sps:$4 sm:$0xff]  }
 0x155   :  { %1897 = vmatprep.subr.bf16.mxu0 %v10775_v27  ;;  %2069 = vmatprep.subr.bf16.mxu1 %v10778_v28  ;;  %v10866_v27 = vld [vmem:[%s12794_s4 + $0x48] ss:$16 sps:$4 sm:$0xff]   ;;  %v10871_v28 = vld [vmem:[%s12794_s4 + $0x64] ss:$16 sps:$4 sm:$0xff]  }
 0x158   :  { %1898 = vmatpush1.bf16.msra.mxu0 %v10773_v29  ;;  %2070 = vmatpush1.bf16.msra.mxu1 %v10776_v30  ;;  %v10874_v29 = vld [vmem:[%s12794_s4 + $0x6c] ss:$16 sps:$4 sm:$0xff]   ;;  %v10869_v30 = vld [vmem:[%s12794_s4 + $0x60] ss:$16 sps:$4 sm:$0xff]  }
 0x159   :  { %1899 = vmatprep.subr.bf16.mxu0 %v10781_v31  ;;  %2071 = vmatprep.subr.bf16.mxu1 %v10784_v32  ;;  %v10872_v31 = vld [vmem:[%s12794_s4 + $0x68] ss:$16 sps:$4 sm:$0xff]   ;;  %v10877_v32 = vld [vmem:[%s12794_s4 + $0x84] ss:$16 sps:$4 sm:$0xff]  }
 0x15c   :  { %1900 = vmatpush1.bf16.msra.mxu0 %v10779_v33  ;;  %2072 = vmatpush1.bf16.msra.mxu1 %v10782_v34  ;;  %v10880_v33 = vld [vmem:[%s12794_s4 + $0x8c] ss:$16 sps:$4 sm:$0xff]   ;;  %v10875_v34 = vld [vmem:[%s12794_s4 + $0x80] ss:$16 sps:$4 sm:$0xff]  }
 0x15d   :  { %1901 = vmatprep.subr.bf16.mxu0 %v10787_v35  ;;  %2073 = vmatprep.subr.bf16.mxu1 %v10790_v36  ;;  %v10878_v35 = vld [vmem:[%s12794_s4 + $0x88] ss:$16 sps:$4 sm:$0xff]   ;;  %v10883_v36 = vld [vmem:[%s12794_s4 + $0xa4] ss:$16 sps:$4 sm:$0xff]  }
 0x160   :  { %1902 = vmatpush1.bf16.msra.mxu0 %v10785_v37  ;;  %2074 = vmatpush1.bf16.msra.mxu1 %v10788_v38  ;;  %v10886_v37 = vld [vmem:[%s12794_s4 + $0xac] ss:$16 sps:$4 sm:$0xff]   ;;  %v10881_v38 = vld [vmem:[%s12794_s4 + $0xa0] ss:$16 sps:$4 sm:$0xff]  }
 0x161   :  { %1903 = vmatprep.subr.bf16.mxu0 %v10793_v39  ;;  %2075 = vmatprep.subr.bf16.mxu1 %v10796_v40  ;;  %v10884_v39 = vld [vmem:[%s12794_s4 + $0xa8] ss:$16 sps:$4 sm:$0xff]   ;;  %v10889_v40 = vld [vmem:[%s12794_s4 + $0xc4] ss:$16 sps:$4 sm:$0xff]  }
 0x164   :  { %1904 = vmatpush1.bf16.msra.mxu0 %v10791_v41  ;;  %2076 = vmatpush1.bf16.msra.mxu1 %v10794_v42  ;;  %v10892_v41 = vld [vmem:[%s12794_s4 + $0xcc] ss:$16 sps:$4 sm:$0xff]   ;;  %v10887_v42 = vld [vmem:[%s12794_s4 + $0xc0] ss:$16 sps:$4 sm:$0xff]  }
 0x165   :  { %1905 = vmatprep.subr.bf16.mxu0 %v10799_v43  ;;  %2077 = vmatprep.subr.bf16.mxu1 %v10802_v44  ;;  %v10890_v43 = vld [vmem:[%s12794_s4 + $0xc8] ss:$16 sps:$4 sm:$0xff]   ;;  %v10895_v44 = vld [vmem:[%s12794_s4 + $0xe4] ss:$16 sps:$4 sm:$0xff]  }
 0x168   :  { %1906 = vmatpush1.bf16.msra.mxu0 %v10797_v45  ;;  %2078 = vmatpush1.bf16.msra.mxu1 %v10800_v46  ;;  %v10898_v45 = vld [vmem:[%s12794_s4 + $0xec] ss:$16 sps:$4 sm:$0xff]   ;;  %v10893_v46 = vld [vmem:[%s12794_s4 + $0xe0] ss:$16 sps:$4 sm:$0xff]  }
 0x169   :  { %1907 = vmatprep.subr.bf16.mxu0 %v10805_v47  ;;  %2079 = vmatprep.subr.bf16.mxu1 %v10808_v48  ;;  %v10896_v47 = vld [vmem:[%s12794_s4 + $0xe8] ss:$16 sps:$4 sm:$0xff]   ;;  %v10901_v48 = vld [vmem:[%s12794_s4 + $0x104] ss:$16 sps:$4 sm:$0xff]  }
 0x16c   :  { %1908 = vmatpush1.bf16.msra.mxu0 %v10803_v49  ;;  %2080 = vmatpush1.bf16.msra.mxu1 %v10806_v50  ;;  %v10904_v49 = vld [vmem:[%s12794_s4 + $0x10c] ss:$16 sps:$4 sm:$0xff]   ;;  %v10899_v50 = vld [vmem:[%s12794_s4 + $0x100] ss:$16 sps:$4 sm:$0xff]  }
 0x16d   :  { %1909 = vmatprep.subr.bf16.mxu0 %v10811_v51  ;;  %2081 = vmatprep.subr.bf16.mxu1 %v10814_v52  ;;  %v10902_v51 = vld [vmem:[%s12794_s4 + $0x108] ss:$16 sps:$4 sm:$0xff]   ;;  %v10907_v52 = vld [vmem:[%s12794_s4 + $0x124] ss:$16 sps:$4 sm:$0xff]  }
 0x170   :  { %1910 = vmatpush1.bf16.msra.mxu0 %v10809_v53  ;;  %2082 = vmatpush1.bf16.msra.mxu1 %v10812_v54  ;;  %v10910_v53 = vld [vmem:[%s12794_s4 + $0x12c] ss:$16 sps:$4 sm:$0xff]   ;;  %v10905_v54 = vld [vmem:[%s12794_s4 + $0x120] ss:$16 sps:$4 sm:$0xff]  }
 0x171   :  { %1911 = vmatprep.subr.bf16.mxu0 %v10817_v55  ;;  %2083 = vmatprep.subr.bf16.mxu1 %v10820_v56  ;;  %v10908_v55 = vld [vmem:[%s12794_s4 + $0x128] ss:$16 sps:$4 sm:$0xff]   ;;  %v10913_v56 = vld [vmem:[%s12794_s4 + $0x144] ss:$16 sps:$4 sm:$0xff]  }
 0x174   :  { %1912 = vmatpush1.bf16.msra.mxu0 %v10815_v57  ;;  %2084 = vmatpush1.bf16.msra.mxu1 %v10818_v58  ;;  %v10916_v57 = vld [vmem:[%s12794_s4 + $0x14c] ss:$16 sps:$4 sm:$0xff]   ;;  %v10911_v58 = vld [vmem:[%s12794_s4 + $0x140] ss:$16 sps:$4 sm:$0xff]  }
 0x175   :  { %1913 = vmatprep.subr.bf16.mxu0 %v10823_v59  ;;  %2085 = vmatprep.subr.bf16.mxu1 %v10826_v60  ;;  %v10914_v59 = vld [vmem:[%s12794_s4 + $0x148] ss:$16 sps:$4 sm:$0xff]   ;;  %v10919_v60 = vld [vmem:[%s12794_s4 + $0x164] ss:$16 sps:$4 sm:$0xff]  }
 0x178   :  { %1914 = vmatpush1.bf16.msra.mxu0 %v10821_v61  ;;  %2086 = vmatpush1.bf16.msra.mxu1 %v10824_v62  ;;  %v10922_v61 = vld [vmem:[%s12794_s4 + $0x16c] ss:$16 sps:$4 sm:$0xff]   ;;  %v10917_v62 = vld [vmem:[%s12794_s4 + $0x160] ss:$16 sps:$4 sm:$0xff]  }
 0x179   :  { %1915 = vmatprep.subr.bf16.mxu0 %v10829_v63  ;;  %2087 = vmatprep.subr.bf16.mxu1 %v10832_v0  ;;  %v10920_v63 = vld [vmem:[%s12794_s4 + $0x168] ss:$16 sps:$4 sm:$0xff]   ;;  %v10925_v0 = vld [vmem:[%s12794_s4 + $0x184] ss:$16 sps:$4 sm:$0xff]  }
 0x17c   :  { %1916 = vmatpush1.bf16.msra.mxu0 %v10827_v1  ;;  %2088 = vmatpush1.bf16.msra.mxu1 %v10830_v2  ;;  %v10928_v1 = vld [vmem:[%s12794_s4 + $0x18c] ss:$16 sps:$4 sm:$0xff]   ;;  %v10923_v2 = vld [vmem:[%s12794_s4 + $0x180] ss:$16 sps:$4 sm:$0xff]  }
 0x17d   :  { %1917 = vmatprep.subr.bf16.mxu0 %v10835_v3  ;;  %2089 = vmatprep.subr.bf16.mxu1 %v10838_v4  ;;  %v10926_v3 = vld [vmem:[%s12794_s4 + $0x188] ss:$16 sps:$4 sm:$0xff]   ;;  %v10931_v4 = vld [vmem:[%s12794_s4 + $0x1a4] ss:$16 sps:$4 sm:$0xff]  }
 0x180   :  { %1918 = vmatpush1.bf16.msra.mxu0 %v10833_v5  ;;  %2090 = vmatpush1.bf16.msra.mxu1 %v10836_v6  ;;  %v10934_v5 = vld [vmem:[%s12794_s4 + $0x1ac] ss:$16 sps:$4 sm:$0xff]   ;;  %v10929_v6 = vld [vmem:[%s12794_s4 + $0x1a0] ss:$16 sps:$4 sm:$0xff]  }
 0x181   :  { %1919 = vmatprep.subr.bf16.mxu0 %v10841_v7  ;;  %2091 = vmatprep.subr.bf16.mxu1 %v10844_v8  ;;  %v10932_v7 = vld [vmem:[%s12794_s4 + $0x1a8] ss:$16 sps:$4 sm:$0xff]   ;;  %v10937_v8 = vld [vmem:[%s12794_s4 + $0x1c4] ss:$16 sps:$4 sm:$0xff]  }
 0x184   :  { %1920 = vmatpush1.bf16.msra.mxu0 %v10839_v9  ;;  %2092 = vmatpush1.bf16.msra.mxu1 %v10842_v10  ;;  %v10940_v9 = vld [vmem:[%s12794_s4 + $0x1cc] ss:$16 sps:$4 sm:$0xff]   ;;  %v10935_v10 = vld [vmem:[%s12794_s4 + $0x1c0] ss:$16 sps:$4 sm:$0xff]  }
 0x185   :  { %1921 = vmatprep.subr.bf16.mxu0 %v10847_v11  ;;  %2093 = vmatprep.subr.bf16.mxu1 %v10850_v12  ;;  %v10938_v11 = vld [vmem:[%s12794_s4 + $0x1c8] ss:$16 sps:$4 sm:$0xff]   ;;  %v10943_v12 = vld [vmem:[%s12794_s4 + $0x1e4] ss:$16 sps:$4 sm:$0xff]  }
 0x188   :  { %1922 = vmatpush1.bf16.msra.mxu0 %v10845_v13  ;;  %2094 = vmatpush1.bf16.msra.mxu1 %v10848_v16  ;;  %v10946_v13 = vld [vmem:[%s12794_s4 + $0x1ec] ss:$16 sps:$4 sm:$0xff]   ;;  %v10941_v16 = vld [vmem:[%s12794_s4 + $0x1e0] ss:$16 sps:$4 sm:$0xff]  }
 0x189   :  { %2908 = vmatprep.subr.bf16.mxu0 %v10853_v17  ;;  %2994 = vmatprep.subr.bf16.mxu1 %v10856_v20  ;;  %v10944_v17 = vld [vmem:[%s12794_s4 + $0x1e8] ss:$16 sps:$4 sm:$0xff]   ;;  %v10949_v20 = vld [vmem:[%s12794_s4 + $0x204] ss:$16 sps:$4 sm:$0xff]  }
 0x18b   :  { %1924 = vmatmul.mubr.bf16.vlgmr.msra.gmra.mrb[0].mxu0 %v9113_v14  ;;  %2096 = vmatmul.mubr.bf16.vlgmr.msra.gmra.mrb[0].mxu1 %v9113_v14 }
 0x18c   :  { %2909 = vmatpush1.bf16.msra.mxu0 %v10851_v21  ;;  %2995 = vmatpush1.bf16.msra.mxu1 %v10854_v22  ;;  %v10952_v21 = vld [vmem:[%s12794_s4 + $0x20c] ss:$16 sps:$4 sm:$0xff]   ;;  %v422_v22 = vlaneseq }
 0x18d   :  { %2910 = vmatprep.subr.bf16.mxu0 %v10859_v15  ;;  %2996 = vmatprep.subr.bf16.mxu1 %v10862_v23 }
 0x18e   :  { %v12328_v14 = vshrl.u32 %v422_v22, 7  ;;  %v10986_v22 = vld [vmem:[%s12794_s4 + $0x2c8] ss:$16 sps:$4 sm:$0xff]  }
 0x190   :  { %2911 = vmatpush1.bf16.msra.mxu0 %v10857_v24  ;;  %2997 = vmatpush1.bf16.msra.mxu1 %v10860_v18  ;;  %v12331_v15 = vsub.s32 0, %v12328_v14  ;;  %v12334_v23 = vsub.s32 2, %v12328_v14  ;;  %v420_v24 = vld [vmem:[%s12793_s3] sm:$0xf]  ;;  %v12340_v18 = vsub.s32 1, %v12328_v14 }
 0x191   :  { %2912 = vmatprep.subr.bf16.mxu0 %v10865_v19  ;;  %2998 = vmatprep.subr.bf16.mxu1 %v10868_v25  ;;  %v12343_v19 = vsub.s32 3, %v12328_v14 }
 0x192   :  { %v425_v25 = vrot.slane %v420_v24, %v12331_v15 }
 0x194   :  { %2913 = vmatpush1.bf16.msra.mxu0 %v10863_v26  ;;  %2999 = vmatpush1.bf16.msra.mxu1 %v10866_v27  ;;  %v433_v26 = vrot.slane %v420_v24, %v12334_v23  ;;  %v429_v27 = vrot.slane %v420_v24, %v12340_v18 }
 0x195   :  { %2914 = vmatprep.subr.bf16.mxu0 %v10871_v28  ;;  %3000 = vmatprep.subr.bf16.mxu1 %v10874_v29  ;;  %v437_v28 = vrot.slane %v420_v24, %v12343_v19  ;;  %v10991_v24 = vld [vmem:[%s12794_s4 + $0x2e4] ss:$16 sps:$4 sm:$0xff]  }
 0x198   :  { %2915 = vmatpush1.bf16.msra.mxu0 %v10869_v30  ;;  %3001 = vmatpush1.bf16.msra.mxu1 %v10872_v31 }
 0x199   :  { %2916 = vmatprep.subr.bf16.mxu0 %v10877_v32  ;;  %3002 = vmatprep.subr.bf16.mxu1 %v10880_v33 }
 0x19c   :  { %2917 = vmatpush1.bf16.msra.mxu0 %v10875_v34  ;;  %3003 = vmatpush1.bf16.msra.mxu1 %v10878_v35 }
 0x19d   :  { %2918 = vmatprep.subr.bf16.mxu0 %v10883_v36  ;;  %3004 = vmatprep.subr.bf16.mxu1 %v10886_v37 }
 0x1a0   :  { %2919 = vmatpush1.bf16.msra.mxu0 %v10881_v38  ;;  %3005 = vmatpush1.bf16.msra.mxu1 %v10884_v39 }
 0x1a1   :  { %2920 = vmatprep.subr.bf16.mxu0 %v10889_v40  ;;  %3006 = vmatprep.subr.bf16.mxu1 %v10892_v41 }
 0x1a4   :  { %2921 = vmatpush1.bf16.msra.mxu0 %v10887_v42  ;;  %3007 = vmatpush1.bf16.msra.mxu1 %v10890_v43 }
 0x1a5   :  { %2922 = vmatprep.subr.bf16.mxu0 %v10895_v44  ;;  %3008 = vmatprep.subr.bf16.mxu1 %v10898_v45 }
 0x1a8   :  { %2923 = vmatpush1.bf16.msra.mxu0 %v10893_v46  ;;  %3009 = vmatpush1.bf16.msra.mxu1 %v10896_v47 }
 0x1a9   :  { %2924 = vmatprep.subr.bf16.mxu0 %v10901_v48  ;;  %3010 = vmatprep.subr.bf16.mxu1 %v10904_v49 }
 0x1ac   :  { %2925 = vmatpush1.bf16.msra.mxu0 %v10899_v50  ;;  %3011 = vmatpush1.bf16.msra.mxu1 %v10902_v51 }
 0x1ad   :  { %2926 = vmatprep.subr.bf16.mxu0 %v10907_v52  ;;  %3012 = vmatprep.subr.bf16.mxu1 %v10910_v53 }
 0x1b0   :  { %2927 = vmatpush1.bf16.msra.mxu0 %v10905_v54  ;;  %3013 = vmatpush1.bf16.msra.mxu1 %v10908_v55 }
 0x1b1   :  { %2928 = vmatprep.subr.bf16.mxu0 %v10913_v56  ;;  %3014 = vmatprep.subr.bf16.mxu1 %v10916_v57  ;;  %v10947_v57 = vld [vmem:[%s12794_s4 + $0x200] ss:$16 sps:$4 sm:$0xff]  }
 0x1b4   :  { %2929 = vmatpush1.bf16.msra.mxu0 %v10911_v58  ;;  %3015 = vmatpush1.bf16.msra.mxu1 %v10914_v59  ;;  %v10950_v58 = vld [vmem:[%s12794_s4 + $0x208] ss:$16 sps:$4 sm:$0xff]   ;;  %v10955_v59 = vld [vmem:[%s12794_s4 + $0x224] ss:$16 sps:$4 sm:$0xff]  }
 0x1b5   :  { %2930 = vmatprep.subr.bf16.mxu0 %v10919_v60  ;;  %3016 = vmatprep.subr.bf16.mxu1 %v10922_v61  ;;  %v10958_v60 = vld [vmem:[%s12794_s4 + $0x22c] ss:$16 sps:$4 sm:$0xff]   ;;  %v10953_v61 = vld [vmem:[%s12794_s4 + $0x220] ss:$16 sps:$4 sm:$0xff]  }
 0x1b8   :  { %2931 = vmatpush1.bf16.msra.mxu0 %v10917_v62  ;;  %3017 = vmatpush1.bf16.msra.mxu1 %v10920_v63  ;;  %v10956_v62 = vld [vmem:[%s12794_s4 + $0x228] ss:$16 sps:$4 sm:$0xff]   ;;  %v10961_v63 = vld [vmem:[%s12794_s4 + $0x244] ss:$16 sps:$4 sm:$0xff]  }
 0x1b9   :  { %2932 = vmatprep.subr.bf16.mxu0 %v10925_v0  ;;  %3018 = vmatprep.subr.bf16.mxu1 %v10928_v1  ;;  %v10964_v0 = vld [vmem:[%s12794_s4 + $0x24c] ss:$16 sps:$4 sm:$0xff]   ;;  %v10959_v1 = vld [vmem:[%s12794_s4 + $0x240] ss:$16 sps:$4 sm:$0xff]  }
 0x1bc   :  { %2933 = vmatpush1.bf16.msra.mxu0 %v10923_v2  ;;  %3019 = vmatpush1.bf16.msra.mxu1 %v10926_v3  ;;  %v10962_v2 = vld [vmem:[%s12794_s4 + $0x248] ss:$16 sps:$4 sm:$0xff]   ;;  %v10967_v3 = vld [vmem:[%s12794_s4 + $0x264] ss:$16 sps:$4 sm:$0xff]  }
 0x1bd   :  { %2934 = vmatprep.subr.bf16.mxu0 %v10931_v4  ;;  %3020 = vmatprep.subr.bf16.mxu1 %v10934_v5  ;;  %v10970_v4 = vld [vmem:[%s12794_s4 + $0x26c] ss:$16 sps:$4 sm:$0xff]   ;;  %v10965_v5 = vld [vmem:[%s12794_s4 + $0x260] ss:$16 sps:$4 sm:$0xff]  }
 0x1c0   :  { %2935 = vmatpush1.bf16.msra.mxu0 %v10929_v6  ;;  %3021 = vmatpush1.bf16.msra.mxu1 %v10932_v7  ;;  %v10968_v6 = vld [vmem:[%s12794_s4 + $0x268] ss:$16 sps:$4 sm:$0xff]   ;;  %v10973_v7 = vld [vmem:[%s12794_s4 + $0x284] ss:$16 sps:$4 sm:$0xff]  }
 0x1c1   :  { %2936 = vmatprep.subr.bf16.mxu0 %v10937_v8  ;;  %3022 = vmatprep.subr.bf16.mxu1 %v10940_v9  ;;  %v10976_v8 = vld [vmem:[%s12794_s4 + $0x28c] ss:$16 sps:$4 sm:$0xff]   ;;  %v10971_v9 = vld [vmem:[%s12794_s4 + $0x280] ss:$16 sps:$4 sm:$0xff]  }
 0x1c4   :  { %2937 = vmatpush1.bf16.msra.mxu0 %v10935_v10  ;;  %3023 = vmatpush1.bf16.msra.mxu1 %v10938_v11  ;;  %v10974_v10 = vld [vmem:[%s12794_s4 + $0x288] ss:$16 sps:$4 sm:$0xff]   ;;  %v10979_v11 = vld [vmem:[%s12794_s4 + $0x2a4] ss:$16 sps:$4 sm:$0xff]  }
 0x1c5   :  { %2938 = vmatprep.subr.bf16.mxu0 %v10943_v12  ;;  %3024 = vmatprep.subr.bf16.mxu1 %v10946_v13  ;;  %v10982_v12 = vld [vmem:[%s12794_s4 + $0x2ac] ss:$16 sps:$4 sm:$0xff]   ;;  %v10977_v13 = vld [vmem:[%s12794_s4 + $0x2a0] ss:$16 sps:$4 sm:$0xff]  }
 0x1c8   :  { %2939 = vmatpush1.bf16.msra.mxu0 %v10941_v16  ;;  %3025 = vmatpush1.bf16.msra.mxu1 %v10944_v17  ;;  %v10980_v16 = vld [vmem:[%s12794_s4 + $0x2a8] ss:$16 sps:$4 sm:$0xff]   ;;  %v10985_v17 = vld [vmem:[%s12794_s4 + $0x2c4] ss:$16 sps:$4 sm:$0xff]  }
 0x1c9   :  { %2951 = vmatprep.subr.bf16.mxu0 %v10949_v20  ;;  %3037 = vmatprep.subr.bf16.mxu1 %v10952_v21  ;;  %v10988_v20 = vld [vmem:[%s12794_s4 + $0x2cc] ss:$16 sps:$4 sm:$0xff]   ;;  %v10983_v21 = vld [vmem:[%s12794_s4 + $0x2c0] ss:$16 sps:$4 sm:$0xff]  }
 0x25e   :  { %v1925_v29 = vpop.f32.mrb[0].mxu0  ;;  %v2097_v30 = vpop.f32.mrb[0].mxu1 }
 0x25f   :  { %v10322_v31 = vadd.f32 %v1925_v29, %v425_v25  ;;  %v10326_v32 = vadd.f32 %v2097_v30, %v433_v26  ;;  %v1927_v33 = vpop.f32.mrb[1].mxu0  ;;  %v2099_v34 = vpop.f32.mrb[1].mxu1  ;;  %v11000_v29 = vld [vmem:[%s12794_s4 + $0x30c] ss:$16 sps:$4 sm:$0xff]   ;;  %v10995_v30 = vld [vmem:[%s12794_s4 + $0x300] ss:$16 sps:$4 sm:$0xff]  }
 0x260   :  { %v10323_v35 = vadd.f32 %v1927_v33, %v429_v27  ;;  %v10327_v36 = vadd.f32 %v2099_v34, %v437_v28  ;;  %v1929_v37 = vpop.f32.mrb[2].mxu0  ;;  %v2101_v38 = vpop.f32.mrb[2].mxu1  ;;  %v11006_v33 = vld [vmem:[%s12794_s4 + $0x32c] ss:$16 sps:$4 sm:$0xff]   ;;  %v11001_v34 = vld [vmem:[%s12794_s4 + $0x320] ss:$16 sps:$4 sm:$0xff]  }
 0x261   :  { %v10324_v39 = vadd.f32 %v1929_v37, %v425_v25  ;;  %v10328_v40 = vadd.f32 %v2101_v38, %v433_v26  ;;  %v1931_v41 = vpop.f32.mrb[3].mxu0  ;;  %v2103_v42 = vpop.f32.mrb[3].mxu1  ;;  %v2106_v45 = vmax.f32 %v10322_v31, 0.0  ;;  %v2108_v46 = vmax.f32 %v10326_v32, 0.0  ;;  %v10994_v25 = vld [vmem:[%s12794_s4 + $0x2ec] ss:$16 sps:$4 sm:$0xff]  }
 0x262   :  { %v10325_v43 = vadd.f32 %v1931_v41, %v429_v27  ;;  %v10329_v44 = vadd.f32 %v2103_v42, %v437_v28  ;;  %v2107_v49 = vmax.f32 %v10323_v35, 0.0  ;;  %v2109_v50 = vmax.f32 %v10327_v36, 0.0  ;;  %v10989_v26 = vld [vmem:[%s12794_s4 + $0x2e0] ss:$16 sps:$4 sm:$0xff]   ;;  %v10992_v27 = vld [vmem:[%s12794_s4 + $0x2e8] ss:$16 sps:$4 sm:$0xff]  }
 0x263   :  { %v2110_v47 = vmax.f32 %v10324_v39, 0.0  ;;  %v2112_v48 = vmax.f32 %v10328_v40, 0.0  ;;  %v10997_v28 = vld [vmem:[%s12794_s4 + $0x304] ss:$16 sps:$4 sm:$0xff]   ;;  %v10998_v31 = vld [vmem:[%s12794_s4 + $0x308] ss:$16 sps:$4 sm:$0xff]  }
 0x264   :  { %v2111_v51 = vmax.f32 %v10325_v43, 0.0  ;;  %v2113_v52 = vmax.f32 %v10329_v44, 0.0  ;;  %v11003_v32 = vld [vmem:[%s12794_s4 + $0x324] ss:$16 sps:$4 sm:$0xff]   ;;  %v11004_v35 = vld [vmem:[%s12794_s4 + $0x328] ss:$16 sps:$4 sm:$0xff]  }
 0x265   :  { %v2114_v53 = vpack.c.bf16 %v2110_v47, %v2106_v45  ;;  %v12349_v54 = vpack.c.bf16 %v2112_v48, %v2108_v46  ;;  %v11009_v36 = vld [vmem:[%s12794_s4 + $0x344] ss:$16 sps:$4 sm:$0xff]   ;;  %v11012_v37 = vld [vmem:[%s12794_s4 + $0x34c] ss:$16 sps:$4 sm:$0xff]   ;;  %v11007_v38 = vld [vmem:[%s12794_s4 + $0x340] ss:$16 sps:$4 sm:$0xff]  }
 0x266   :  { %v2115_v55 = vpack.c.bf16 %v2111_v51, %v2107_v49  ;;  %v2117_v56 = vpack.c.bf16 %v2113_v52, %v2109_v50  ;;  %v11010_v39 = vld [vmem:[%s12794_s4 + $0x348] ss:$16 sps:$4 sm:$0xff]   ;;  %v11015_v40 = vld [vmem:[%s12794_s4 + $0x364] ss:$16 sps:$4 sm:$0xff]   ;;  %v11018_v41 = vld [vmem:[%s12794_s4 + $0x36c] ss:$16 sps:$4 sm:$0xff]  }
 0x267   :  { %v11013_v42 = vld [vmem:[%s12794_s4 + $0x360] ss:$16 sps:$4 sm:$0xff]   ;;  %v11016_v43 = vld [vmem:[%s12794_s4 + $0x368] ss:$16 sps:$4 sm:$0xff]   ;;  %v11021_v44 = vld [vmem:[%s12794_s4 + $0x384] ss:$16 sps:$4 sm:$0xff]  }
 0x268   :  { %2940 = vmatprep.mubr.bf16.mxu0 %v2115_v55  ;;  %3026 = vmatprep.mubr.bf16.mxu1 %v2115_v55  ;;  %v11024_v45 = vld [vmem:[%s12794_s4 + $0x38c] ss:$16 sps:$4 sm:$0xff]   ;;  %v11019_v46 = vld [vmem:[%s12794_s4 + $0x380] ss:$16 sps:$4 sm:$0xff]   ;;  %v11022_v47 = vld [vmem:[%s12794_s4 + $0x388] ss:$16 sps:$4 sm:$0xff]  }
 0x269   :  { %2941 = vmatmul.mubr.bf16.vlgmr.msra.gmra.mrb[4].mxu0 %v2114_v53  ;;  %3027 = vmatmul.mubr.bf16.vlgmr.msra.gmra.mrb[4].mxu1 %v2114_v53  ;;  %v11027_v48 = vld [vmem:[%s12794_s4 + $0x3a4] ss:$16 sps:$4 sm:$0xff]   ;;  %v11030_v49 = vld [vmem:[%s12794_s4 + $0x3ac] ss:$16 sps:$4 sm:$0xff]   ;;  %v11025_v50 = vld [vmem:[%s12794_s4 + $0x3a0] ss:$16 sps:$4 sm:$0xff]  }
 0x26a   :  { %2952 = vmatpush1.bf16.msra.mxu0 %v10947_v57  ;;  %3038 = vmatpush1.bf16.msra.mxu1 %v10950_v58  ;;  %v11028_v51 = vld [vmem:[%s12794_s4 + $0x3a8] ss:$16 sps:$4 sm:$0xff]   ;;  %v11033_v52 = vld [vmem:[%s12794_s4 + $0x3c4] ss:$16 sps:$4 sm:$0xff]   ;;  %v11036_v53 = vld [vmem:[%s12794_s4 + $0x3cc] ss:$16 sps:$4 sm:$0xff]  }
 0x26b   :  { %2983 = vmatprep.mubr.bf16.mxu0 %v2117_v56  ;;  %3069 = vmatprep.mubr.bf16.mxu1 %v2117_v56  ;;  %v11031_v55 = vld [vmem:[%s12794_s4 + $0x3c0] ss:$16 sps:$4 sm:$0xff]   ;;  %v11034_v56 = vld [vmem:[%s12794_s4 + $0x3c8] ss:$16 sps:$4 sm:$0xff]   ;;  %v11039_v57 = vld [vmem:[%s12794_s4 + $0x3e4] ss:$16 sps:$4 sm:$0xff]  }
 0x26c   :  { %2953 = vmatprep.subr.bf16.mxu0 %v10955_v59  ;;  %3039 = vmatprep.subr.bf16.mxu1 %v10958_v60  ;;  %v11042_v58 = vld [vmem:[%s12794_s4 + $0x3ec] ss:$16 sps:$4 sm:$0xff]   ;;  %v11037_v59 = vld [vmem:[%s12794_s4 + $0x3e0] ss:$16 sps:$4 sm:$0xff]   ;;  %v11040_v60 = vld [vmem:[%s12794_s4 + $0x3e8] ss:$16 sps:$4 sm:$0xff]  }
 0x26e   :  { %2954 = vmatpush1.bf16.msra.mxu0 %v10953_v61  ;;  %3040 = vmatpush1.bf16.msra.mxu1 %v10956_v62  ;;  %v11869_v61 = vmov 0   ;;  %v11044_v62 = vld [vmem:[#allocation7] ss:$8 sps:$4 sm:$0xff]  }
 0x26f   :  { %2955 = vmatprep.subr.bf16.mxu0 %v10961_v63  ;;  %3041 = vmatprep.subr.bf16.mxu1 %v10964_v0  ;;  %v11046_v63 = vld [vmem:[#allocation7 + $0x4] ss:$8 sps:$4 sm:$0xff]   ;;  %v11049_v0 = vld [vmem:[#allocation7 + $0x14] ss:$8 sps:$4 sm:$0xff]  }
 0x272   :  { %2956 = vmatpush1.bf16.msra.mxu0 %v10959_v1  ;;  %3042 = vmatpush1.bf16.msra.mxu1 %v10962_v2  ;;  %v11047_v1 = vld [vmem:[#allocation7 + $0x10] ss:$8 sps:$4 sm:$0xff]   ;;  %v11052_v2 = vld [vmem:[#allocation7 + $0x24] ss:$8 sps:$4 sm:$0xff]  }
 0x273   :  { %2957 = vmatprep.subr.bf16.mxu0 %v10967_v3  ;;  %3043 = vmatprep.subr.bf16.mxu1 %v10970_v4  ;;  %v11050_v3 = vld [vmem:[#allocation7 + $0x20] ss:$8 sps:$4 sm:$0xff]   ;;  %v11055_v4 = vld [vmem:[#allocation7 + $0x34] ss:$8 sps:$4 sm:$0xff]  }
 0x276   :  { %2958 = vmatpush1.bf16.msra.mxu0 %v10965_v5  ;;  %3044 = vmatpush1.bf16.msra.mxu1 %v10968_v6  ;;  %v11053_v5 = vld [vmem:[#allocation7 + $0x30] ss:$8 sps:$4 sm:$0xff]   ;;  %v11058_v6 = vld [vmem:[#allocation7 + $0x44] ss:$8 sps:$4 sm:$0xff]  }
 0x277   :  { %2959 = vmatprep.subr.bf16.mxu0 %v10973_v7  ;;  %3045 = vmatprep.subr.bf16.mxu1 %v10976_v8  ;;  %v11061_v7 = vld [vmem:[#allocation7 + $0x54] ss:$8 sps:$4 sm:$0xff]   ;;  %v11059_v8 = vld [vmem:[#allocation7 + $0x50] ss:$8 sps:$4 sm:$0xff]  }
 0x27a   :  { %2960 = vmatpush1.bf16.msra.mxu0 %v10971_v9  ;;  %3046 = vmatpush1.bf16.msra.mxu1 %v10974_v10  ;;  %v11064_v9 = vld [vmem:[#allocation7 + $0x64] ss:$8 sps:$4 sm:$0xff]   ;;  %v11062_v10 = vld [vmem:[#allocation7 + $0x60] ss:$8 sps:$4 sm:$0xff]  }
 0x27b   :  { %2961 = vmatprep.subr.bf16.mxu0 %v10979_v11  ;;  %3047 = vmatprep.subr.bf16.mxu1 %v10982_v12  ;;  %v11067_v11 = vld [vmem:[#allocation7 + $0x74] ss:$8 sps:$4 sm:$0xff]   ;;  %v11065_v12 = vld [vmem:[#allocation7 + $0x70] ss:$8 sps:$4 sm:$0xff]  }
 0x27e   :  { %2962 = vmatpush1.bf16.msra.mxu0 %v10977_v13  ;;  %3048 = vmatpush1.bf16.msra.mxu1 %v10980_v16  ;;  %v11070_v13 = vld [vmem:[#allocation7 + $0x84] ss:$8 sps:$4 sm:$0xff]   ;;  %v11068_v16 = vld [vmem:[#allocation7 + $0x80] ss:$8 sps:$4 sm:$0xff]  }
 0x27f   :  { %2963 = vmatprep.subr.bf16.mxu0 %v10985_v17  ;;  %3049 = vmatprep.subr.bf16.mxu1 %v10988_v20  ;;  %v11073_v17 = vld [vmem:[#allocation7 + $0x94] ss:$8 sps:$4 sm:$0xff]   ;;  %v11071_v20 = vld [vmem:[#allocation7 + $0x90] ss:$8 sps:$4 sm:$0xff]  }
 0x282   :  { %2964 = vmatpush1.bf16.msra.mxu0 %v10983_v21  ;;  %3050 = vmatpush1.bf16.msra.mxu1 %v10986_v22  ;;  %v11076_v21 = vld [vmem:[#allocation7 + $0xa4] ss:$8 sps:$4 sm:$0xff]   ;;  %v11074_v22 = vld [vmem:[#allocation7 + $0xa0] ss:$8 sps:$4 sm:$0xff]  }
 0x283   :  { %2965 = vmatprep.subr.bf16.mxu0 %v10991_v24  ;;  %3051 = vmatprep.subr.bf16.mxu1 %v10994_v25  ;;  %v11079_v24 = vld [vmem:[#allocation7 + $0xb4] ss:$8 sps:$4 sm:$0xff]   ;;  %v11077_v25 = vld [vmem:[#allocation7 + $0xb0] ss:$8 sps:$4 sm:$0xff]  }
 0x286   :  { %2966 = vmatpush1.bf16.msra.mxu0 %v10989_v26  ;;  %3052 = vmatpush1.bf16.msra.mxu1 %v10992_v27  ;;  %v11082_v26 = vld [vmem:[#allocation7 + $0xc4] ss:$8 sps:$4 sm:$0xff]   ;;  %v11080_v27 = vld [vmem:[#allocation7 + $0xc0] ss:$8 sps:$4 sm:$0xff]  }
 0x287   :  { %2967 = vmatprep.subr.bf16.mxu0 %v10997_v28  ;;  %3053 = vmatprep.subr.bf16.mxu1 %v11000_v29  ;;  %v11085_v28 = vld [vmem:[#allocation7 + $0xd4] ss:$8 sps:$4 sm:$0xff]   ;;  %v11083_v29 = vld [vmem:[#allocation7 + $0xd0] ss:$8 sps:$4 sm:$0xff]  }
 0x28a   :  { %2968 = vmatpush1.bf16.msra.mxu0 %v10995_v30  ;;  %3054 = vmatpush1.bf16.msra.mxu1 %v10998_v31  ;;  %v11088_v30 = vld [vmem:[#allocation7 + $0xe4] ss:$8 sps:$4 sm:$0xff]   ;;  %v11086_v31 = vld [vmem:[#allocation7 + $0xe0] ss:$8 sps:$4 sm:$0xff]  }
 0x28b   :  { %2969 = vmatprep.subr.bf16.mxu0 %v11003_v32  ;;  %3055 = vmatprep.subr.bf16.mxu1 %v11006_v33  ;;  %v2246_v32 = vld [vmem:[%s12795_s5] sm:$0xf]  ;;  %s9092_s5 = sshll.u32 %s11870_s29, 4  ;;  %s9093_s5 = int_to_ptr.vmem [resolvable:$true] %s9092_s5 }
 0x28c   :  { %v2251_v33 = vrot.slane %v2246_v32, %v12331_v15  ;;  %s11822_s23 = scalar_lea.vmem %s9093_s5, 256  ;;  %p11827_p1 = scmp.lt.s32.totalorder %s9093_s5, %s9093_s5 }
 0x28d   :  { %p11823_p0 = scmp.ne.s32.totalorder %s9093_s5, %s11822_s23  ;;  %p11828_p2 = scmp.lt.s32.totalorder %s11822_s23, %s11822_s23 }
 0x28e   :  { %2970 = vmatpush1.bf16.msra.mxu0 %v11001_v34  ;;  %3056 = vmatpush1.bf16.msra.mxu1 %v11004_v35  ;;  %v2259_v34 = vrot.slane %v2246_v32, %v12334_v23 }
 0x28f   :  { %2971 = vmatprep.subr.bf16.mxu0 %v11009_v36  ;;  %3057 = vmatprep.subr.bf16.mxu1 %v11012_v37  ;;  %v2255_v37 = vrot.slane %v2246_v32, %v12340_v18  ;;  %p11829_p3 = por %p11828_p2, %p11827_p1 }
 0x291   :  { %p11830_p4 = pnand %p11829_p3, %p11823_p0 }
 0x292   :  { %2972 = vmatpush1.bf16.msra.mxu0 %v11007_v38  ;;  %3058 = vmatpush1.bf16.msra.mxu1 %v11010_v39  ;;  %v2263_v38 = vrot.slane %v2246_v32, %v12343_v19  ;;  %v11121_v32 = vld [vmem:[#allocation7 + $0x194] ss:$8 sps:$4 sm:$0xff]  }
 0x293   :  { %2973 = vmatprep.subr.bf16.mxu0 %v11015_v40  ;;  %3059 = vmatprep.subr.bf16.mxu1 %v11018_v41 }
 0x296   :  { %2974 = vmatpush1.bf16.msra.mxu0 %v11013_v42  ;;  %3060 = vmatpush1.bf16.msra.mxu1 %v11016_v43 }
 0x297   :  { %2975 = vmatprep.subr.bf16.mxu0 %v11021_v44  ;;  %3061 = vmatprep.subr.bf16.mxu1 %v11024_v45 }
 0x29a   :  { %2976 = vmatpush1.bf16.msra.mxu0 %v11019_v46  ;;  %3062 = vmatpush1.bf16.msra.mxu1 %v11022_v47 }
 0x29b   :  { %2977 = vmatprep.subr.bf16.mxu0 %v11027_v48  ;;  %3063 = vmatprep.subr.bf16.mxu1 %v11030_v49 }
 0x29e   :  { %2978 = vmatpush1.bf16.msra.mxu0 %v11025_v50  ;;  %3064 = vmatpush1.bf16.msra.mxu1 %v11028_v51 }
 0x29f   :  { %2979 = vmatprep.subr.bf16.mxu0 %v11033_v52  ;;  %3065 = vmatprep.subr.bf16.mxu1 %v11036_v53 }
 0x2a2   :  { %2980 = vmatpush1.bf16.msra.mxu0 %v11031_v55  ;;  %3066 = vmatpush1.bf16.msra.mxu1 %v11034_v56 }
 0x2a3   :  { %2981 = vmatprep.subr.bf16.mxu0 %v11039_v57  ;;  %3067 = vmatprep.subr.bf16.mxu1 %v11042_v58  ;;  %v11043_v58 = vld [vmem:[%s12824_s7] sm:$0xff]  }
 0x2a6   :  { %2982 = vmatpush1.bf16.msra.mxu0 %v11037_v59  ;;  %3068 = vmatpush1.bf16.msra.mxu1 %v11040_v60  ;;  %v11091_v59 = vld [vmem:[#allocation7 + $0xf4] ss:$8 sps:$4 sm:$0xff]   ;;  %v11089_v60 = vld [vmem:[#allocation7 + $0xf0] ss:$8 sps:$4 sm:$0xff]  }
 0x2a7   :  { %3581 = vmatprep.subr.bf16.mxu0 %v11046_v63 }
 0x2a9   :  { %2984 = vmatmul.mubr.bf16.vlgmr.msra.gmra.mrb[4].mxu0 %v12349_v54  ;;  %3070 = vmatmul.mubr.bf16.vlgmr.msra.gmra.mrb[4].mxu1 %v12349_v54  ;;  %v11056_v54 = vld [vmem:[#allocation7 + $0x40] ss:$8 sps:$4 sm:$0xff]  }
 0x2aa   :  { %3127 = vmatprep.mubr.bf16.mxu1 %v11869_v61  ;;  %3582 = vmatpush1.bf16.msra.mxu0 %v11044_v62  ;;  %v11094_v62 = vld [vmem:[#allocation7 + $0x104] ss:$8 sps:$4 sm:$0xff]  }
 0x2ab   :  { %3583 = vmatprep.subr.bf16.mxu0 %v11049_v0 }
 0x2ae   :  { %3584 = vmatpush1.bf16.msra.mxu0 %v11047_v1 }
 0x2af   :  { %3585 = vmatprep.subr.bf16.mxu0 %v11052_v2 }
 0x2b2   :  { %3586 = vmatpush1.bf16.msra.mxu0 %v11050_v3 }
 0x2b3   :  { %3587 = vmatprep.subr.bf16.mxu0 %v11055_v4 }
 0x2b6   :  { %3588 = vmatpush1.bf16.msra.mxu0 %v11053_v5  ;;  %v11092_v5 = vld [vmem:[#allocation7 + $0x100] ss:$8 sps:$4 sm:$0xff]  }
 0x2b7   :  { %3589 = vmatprep.subr.bf16.mxu0 %v11058_v6  ;;  %v11097_v6 = vld [vmem:[#allocation7 + $0x114] ss:$8 sps:$4 sm:$0xff]  }
 0x2ba   :  { %3590 = vmatpush1.bf16.msra.mxu0 %v11056_v54  ;;  %v11095_v54 = vld [vmem:[#allocation7 + $0x110] ss:$8 sps:$4 sm:$0xff]  }
 0x2bb   :  { %3591 = vmatprep.subr.bf16.mxu0 %v11061_v7 }
 0x2be   :  { %3592 = vmatpush1.bf16.msra.mxu0 %v11059_v8  ;;  %v11100_v8 = vld [vmem:[#allocation7 + $0x124] ss:$8 sps:$4 sm:$0xff]  }
 0x2bf   :  { %3593 = vmatprep.subr.bf16.mxu0 %v11064_v9 }
 0x2c2   :  { %3594 = vmatpush1.bf16.msra.mxu0 %v11062_v10 }
 0x2c3   :  { %3595 = vmatprep.subr.bf16.mxu0 %v11067_v11 }
 0x2c6   :  { %3596 = vmatpush1.bf16.msra.mxu0 %v11065_v12 }
 0x2c7   :  { %3597 = vmatprep.subr.bf16.mxu0 %v11070_v13  ;;  %v11098_v13 = vld [vmem:[#allocation7 + $0x120] ss:$8 sps:$4 sm:$0xff]  }
 0x2ca   :  { %3598 = vmatpush1.bf16.msra.mxu0 %v11068_v16 }
 0x2cb   :  { %3599 = vmatprep.subr.bf16.mxu0 %v11073_v17  ;;  %v11103_v17 = vld [vmem:[#allocation7 + $0x134] ss:$8 sps:$4 sm:$0xff]  }
 0x2ce   :  { %3600 = vmatpush1.bf16.msra.mxu0 %v11071_v20  ;;  %v11101_v20 = vld [vmem:[#allocation7 + $0x130] ss:$8 sps:$4 sm:$0xff]  }
 0x2cf   :  { %3601 = vmatprep.subr.bf16.mxu0 %v11076_v21  ;;  %v11106_v21 = vld [vmem:[#allocation7 + $0x144] ss:$8 sps:$4 sm:$0xff]  }
 0x2d2   :  { %3602 = vmatpush1.bf16.msra.mxu0 %v11074_v22  ;;  %v11104_v22 = vld [vmem:[#allocation7 + $0x140] ss:$8 sps:$4 sm:$0xff]  }
 0x2d3   :  { %3603 = vmatprep.subr.bf16.mxu0 %v11079_v24  ;;  %v11109_v24 = vld [vmem:[#allocation7 + $0x154] ss:$8 sps:$4 sm:$0xff]  }
 0x2d6   :  { %3604 = vmatpush1.bf16.msra.mxu0 %v11077_v25  ;;  %v11107_v25 = vld [vmem:[#allocation7 + $0x150] ss:$8 sps:$4 sm:$0xff]  }
 0x2d7   :  { %3605 = vmatprep.subr.bf16.mxu0 %v11082_v26  ;;  %v11112_v26 = vld [vmem:[#allocation7 + $0x164] ss:$8 sps:$4 sm:$0xff]  }
 0x2da   :  { %3606 = vmatpush1.bf16.msra.mxu0 %v11080_v27  ;;  %v11110_v27 = vld [vmem:[#allocation7 + $0x160] ss:$8 sps:$4 sm:$0xff]  }
 0x2db   :  { %3607 = vmatprep.subr.bf16.mxu0 %v11085_v28  ;;  %v11115_v28 = vld [vmem:[#allocation7 + $0x174] ss:$8 sps:$4 sm:$0xff]  }
 0x2de   :  { %3608 = vmatpush1.bf16.msra.mxu0 %v11083_v29  ;;  %v11113_v29 = vld [vmem:[#allocation7 + $0x170] ss:$8 sps:$4 sm:$0xff]  }
 0x2df   :  { %3609 = vmatprep.subr.bf16.mxu0 %v11088_v30  ;;  %v11118_v30 = vld [vmem:[#allocation7 + $0x184] ss:$8 sps:$4 sm:$0xff]  }
 0x2e2   :  { %3610 = vmatpush1.bf16.msra.mxu0 %v11086_v31  ;;  %v11116_v31 = vld [vmem:[#allocation7 + $0x180] ss:$8 sps:$4 sm:$0xff]  }
 0x2e3   :  { %3611 = vmatprep.subr.bf16.mxu0 %v11091_v59  ;;  %v11239_v59 = vld [vmem:[#allocation8 + $0x8] sm:$0xff]  }
 0x2e6   :  { %3612 = vmatpush1.bf16.msra.mxu0 %v11089_v60  ;;  %v11240_v60 = vld [vmem:[#allocation8 + $0x50] sm:$0xff]  }
 0x2e7   :  { %3624 = vmatprep.subr.bf16.mxu0 %v11094_v62  ;;  %v11146_v62 = vld [vmem:[#allocation5 + $0x20] ss:$8 sps:$4 sm:$0xff]  }
 0x37c   :  { %v2985_v35 = vpop.f32.mrb[4].mxu0  ;;  %v3071_v36 = vpop.f32.mrb[4].mxu1 }
 0x37d   :  { %v2987_v39 = vpop.f32.mrb[5].mxu0  ;;  %v3073_v40 = vpop.f32.mrb[5].mxu1  ;;  %v10330_v43 = vadd.f32 %v2985_v35, %v2251_v33  ;;  %v10334_v44 = vadd.f32 %v3071_v36, %v2259_v34  ;;  %v11122_v35 = vld [vmem:[#allocation7 + $0x1a0] ss:$8 sps:$4 sm:$0xff]   ;;  %v11127_v36 = vld [vmem:[#allocation7 + $0x1b4] ss:$8 sps:$4 sm:$0xff]  }
 0x37e   :  { %v2989_v41 = vpop.f32.mrb[6].mxu0  ;;  %v3075_v42 = vpop.f32.mrb[6].mxu1  ;;  %v10331_v49 = vadd.f32 %v2987_v39, %v2255_v37  ;;  %v10335_v50 = vadd.f32 %v3073_v40, %v2263_v38  ;;  %v11128_v39 = vld [vmem:[#allocation7 + $0x1c0] ss:$8 sps:$4 sm:$0xff]   ;;  %v11133_v40 = vld [vmem:[#allocation7 + $0x1d4] ss:$8 sps:$4 sm:$0xff]  }
 0x37f   :  { %v10332_v45 = vadd.f32 %v2989_v41, %v2251_v33  ;;  %v10336_v46 = vadd.f32 %v3075_v42, %v2259_v34  ;;  %v2991_v47 = vpop.f32.mrb[7].mxu0  ;;  %v3077_v48 = vpop.f32.mrb[7].mxu1  ;;  %v11119_v33 = vld [vmem:[#allocation7 + $0x190] ss:$8 sps:$4 sm:$0xff]   ;;  %v11124_v34 = vld [vmem:[#allocation7 + $0x1a4] ss:$8 sps:$4 sm:$0xff]  }
 0x380   :  { %v10333_v51 = vadd.f32 %v2991_v47, %v2255_v37  ;;  %v10337_v52 = vadd.f32 %v3077_v48, %v2263_v38  ;;  %v11125_v37 = vld [vmem:[#allocation7 + $0x1b0] ss:$8 sps:$4 sm:$0xff]   ;;  %v11130_v38 = vld [vmem:[#allocation7 + $0x1c4] ss:$8 sps:$4 sm:$0xff]   ;;  %v11140_v47 = vld [vmem:[#allocation5] ss:$8 sps:$4 sm:$0xff]  }
 0x381   :  { %v12547_v53 = vpack.c.bf16 %v10332_v45, %v10330_v43  ;;  %v12549_v55 = vpack.c.bf16 %v10336_v46, %v10334_v44  ;;  %v11131_v41 = vld [vmem:[#allocation7 + $0x1d0] ss:$8 sps:$4 sm:$0xff]   ;;  %v11136_v42 = vld [vmem:[#allocation7 + $0x1e4] ss:$8 sps:$4 sm:$0xff]   ;;  %v11134_v43 = vld [vmem:[#allocation7 + $0x1e0] ss:$8 sps:$4 sm:$0xff]  }
 0x382   :  { %v12551_v56 = vpack.c.bf16 %v10333_v51, %v10331_v49  ;;  %v12553_v57 = vpack.c.bf16 %v10337_v52, %v10335_v50  ;;  %v11139_v44 = vld [vmem:[#allocation7 + $0x1f4] ss:$8 sps:$4 sm:$0xff]   ;;  %v11137_v45 = vld [vmem:[#allocation7 + $0x1f0] ss:$8 sps:$4 sm:$0xff]   ;;  %v11142_v46 = vld [vmem:[#allocation5 + $0x4] ss:$8 sps:$4 sm:$0xff]  }
 0x383   :  { %v11145_v48 = vld [vmem:[#allocation5 + $0x14] ss:$8 sps:$4 sm:$0xff]   ;;  %v11236_v49 = vld [vmem:[#allocation8 + $0x40] sm:$0xff]   ;;  %v11238_v51 = vld [vmem:[#allocation8 + $0x48] sm:$0xff]  }
 0x384   :  { %3095 = vmatprep.subr.bf16.mxu1 %v12551_v56  ;;  %v11237_v50 = vld [vmem:[#allocation8] sm:$0xff]   ;;  %v11143_v52 = vld [vmem:[#allocation5 + $0x10] ss:$8 sps:$4 sm:$0xff]  }
 0x385   :  { %3096 = vmatpush1.bf16.msra.mxu1 %v12547_v53 }
 0x386   :  { %3138 = vmatprep.subr.bf16.mxu1 %v12553_v57 }
 0x388   :  { %9500 = vmatmul.mubr.msk.bf16.vlgmr.msra.gmra.mrb[8].mxu1 %vm3091_vm0, %v11043_v58 }
 0x389   :  { %3139 = vmatpush1.bf16.msra.mxu1 %v12549_v55  ;;  %3170 = vmatprep.mubr.bf16.mxu1 %v11869_v61 }
 0x38a   :  { %10256 = vmatprep.subr.bf16.mxu1 %v11236_v49  ;;  %v11211_v49 = vld [vmem:[#allocation5 + $0x174] ss:$8 sps:$4 sm:$0xff]  }
 0x390   :  { %9501 = vmatmul.mubr.msk.bf16.vlgmr.msra.gmra.mrb[12].mxu1 %vm3091_vm0, %v11043_v58  ;;  %v11148_v58 = vld [vmem:[#allocation5 + $0x24] ss:$8 sps:$4 sm:$0xff]  }
 0x391   :  { %10257 = vmatpush3.bf16.msra.mxu1 %v11237_v50  ;;  %v11209_v50 = vld [vmem:[#allocation5 + $0x170] ss:$8 sps:$4 sm:$0xff]  }
 0x392   :  { %10258 = vmatprep.subr.bf16.mxu1 %v11238_v51  ;;  %v11214_v51 = vld [vmem:[#allocation5 + $0x184] ss:$8 sps:$4 sm:$0xff]  }
 0x395   :  { %10259 = vmatpush3.bf16.msra.mxu1 %v11239_v59  ;;  %v11215_v59 = vld [vmem:[#allocation5 + $0x190] ss:$8 sps:$4 sm:$0xff]  }
 0x396   :  { %10260 = vmatprep.subr.bf16.mxu1 %v11240_v60  ;;  %v11220_v60 = vld [vmem:[#allocation5 + $0x1a4] ss:$8 sps:$4 sm:$0xff]  }
 0x45b   :  { %v3129_v63 = vpop.f32.mrb[8].mxu1 }
 0x45c   :  { %v3131_v0 = vpop.f32.mrb[9].mxu1 }
 0x45d   :  { %v3133_v1 = vpop.f32.mrb[10].mxu1 }
 0x45e   :  { %v3181_v2 = vpack.c.bf16 %v3133_v1, %v3129_v63  ;;  %v3135_v3 = vpop.f32.mrb[11].mxu1  ;;  %v11151_v63 = vld [vmem:[#allocation5 + $0x34] ss:$8 sps:$4 sm:$0xff]  }
 0x45f   :  { %v3182_v4 = vpack.c.bf16 %v3135_v3, %v3131_v0  ;;  %v11241_v0 = vld [vmem:[#allocation8 + $0x10] sm:$0xff]   ;;  %v11242_v1 = vld [vmem:[#allocation8 + $0x58] sm:$0xff]   ;;  %v11154_v3 = vld [vmem:[#allocation5 + $0x44] ss:$8 sps:$4 sm:$0xff]  }
 0x460   :  { %10261 = vmatpush3.bf16.msra.mxu1 %v11241_v0  ;;  %v11221_v0 = vld [vmem:[#allocation5 + $0x1b0] ss:$8 sps:$4 sm:$0xff]  }
 0x461   :  { %3613 = vmatprep.mubr.bf16.mxu0 %v3182_v4  ;;  %v11243_v4 = vld [vmem:[#allocation8 + $0x18] sm:$0xff]   ;;  %10262 = vmatprep.subr.bf16.mxu1 %v11242_v1  ;;  %v11226_v1 = vld [vmem:[#allocation5 + $0x1c4] ss:$8 sps:$4 sm:$0xff]  }
 0x462   :  { %3614 = vmatmul.mubr.bf16.vlgmr.msra.gmra.mrb[8].mxu0 %v3181_v2  ;;  %v11149_v2 = vld [vmem:[#allocation5 + $0x30] ss:$8 sps:$4 sm:$0xff]  }
 0x463   :  { %3625 = vmatpush1.bf16.msra.mxu0 %v11092_v5  ;;  %v12563_v7 = vpop.f32.mrb[12].mxu1  ;;  %v11244_v5 = vld [vmem:[#allocation8 + $0x60] sm:$0xff]  }
 0x464   :  { %3626 = vmatprep.subr.bf16.mxu0 %v11097_v6  ;;  %v3174_v9 = vpop.f32.mrb[13].mxu1  ;;  %v11152_v6 = vld [vmem:[#allocation5 + $0x40] ss:$8 sps:$4 sm:$0xff]   ;;  %10263 = vmatpush3.bf16.msra.mxu1 %v11243_v4  ;;  %v11227_v4 = vld [vmem:[#allocation5 + $0x1d0] ss:$8 sps:$4 sm:$0xff]  }
 0x465   :  { %v12565_v10 = vpop.f32.mrb[14].mxu1  ;;  %10264 = vmatprep.subr.bf16.mxu1 %v11244_v5  ;;  %v11232_v5 = vld [vmem:[#allocation5 + $0x1e4] ss:$8 sps:$4 sm:$0xff]  }
 0x466   :  { %v3183_v11 = vpack.c.bf16 %v12565_v10, %v12563_v7  ;;  %v3178_v12 = vpop.f32.mrb[15].mxu1  ;;  %v11245_v7 = vld [vmem:[#allocation8 + $0x20] sm:$0xff]  }
 0x467   :  { %3627 = vmatpush1.bf16.msra.mxu0 %v11095_v54  ;;  %v3184_v16 = vpack.c.bf16 %v3178_v12, %v3174_v9  ;;  %v11157_v54 = vld [vmem:[#allocation5 + $0x54] ss:$8 sps:$4 sm:$0xff]   ;;  %v11155_v9 = vld [vmem:[#allocation5 + $0x50] ss:$8 sps:$4 sm:$0xff]   ;;  %v11160_v10 = vld [vmem:[#allocation5 + $0x64] ss:$8 sps:$4 sm:$0xff]  }
 0x468   :  { %3628 = vmatprep.subr.bf16.mxu0 %v11100_v8  ;;  %v11246_v8 = vld [vmem:[#allocation8 + $0x68] sm:$0xff]   ;;  %10265 = vmatpush3.bf16.msra.mxu1 %v11245_v7  ;;  %v11163_v12 = vld [vmem:[#allocation5 + $0x74] ss:$8 sps:$4 sm:$0xff]   ;;  %v11233_v7 = vld [vmem:[#allocation5 + $0x1f0] ss:$8 sps:$4 sm:$0xff]  }
 0x469   :  { %3656 = vmatprep.mubr.bf16.mxu0 %v3184_v16  ;;  %10266 = vmatprep.subr.bf16.mxu1 %v11246_v8  ;;  %v11166_v16 = vld [vmem:[#allocation5 + $0x84] ss:$8 sps:$4 sm:$0xff]  }
 0x46a   :  { %v11247_v8 = vld [vmem:[#allocation8 + $0x28] sm:$0xff]  }
 0x46b   :  { %3629 = vmatpush1.bf16.msra.mxu0 %v11098_v13  ;;  %v11161_v13 = vld [vmem:[#allocation5 + $0x70] ss:$8 sps:$4 sm:$0xff]  }
 0x46c   :  { %3630 = vmatprep.subr.bf16.mxu0 %v11103_v17  ;;  %v11164_v17 = vld [vmem:[#allocation5 + $0x80] ss:$8 sps:$4 sm:$0xff]   ;;  %10267 = vmatpush3.bf16.msra.mxu1 %v11247_v8 }
 0x46d   :  { %v4581_v8 = vld [vmem:[#allocation11 + $0x8] sm:$0xff] }
 0x46f   :  { %3631 = vmatpush1.bf16.msra.mxu0 %v11101_v20  ;;  %v11169_v20 = vld [vmem:[#allocation5 + $0x94] ss:$8 sps:$4 sm:$0xff]  }
 0x470   :  { %3632 = vmatprep.subr.bf16.mxu0 %v11106_v21  ;;  %v11167_v21 = vld [vmem:[#allocation5 + $0x90] ss:$8 sps:$4 sm:$0xff]  }
 0x473   :  { %3633 = vmatpush1.bf16.msra.mxu0 %v11104_v22  ;;  %v11172_v22 = vld [vmem:[#allocation5 + $0xa4] ss:$8 sps:$4 sm:$0xff]  }
 0x474   :  { %3634 = vmatprep.subr.bf16.mxu0 %v11109_v24  ;;  %v11170_v24 = vld [vmem:[#allocation5 + $0xa0] ss:$8 sps:$4 sm:$0xff]  }
 0x477   :  { %3635 = vmatpush1.bf16.msra.mxu0 %v11107_v25  ;;  %v11175_v25 = vld [vmem:[#allocation5 + $0xb4] ss:$8 sps:$4 sm:$0xff]  }
 0x478   :  { %3636 = vmatprep.subr.bf16.mxu0 %v11112_v26  ;;  %v11173_v26 = vld [vmem:[#allocation5 + $0xb0] ss:$8 sps:$4 sm:$0xff]  }
 0x47b   :  { %3637 = vmatpush1.bf16.msra.mxu0 %v11110_v27  ;;  %v11178_v27 = vld [vmem:[#allocation5 + $0xc4] ss:$8 sps:$4 sm:$0xff]  }
 0x47c   :  { %3638 = vmatprep.subr.bf16.mxu0 %v11115_v28  ;;  %v11176_v28 = vld [vmem:[#allocation5 + $0xc0] ss:$8 sps:$4 sm:$0xff]  }
 0x47f   :  { %3639 = vmatpush1.bf16.msra.mxu0 %v11113_v29  ;;  %v11181_v29 = vld [vmem:[#allocation5 + $0xd4] ss:$8 sps:$4 sm:$0xff]  }
 0x480   :  { %3640 = vmatprep.subr.bf16.mxu0 %v11118_v30  ;;  %v11179_v30 = vld [vmem:[#allocation5 + $0xd0] ss:$8 sps:$4 sm:$0xff]  }
 0x483   :  { %3641 = vmatpush1.bf16.msra.mxu0 %v11116_v31  ;;  %v11184_v31 = vld [vmem:[#allocation5 + $0xe4] ss:$8 sps:$4 sm:$0xff]  }
 0x484   :  { %3642 = vmatprep.subr.bf16.mxu0 %v11121_v32  ;;  %v11182_v32 = vld [vmem:[#allocation5 + $0xe0] ss:$8 sps:$4 sm:$0xff]  }
 0x487   :  { %3643 = vmatpush1.bf16.msra.mxu0 %v11119_v33  ;;  %v11187_v33 = vld [vmem:[#allocation5 + $0xf4] ss:$8 sps:$4 sm:$0xff]  }
 0x488   :  { %3644 = vmatprep.subr.bf16.mxu0 %v11124_v34  ;;  %v11185_v34 = vld [vmem:[#allocation5 + $0xf0] ss:$8 sps:$4 sm:$0xff]  }
 0x48b   :  { %3645 = vmatpush1.bf16.msra.mxu0 %v11122_v35  ;;  %v11190_v35 = vld [vmem:[#allocation5 + $0x104] ss:$8 sps:$4 sm:$0xff]  }
 0x48c   :  { %3646 = vmatprep.subr.bf16.mxu0 %v11127_v36  ;;  %v11188_v36 = vld [vmem:[#allocation5 + $0x100] ss:$8 sps:$4 sm:$0xff]  }
 0x48f   :  { %3647 = vmatpush1.bf16.msra.mxu0 %v11125_v37  ;;  %v11193_v37 = vld [vmem:[#allocation5 + $0x114] ss:$8 sps:$4 sm:$0xff]  }
 0x490   :  { %3648 = vmatprep.subr.bf16.mxu0 %v11130_v38  ;;  %v11191_v38 = vld [vmem:[#allocation5 + $0x110] ss:$8 sps:$4 sm:$0xff]  }
 0x493   :  { %3649 = vmatpush1.bf16.msra.mxu0 %v11128_v39  ;;  %v11196_v39 = vld [vmem:[#allocation5 + $0x124] ss:$8 sps:$4 sm:$0xff]  }
 0x494   :  { %3650 = vmatprep.subr.bf16.mxu0 %v11133_v40  ;;  %v11194_v40 = vld [vmem:[#allocation5 + $0x120] ss:$8 sps:$4 sm:$0xff]  }
 0x497   :  { %3651 = vmatpush1.bf16.msra.mxu0 %v11131_v41  ;;  %v11199_v41 = vld [vmem:[#allocation5 + $0x134] ss:$8 sps:$4 sm:$0xff]  }
 0x498   :  { %3652 = vmatprep.subr.bf16.mxu0 %v11136_v42  ;;  %v11197_v42 = vld [vmem:[#allocation5 + $0x130] ss:$8 sps:$4 sm:$0xff]  }
 0x49b   :  { %3653 = vmatpush1.bf16.msra.mxu0 %v11134_v43  ;;  %v11202_v43 = vld [vmem:[#allocation5 + $0x144] ss:$8 sps:$4 sm:$0xff]  }
 0x49c   :  { %3654 = vmatprep.subr.bf16.mxu0 %v11139_v44  ;;  %v11200_v44 = vld [vmem:[#allocation5 + $0x140] ss:$8 sps:$4 sm:$0xff]  }
 0x49f   :  { %3655 = vmatpush1.bf16.msra.mxu0 %v11137_v45  ;;  %v11205_v45 = vld [vmem:[#allocation5 + $0x154] ss:$8 sps:$4 sm:$0xff]  }
 0x4a0   :  { %4051 = vmatprep.subr.bf16.mxu0 %v11142_v46  ;;  %v11203_v46 = vld [vmem:[#allocation5 + $0x150] ss:$8 sps:$4 sm:$0xff]  }
 0x4a2   :  { %3657 = vmatmul.mubr.bf16.vlgmr.msra.gmra.mrb[8].mxu0 %v3183_v11  ;;  %v11158_v11 = vld [vmem:[#allocation5 + $0x60] ss:$8 sps:$4 sm:$0xff]  }
 0x4a3   :  { %4052 = vmatpush1.bf16.msra.mxu0 %v11140_v47  ;;  %4083 = vmatprep.mubr.bf16.mxu0 %v12551_v56  ;;  %v11208_v47 = vld [vmem:[#allocation5 + $0x164] ss:$8 sps:$4 sm:$0xff]  }
 0x4a4   :  { %4053 = vmatprep.subr.bf16.mxu0 %v11145_v48  ;;  %v11206_v48 = vld [vmem:[#allocation5 + $0x160] ss:$8 sps:$4 sm:$0xff]  }
 0x4a7   :  { %4054 = vmatpush1.bf16.msra.mxu0 %v11143_v52  ;;  %v11212_v52 = vld [vmem:[#allocation5 + $0x180] ss:$8 sps:$4 sm:$0xff]  }
 0x4a8   :  { %4055 = vmatprep.subr.bf16.mxu0 %v11148_v58  ;;  %v11217_v58 = vld [vmem:[#allocation5 + $0x194] ss:$8 sps:$4 sm:$0xff]  }
 0x4ab   :  { %4056 = vmatpush1.bf16.msra.mxu0 %v11146_v62  ;;  %v11218_v62 = vld [vmem:[#allocation5 + $0x1a0] ss:$8 sps:$4 sm:$0xff]  }
 0x4ac   :  { %4057 = vmatprep.subr.bf16.mxu0 %v11151_v63  ;;  %v11223_v63 = vld [vmem:[#allocation5 + $0x1b4] ss:$8 sps:$4 sm:$0xff]  }
 0x4af   :  { %4058 = vmatpush1.bf16.msra.mxu0 %v11149_v2  ;;  %v11224_v2 = vld [vmem:[#allocation5 + $0x1c0] ss:$8 sps:$4 sm:$0xff]  }
 0x4b0   :  { %4059 = vmatprep.subr.bf16.mxu0 %v11154_v3  ;;  %v11229_v3 = vld [vmem:[#allocation5 + $0x1d4] ss:$8 sps:$4 sm:$0xff]  }
 0x4b3   :  { %4060 = vmatpush1.bf16.msra.mxu0 %v11152_v6  ;;  %v11230_v6 = vld [vmem:[#allocation5 + $0x1e0] ss:$8 sps:$4 sm:$0xff]  }
 0x4b4   :  { %4061 = vmatprep.subr.bf16.mxu0 %v11157_v54  ;;  %v11235_v54 = vld [vmem:[#allocation5 + $0x1f4] ss:$8 sps:$4 sm:$0xff]  }
 0x4b7   :  { %4062 = vmatpush1.bf16.msra.mxu0 %v11155_v9  ;;  %v11248_v9 = vld [vmem:[#allocation8 + $0x70] sm:$0xff]  }
 0x4b8   :  { %4063 = vmatprep.subr.bf16.mxu0 %v11160_v10  ;;  %v11249_v10 = vld [vmem:[#allocation8 + $0x30] sm:$0xff]   ;;  %10268 = vmatprep.subr.bf16.mxu1 %v11248_v9  ;;  %v4585_v9 = vld [vmem:[#allocation11 + $0x28] sm:$0xff] }
 0x4b9   :  { %10269 = vmatpush3.bf16.msra.mxu1 %v11249_v10  ;;  %v9650_v10 = vcombine.high %v4581_v8, %v4585_v9 }
 0x4bb   :  { %4064 = vmatpush1.bf16.msra.mxu0 %v11158_v11  ;;  %v11250_v11 = vld [vmem:[#allocation8 + $0x78] sm:$0xff]  }
 0x4bc   :  { %4065 = vmatprep.subr.bf16.mxu0 %v11163_v12  ;;  %v11251_v12 = vld [vmem:[#allocation8 + $0x38] sm:$0xff]   ;;  %10270 = vmatprep.subr.bf16.mxu1 %v11250_v11  ;;  %v9649_v11 = vcombine.low %v4581_v8, %v4585_v9  ;;  %v4610_v8 = vld [vmem:[#allocation11 + $0xf0] sm:$0xff] }
 0x4bd   :  { %10271 = vmatpush3.bf16.msra.mxu1 %v11251_v12 }
 0x4bf   :  { %4066 = vmatpush1.bf16.msra.mxu0 %v11161_v13  ;;  %v4580_v13 = vld [vmem:[#allocation11] sm:$0xff] }
 0x4c0   :  { %4067 = vmatprep.subr.bf16.mxu0 %v11166_v16  ;;  %v4584_v16 = vld [vmem:[#allocation11 + $0x20] sm:$0xff] }
 0x4c3   :  { %4068 = vmatpush1.bf16.msra.mxu0 %v11164_v17  ;;  %v9647_v17 = vcombine.low %v4580_v13, %v4584_v16 }
 0x4c4   :  { %4069 = vmatprep.subr.bf16.mxu0 %v11169_v20  ;;  %v9648_v20 = vcombine.high %v4580_v13, %v4584_v16 }
 0x4c6   :  { %4964 = vmatprep.subr.bf16.mxu1 %v9648_v20  ;;  %v9630_v20 = vld [vmem:[%s12800_s10] ss:$0 sm:$0xff] }
 0x4c7   :  { %4070 = vmatpush1.bf16.msra.mxu0 %v11167_v21  ;;  %v3249_v21 = vld [vmem:[%s12798_s8] sm:$0x3] }
 0x4c8   :  { %4071 = vmatprep.subr.bf16.mxu0 %v11172_v22  ;;  %v3254_v22 = vrot.slane %v3249_v21, %v12331_v15 }
 0x4cb   :  { %4072 = vmatpush1.bf16.msra.mxu0 %v11170_v24  ;;  %v3258_v24 = vrot.slane %v3249_v21, %v12340_v18 }
 0x4cc   :  { %4073 = vmatprep.subr.bf16.mxu0 %v11175_v25 }
 0x4cf   :  { %4074 = vmatpush1.bf16.msra.mxu0 %v11173_v26 }
 0x4d0   :  { %4075 = vmatprep.subr.bf16.mxu0 %v11178_v27 }
 0x4d3   :  { %4076 = vmatpush1.bf16.msra.mxu0 %v11176_v28 }
 0x4d4   :  { %4077 = vmatprep.subr.bf16.mxu0 %v11181_v29 }
 0x4d7   :  { %4078 = vmatpush1.bf16.msra.mxu0 %v11179_v30 }
 0x4d8   :  { %4079 = vmatprep.subr.bf16.mxu0 %v11184_v31 }
 0x4db   :  { %4080 = vmatpush1.bf16.msra.mxu0 %v11182_v32 }
 0x4dc   :  { %4081 = vmatprep.subr.bf16.mxu0 %v11187_v33 }
 0x4df   :  { %4082 = vmatpush1.bf16.msra.mxu0 %v11185_v34 }
 0x4e0   :  { %4094 = vmatprep.subr.bf16.mxu0 %v11190_v35 }
 0x4e2   :  { %4084 = vmatmul.mubr.bf16.vlgmr.msra.gmra.mrb[8].mxu0 %v12547_v53 }
 0x4e3   :  { %4095 = vmatpush1.bf16.msra.mxu0 %v11188_v36  ;;  %4126 = vmatprep.mubr.bf16.mxu0 %v12553_v57 }
 0x4e4   :  { %4096 = vmatprep.subr.bf16.mxu0 %v11193_v37  ;;  %v4588_v37 = vld [vmem:[#allocation11 + $0x40] sm:$0xff] }
 0x4e7   :  { %4097 = vmatpush1.bf16.msra.mxu0 %v11191_v38  ;;  %v4592_v38 = vld [vmem:[#allocation11 + $0x60] sm:$0xff] }
 0x4e8   :  { %4098 = vmatprep.subr.bf16.mxu0 %v11196_v39 }
 0x4eb   :  { %4099 = vmatpush1.bf16.msra.mxu0 %v11194_v40 }
 0x4ec   :  { %4100 = vmatprep.subr.bf16.mxu0 %v11199_v41  ;;  %v9656_v41 = vcombine.high %v4588_v37, %v4592_v38 }
 0x4ef   :  { %4101 = vmatpush1.bf16.msra.mxu0 %v11197_v42  ;;  %v4596_v42 = vld [vmem:[#allocation11 + $0x80] sm:$0xff] }
 0x4f0   :  { %4102 = vmatprep.subr.bf16.mxu0 %v11202_v43  ;;  %v4600_v43 = vld [vmem:[#allocation11 + $0xa0] sm:$0xff] }
 0x4f3   :  { %4103 = vmatpush1.bf16.msra.mxu0 %v11200_v44  ;;  %v9655_v44 = vcombine.low %v4588_v37, %v4592_v38  ;;  %v4613_v38 = vld [vmem:[#allocation11 + $0x108] sm:$0xff] }
 0x4f4   :  { %4104 = vmatprep.subr.bf16.mxu0 %v11205_v45  ;;  %v9664_v45 = vcombine.high %v4596_v42, %v4600_v43 }
 0x4f7   :  { %4105 = vmatpush1.bf16.msra.mxu0 %v11203_v46  ;;  %v4604_v46 = vld [vmem:[#allocation11 + $0xc0] sm:$0xff] }
 0x4f8   :  { %4106 = vmatprep.subr.bf16.mxu0 %v11208_v47  ;;  %v4608_v47 = vld [vmem:[#allocation11 + $0xe0] sm:$0xff] }
 0x4fb   :  { %4107 = vmatpush1.bf16.msra.mxu0 %v11206_v48  ;;  %v9663_v48 = vcombine.low %v4596_v42, %v4600_v43  ;;  %v4621_v42 = vld [vmem:[#allocation11 + $0x148] sm:$0xff] }
 0x4fc   :  { %4108 = vmatprep.subr.bf16.mxu0 %v11211_v49  ;;  %v9672_v49 = vcombine.high %v4604_v46, %v4608_v47  ;;  %v4625_v43 = vld [vmem:[#allocation11 + $0x168] sm:$0xff] }
 0x4ff   :  { %4109 = vmatpush1.bf16.msra.mxu0 %v11209_v50  ;;  %v4612_v50 = vld [vmem:[#allocation11 + $0x100] sm:$0xff] }
 0x500   :  { %4110 = vmatprep.subr.bf16.mxu0 %v11214_v51  ;;  %v4616_v51 = vld [vmem:[#allocation11 + $0x120] sm:$0xff] }
 0x503   :  { %4111 = vmatpush1.bf16.msra.mxu0 %v11212_v52  ;;  %v9671_v52 = vcombine.low %v4604_v46, %v4608_v47  ;;  %v4629_v46 = vld [vmem:[#allocation11 + $0x188] sm:$0xff] }
 0x504   :  { %4112 = vmatprep.subr.bf16.mxu0 %v11217_v58  ;;  %v9680_v58 = vcombine.high %v4612_v50, %v4616_v51  ;;  %v4633_v47 = vld [vmem:[#allocation11 + $0x1a8] sm:$0xff] }
 0x507   :  { %4113 = vmatpush1.bf16.msra.mxu0 %v11215_v59  ;;  %v4620_v59 = vld [vmem:[#allocation11 + $0x140] sm:$0xff] }
 0x508   :  { %4114 = vmatprep.subr.bf16.mxu0 %v11220_v60  ;;  %v4624_v60 = vld [vmem:[#allocation11 + $0x160] sm:$0xff] }
 0x50b   :  { %4115 = vmatpush1.bf16.msra.mxu0 %v11218_v62  ;;  %v9679_v62 = vcombine.low %v4612_v50, %v4616_v51  ;;  %v4637_v50 = vld [vmem:[#allocation11 + $0x1c8] sm:$0xff] }
 0x50c   :  { %4116 = vmatprep.subr.bf16.mxu0 %v11223_v63  ;;  %v9688_v63 = vcombine.high %v4620_v59, %v4624_v60  ;;  %v4641_v51 = vld [vmem:[#allocation11 + $0x1e8] sm:$0xff] }
 0x50f   :  { %4117 = vmatpush1.bf16.msra.mxu0 %v11221_v0  ;;  %v9687_v0 = vcombine.low %v4620_v59, %v4624_v60  ;;  %v4582_v59 = vld [vmem:[#allocation11 + $0x10] sm:$0xff] }
 0x510   :  { %4118 = vmatprep.subr.bf16.mxu0 %v11226_v1  ;;  %v4628_v1 = vld [vmem:[#allocation11 + $0x180] sm:$0xff]  ;;  %v4586_v60 = vld [vmem:[#allocation11 + $0x30] sm:$0xff] }
 0x513   :  { %4119 = vmatpush1.bf16.msra.mxu0 %v11224_v2  ;;  %v4632_v2 = vld [vmem:[#allocation11 + $0x1a0] sm:$0xff] }
 0x514   :  { %4120 = vmatprep.subr.bf16.mxu0 %v11229_v3  ;;  %v9696_v3 = vcombine.high %v4628_v1, %v4632_v2 }
 0x517   :  { %4121 = vmatpush1.bf16.msra.mxu0 %v11227_v4  ;;  %v9695_v4 = vcombine.low %v4628_v1, %v4632_v2  ;;  %v4594_v1 = vld [vmem:[#allocation11 + $0x70] sm:$0xff]  ;;  %v9651_v2 = vcombine.low %v4582_v59, %v4586_v60 }
 0x518   :  { %4122 = vmatprep.subr.bf16.mxu0 %v11232_v5  ;;  %v4636_v5 = vld [vmem:[#allocation11 + $0x1c0] sm:$0xff] }
 0x51b   :  { %4123 = vmatpush1.bf16.msra.mxu0 %v11230_v6  ;;  %v4640_v6 = vld [vmem:[#allocation11 + $0x1e0] sm:$0xff] }
 0x51c   :  { %4124 = vmatprep.subr.bf16.mxu0 %v11235_v54  ;;  %v9704_v54 = vcombine.high %v4636_v5, %v4640_v6 }
 0x51f   :  { %4125 = vmatpush1.bf16.msra.mxu0 %v11233_v7  ;;  %v9703_v7 = vcombine.low %v4636_v5, %v4640_v6  ;;  %v4602_v5 = vld [vmem:[#allocation11 + $0xb0] sm:$0xff] }
 0x522   :  { %4127 = vmatmul.mubr.bf16.vlgmr.msra.gmra.mrb[8].mxu0 %v12549_v55 }
 0x5f5   :  { %v4128_v25 = vpop.f32.mrb[8].mxu0 }
 0x5f6   :  { %v10338_v26 = vadd.f32 %v4128_v25, %v3254_v22  ;;  %v4130_v27 = vpop.f32.mrb[9].mxu0  ;;  %v4593_v25 = vld [vmem:[#allocation11 + $0x68] sm:$0xff] }
 0x5f7   :  { %v10339_v28 = vadd.f32 %v4130_v27, %v3258_v24  ;;  %v4132_v29 = vpop.f32.mrb[10].mxu0 }
 0x5f8   :  { %v10340_v30 = vadd.f32 %v4132_v29, %v3254_v22  ;;  %v4134_v31 = vpop.f32.mrb[11].mxu0  ;;  %v4141_v33 = vmax.f32 %v10338_v26, 0.0 }
 0x5f9   :  { %v10341_v32 = vadd.f32 %v4134_v31, %v3258_v24  ;;  %v4142_v35 = vmax.f32 %v10339_v28, 0.0  ;;  %v4589_v24 = vld [vmem:[#allocation11 + $0x48] sm:$0xff] }
 0x5fa   :  { %v4143_v34 = vmax.f32 %v10340_v30, 0.0  ;;  %v9658_v29 = vcombine.high %v4589_v24, %v4593_v25  ;;  %v4597_v30 = vld [vmem:[#allocation11 + $0x88] sm:$0xff] }
 0x5fb   :  { %v4144_v36 = vmax.f32 %v10341_v32, 0.0  ;;  %v4601_v31 = vld [vmem:[#allocation11 + $0xa8] sm:$0xff]  ;;  %v9657_v32 = vcombine.low %v4589_v24, %v4593_v25  ;;  %v4630_v24 = vld [vmem:[#allocation11 + $0x190] sm:$0xff] }
 0x5fc   :  { %v4145_v39 = vpack.c.bf16 %v4143_v34, %v4141_v33  ;;  %v9666_v33 = vcombine.high %v4597_v30, %v4601_v31  ;;  %v4605_v34 = vld [vmem:[#allocation11 + $0xc8] sm:$0xff]  ;;  %v4634_v25 = vld [vmem:[#allocation11 + $0x1b0] sm:$0xff] }
 0x5fd   :  { %v4146_v40 = vpack.c.bf16 %v4144_v36, %v4142_v35  ;;  %v4609_v35 = vld [vmem:[#allocation11 + $0xe8] sm:$0xff]  ;;  %v9665_v36 = vcombine.low %v4597_v30, %v4601_v31  ;;  %v4642_v30 = vld [vmem:[#allocation11 + $0x1f0] sm:$0xff]  ;;  %v9699_v31 = vcombine.low %v4630_v24, %v4634_v25 }
 0x5fe   :  { %v9674_v37 = vcombine.high %v4605_v34, %v4609_v35 }
 0x5ff   :  { %4314 = vmatprep.mubr.bf16.mxu1 %v4146_v40  ;;  %v9673_v40 = vcombine.low %v4605_v34, %v4609_v35  ;;  %v4587_v34 = vld [vmem:[#allocation11 + $0x38] sm:$0xff] }
 0x600   :  { %4315 = vmatmul.mubr.bf16.vlgmr.msra.gmra.mrb[16].mxu1 %v4145_v39  ;;  %v4617_v39 = vld [vmem:[#allocation11 + $0x128] sm:$0xff] }
 0x601   :  { %4965 = vmatpush1.bf16.msra.mxu1 %v9647_v17  ;;  %4996 = vmatprep.mubr.bf16.mxu1 %v11869_v61 }
 0x602   :  { %4966 = vmatprep.subr.bf16.mxu1 %v9656_v41  ;;  %v9682_v41 = vcombine.high %v4613_v38, %v4617_v39 }
 0x605   :  { %4967 = vmatpush1.bf16.msra.mxu1 %v9655_v44  ;;  %v9681_v44 = vcombine.low %v4613_v38, %v4617_v39  ;;  %v4595_v38 = vld [vmem:[#allocation11 + $0x78] sm:$0xff] }
 0x606   :  { %4968 = vmatprep.subr.bf16.mxu1 %v9664_v45  ;;  %v9690_v45 = vcombine.high %v4621_v42, %v4625_v43 }
 0x609   :  { %4969 = vmatpush1.bf16.msra.mxu1 %v9663_v48  ;;  %v9689_v48 = vcombine.low %v4621_v42, %v4625_v43  ;;  %v4603_v42 = vld [vmem:[#allocation11 + $0xb8] sm:$0xff] }
 0x60a   :  { %4970 = vmatprep.subr.bf16.mxu1 %v9672_v49  ;;  %v9698_v49 = vcombine.high %v4629_v46, %v4633_v47 }
 0x60d   :  { %4971 = vmatpush1.bf16.msra.mxu1 %v9671_v52  ;;  %v9697_v52 = vcombine.low %v4629_v46, %v4633_v47  ;;  %v4611_v46 = vld [vmem:[#allocation11 + $0xf8] sm:$0xff] }
 0x60e   :  { %4972 = vmatprep.subr.bf16.mxu1 %v9680_v58  ;;  %v9706_v58 = vcombine.high %v4637_v50, %v4641_v51 }
 0x611   :  { %4973 = vmatpush1.bf16.msra.mxu1 %v9679_v62  ;;  %v9705_v62 = vcombine.low %v4637_v50, %v4641_v51  ;;  %v4619_v50 = vld [vmem:[#allocation11 + $0x138] sm:$0xff] }
 0x612   :  { %4974 = vmatprep.subr.bf16.mxu1 %v9688_v63  ;;  %v9652_v63 = vcombine.high %v4582_v59, %v4586_v60  ;;  %v4627_v59 = vld [vmem:[#allocation11 + $0x178] sm:$0xff] }
 0x615   :  { %4975 = vmatpush1.bf16.msra.mxu1 %v9687_v0  ;;  %v4590_v0 = vld [vmem:[#allocation11 + $0x50] sm:$0xff] }
 0x616   :  { %4976 = vmatprep.subr.bf16.mxu1 %v9696_v3  ;;  %v9660_v3 = vcombine.high %v4590_v0, %v4594_v1  ;;  %v9659_v6 = vcombine.low %v4590_v0, %v4594_v1 }
 0x619   :  { %4977 = vmatpush1.bf16.msra.mxu1 %v9695_v4  ;;  %v4598_v4 = vld [vmem:[#allocation11 + $0x90] sm:$0xff] }
 0x61a   :  { %4978 = vmatprep.subr.bf16.mxu1 %v9704_v54  ;;  %v9668_v54 = vcombine.high %v4598_v4, %v4602_v5  ;;  %v9667_v9 = vcombine.low %v4598_v4, %v4602_v5 }
 0x61d   :  { %4979 = vmatpush1.bf16.msra.mxu1 %v9703_v7  ;;  %v4606_v7 = vld [vmem:[#allocation11 + $0xd0] sm:$0xff] }
 0x61e   :  { %5007 = vmatprep.subr.bf16.mxu1 %v9650_v10  ;;  %v9676_v10 = vcombine.high %v4606_v7, %v4610_v8 }
 0x6d3   :  { %v10272_v12 = vpop.f32.mrb[16].mxu1 }
 0x6d4   :  { %v10273_v13 = vpop.f32.mrb[17].mxu1 }
 0x6d5   :  { %v10274_v16 = vadd.f32 %v10273_v13, %v10272_v12  ;;  %v10275_v17 = vpop.f32.mrb[18].mxu1  ;;  %v4618_v12 = vld [vmem:[#allocation11 + $0x130] sm:$0xff]  ;;  %v9675_v13 = vcombine.low %v4606_v7, %v4610_v8 }
 0x6d6   :  { %v10276_v21 = vpop.f32.mrb[19].mxu1 }
 0x6d7   :  { %v10277_v22 = vadd.f32 %v10276_v21, %v10275_v17  ;;  %v4317_v26 = vadd.f32 %v10274_v16, %v9630_v20  ;;  %v4622_v17 = vld [vmem:[#allocation11 + $0x150] sm:$0xff] }
 0x6d9   :  { %v4320_v27 = vadd.f32 %v10277_v22, %v9630_v20  ;;  %v4626_v20 = vld [vmem:[#allocation11 + $0x170] sm:$0xff] }
 0x6da   :  { %v9692_v22 = vcombine.high %v4622_v17, %v4626_v20 }
 0x6db   :  { %v12585_v28 = vpack.c.bf16 %v4320_v27, %v4317_v26  ;;  %v9691_v26 = vcombine.low %v4622_v17, %v4626_v20  ;;  %v9700_v27 = vcombine.high %v4630_v24, %v4634_v25 }
 0x6dd   :  { %4997 = vmatmul.mubr.bf16.vlgmr.msra.gmra.mrb[20].mxu1 %v12585_v28 }
 0x6de   :  { %5008 = vmatpush1.bf16.msra.mxu1 %v9649_v11  ;;  %5039 = vmatprep.mubr.bf16.mxu1 %v11869_v61  ;;  %v4614_v11 = vld [vmem:[#allocation11 + $0x110] sm:$0xff] }
 0x6df   :  { %5009 = vmatprep.subr.bf16.mxu1 %v9658_v29  ;;  %v9684_v16 = vcombine.high %v4614_v11, %v4618_v12  ;;  %v9683_v21 = vcombine.low %v4614_v11, %v4618_v12  ;;  %v4638_v29 = vld [vmem:[#allocation11 + $0x1d0] sm:$0xff] }
 0x6e0   :  { %v9707_v35 = vcombine.low %v4638_v29, %v4642_v30 }
 0x6e2   :  { %5010 = vmatpush1.bf16.msra.mxu1 %v9657_v32  ;;  %v9708_v32 = vcombine.high %v4638_v29, %v4642_v30 }
 0x6e3   :  { %5011 = vmatprep.subr.bf16.mxu1 %v9666_v33  ;;  %v4583_v33 = vld [vmem:[#allocation11 + $0x18] sm:$0xff] }
 0x6e4   :  { %v9653_v39 = vcombine.low %v4583_v33, %v4587_v34 }
 0x6e6   :  { %5012 = vmatpush1.bf16.msra.mxu1 %v9665_v36  ;;  %v9654_v36 = vcombine.high %v4583_v33, %v4587_v34  ;;  %v4371_v34 = vld [vmem:[#allocation10 + $0x180] sm:$0xff] }
 0x6e7   :  { %5013 = vmatprep.subr.bf16.mxu1 %v9674_v37  ;;  %v4591_v37 = vld [vmem:[#allocation11 + $0x58] sm:$0xff] }
 0x6e8   :  { %v9661_v43 = vcombine.low %v4591_v37, %v4595_v38 }
 0x6ea   :  { %5014 = vmatpush1.bf16.msra.mxu1 %v9673_v40  ;;  %v9662_v40 = vcombine.high %v4591_v37, %v4595_v38  ;;  %v4379_v38 = vld [vmem:[#allocation10 + $0x1c0] sm:$0xff] }
 0x6eb   :  { %5015 = vmatprep.subr.bf16.mxu1 %v9682_v41  ;;  %v4599_v41 = vld [vmem:[#allocation11 + $0x98] sm:$0xff] }
 0x6ec   :  { %v9669_v47 = vcombine.low %v4599_v41, %v4603_v42 }
 0x6ee   :  { %5016 = vmatpush1.bf16.msra.mxu1 %v9681_v44  ;;  %v9670_v44 = vcombine.high %v4599_v41, %v4603_v42  ;;  %v4387_v42 = vld [vmem:[#allocation10 + $0x200] sm:$0xff] }
 0x6ef   :  { %5017 = vmatprep.subr.bf16.mxu1 %v9690_v45  ;;  %v4607_v45 = vld [vmem:[#allocation11 + $0xd8] sm:$0xff] }
 0x6f0   :  { %v9677_v51 = vcombine.low %v4607_v45, %v4611_v46 }
 0x6f2   :  { %5018 = vmatpush1.bf16.msra.mxu1 %v9689_v48  ;;  %v9678_v48 = vcombine.high %v4607_v45, %v4611_v46  ;;  %v4395_v46 = vld [vmem:[#allocation10 + $0x240] sm:$0xff] }
 0x6f3   :  { %5019 = vmatprep.subr.bf16.mxu1 %v9698_v49  ;;  %v4615_v49 = vld [vmem:[#allocation11 + $0x118] sm:$0xff] }
 0x6f4   :  { %v9685_v60 = vcombine.low %v4615_v49, %v4619_v50 }
 0x6f6   :  { %5020 = vmatpush1.bf16.msra.mxu1 %v9697_v52  ;;  %v9686_v52 = vcombine.high %v4615_v49, %v4619_v50  ;;  %v4403_v50 = vld [vmem:[#allocation10 + $0x280] sm:$0xff] }
 0x6f7   :  { %5021 = vmatprep.subr.bf16.mxu1 %v9706_v58  ;;  %v4623_v58 = vld [vmem:[#allocation11 + $0x158] sm:$0xff] }
 0x6f8   :  { %v9693_v0 = vcombine.low %v4623_v58, %v4627_v59 }
 0x6fa   :  { %5022 = vmatpush1.bf16.msra.mxu1 %v9705_v62  ;;  %v4631_v62 = vld [vmem:[#allocation11 + $0x198] sm:$0xff] }
 0x6fb   :  { %5050 = vmatprep.subr.bf16.mxu1 %v9652_v63  ;;  %v4635_v63 = vld [vmem:[#allocation11 + $0x1b8] sm:$0xff] }
 0x6fc   :  { %v9702_v1 = vcombine.high %v4631_v62, %v4635_v63  ;;  %v9701_v4 = vcombine.low %v4631_v62, %v4635_v63  ;;  %v4419_v63 = vld [vmem:[#allocation10 + $0x300] sm:$0xff] }
 0x6fd   :  { %5040 = vmatmul.mubr.bf16.vlgmr.msra.gmra.mrb[24].mxu1 %v12585_v28 }
 0x6fe   :  { %5051 = vmatpush1.bf16.msra.mxu1 %v9651_v2  ;;  %5082 = vmatprep.mubr.bf16.mxu1 %v11869_v61  ;;  %v4639_v2 = vld [vmem:[#allocation11 + $0x1d8] sm:$0xff] }
 0x6ff   :  { %5052 = vmatprep.subr.bf16.mxu1 %v9660_v3  ;;  %v4643_v3 = vld [vmem:[#allocation11 + $0x1f8] sm:$0xff] }
 0x700   :  { %v9710_v5 = vcombine.high %v4639_v2, %v4643_v3  ;;  %v9709_v7 = vcombine.low %v4639_v2, %v4643_v3  ;;  %v4427_v3 = vld [vmem:[#allocation10 + $0x340] sm:$0xff] }
 0x702   :  { %5053 = vmatpush1.bf16.msra.mxu1 %v9659_v6  ;;  %v4323_v6 = vld [vmem:[#allocation10] sm:$0xff] }
 0x703   :  { %5054 = vmatprep.subr.bf16.mxu1 %v9668_v54  ;;  %v4327_v54 = vld [vmem:[#allocation10 + $0x20] sm:$0xff] }
 0x704   :  { %v9712_v8 = vcombine.high %v4323_v6, %v4327_v54  ;;  %v9711_v11 = vcombine.low %v4323_v6, %v4327_v54  ;;  %v4435_v54 = vld [vmem:[#allocation10 + $0x380] sm:$0xff] }
 0x706   :  { %5055 = vmatpush1.bf16.msra.mxu1 %v9667_v9  ;;  %v4331_v9 = vld [vmem:[#allocation10 + $0x40] sm:$0xff] }
 0x707   :  { %5056 = vmatprep.subr.bf16.mxu1 %v9676_v10  ;;  %v4335_v10 = vld [vmem:[#allocation10 + $0x60] sm:$0xff] }
 0x708   :  { %v9720_v12 = vcombine.high %v4331_v9, %v4335_v10  ;;  %v9719_v17 = vcombine.low %v4331_v9, %v4335_v10  ;;  %v4443_v10 = vld [vmem:[#allocation10 + $0x3c0] sm:$0xff] }
 0x70a   :  { %5057 = vmatpush1.bf16.msra.mxu1 %v9675_v13  ;;  %v4339_v13 = vld [vmem:[#allocation10 + $0x80] sm:$0xff] }
 0x70b   :  { %5058 = vmatprep.subr.bf16.mxu1 %v9684_v16  ;;  %v4343_v16 = vld [vmem:[#allocation10 + $0xa0] sm:$0xff] }
 0x70c   :  { %v9728_v20 = vcombine.high %v4339_v13, %v4343_v16  ;;  %v9727_v24 = vcombine.low %v4339_v13, %v4343_v16  ;;  %v4451_v16 = vld [vmem:[#allocation10 + $0x400] sm:$0xff] }
 0x70e   :  { %5059 = vmatpush1.bf16.msra.mxu1 %v9683_v21  ;;  %v4347_v21 = vld [vmem:[#allocation10 + $0xc0] sm:$0xff] }
 0x70f   :  { %5060 = vmatprep.subr.bf16.mxu1 %v9692_v22  ;;  %v4351_v22 = vld [vmem:[#allocation10 + $0xe0] sm:$0xff] }
 0x710   :  { %v9736_v25 = vcombine.high %v4347_v21, %v4351_v22  ;;  %v9735_v29 = vcombine.low %v4347_v21, %v4351_v22  ;;  %v4459_v22 = vld [vmem:[#allocation10 + $0x440] sm:$0xff] }
 0x712   :  { %5061 = vmatpush1.bf16.msra.mxu1 %v9691_v26  ;;  %v4355_v26 = vld [vmem:[#allocation10 + $0x100] sm:$0xff] }
 0x713   :  { %5062 = vmatprep.subr.bf16.mxu1 %v9700_v27  ;;  %v4359_v27 = vld [vmem:[#allocation10 + $0x120] sm:$0xff] }
 0x714   :  { %v9744_v30 = vcombine.high %v4355_v26, %v4359_v27 }
 0x716   :  { %5063 = vmatpush1.bf16.msra.mxu1 %v9699_v31  ;;  %v4363_v31 = vld [vmem:[#allocation10 + $0x140] sm:$0xff] }
 0x717   :  { %5064 = vmatprep.subr.bf16.mxu1 %v9708_v32  ;;  %v9743_v32 = vcombine.low %v4355_v26, %v4359_v27  ;;  %v4467_v27 = vld [vmem:[#allocation10 + $0x480] sm:$0xff] }
 0x71a   :  { %5065 = vmatpush1.bf16.msra.mxu1 %v9707_v35  ;;  %v4375_v35 = vld [vmem:[#allocation10 + $0x1a0] sm:$0xff] }
 0x71b   :  { %5093 = vmatprep.subr.bf16.mxu1 %v9654_v36  ;;  %v9760_v37 = vcombine.high %v4371_v34, %v4375_v35 }
 0x71d   :  { %5083 = vmatmul.mubr.bf16.vlgmr.msra.gmra.mrb[28].mxu1 %v12585_v28 }
 0x71e   :  { %5094 = vmatpush1.bf16.msra.mxu1 %v9653_v39  ;;  %5125 = vmatprep.mubr.bf16.mxu1 %v11869_v61  ;;  %v9694_v61 = vcombine.high %v4623_v58, %v4627_v59  ;;  %v4383_v39 = vld [vmem:[#allocation10 + $0x1e0] sm:$0xff] }
 0x71f   :  { %5095 = vmatprep.subr.bf16.mxu1 %v9662_v40  ;;  %v9759_v40 = vcombine.low %v4371_v34, %v4375_v35  ;;  %v9768_v41 = vcombine.high %v4379_v38, %v4383_v39  ;;  %v4411_v59 = vld [vmem:[#allocation10 + $0x2c0] sm:$0xff] }
 0x720   :  { %v4483_v35 = vld [vmem:[#allocation10 + $0x500] sm:$0xff] }
 0x722   :  { %5096 = vmatpush1.bf16.msra.mxu1 %v9661_v43  ;;  %v4391_v43 = vld [vmem:[#allocation10 + $0x220] sm:$0xff] }
 0x723   :  { %5097 = vmatprep.subr.bf16.mxu1 %v9670_v44  ;;  %v9767_v44 = vcombine.low %v4379_v38, %v4383_v39  ;;  %v9776_v45 = vcombine.high %v4387_v42, %v4391_v43  ;;  %v4491_v39 = vld [vmem:[#allocation10 + $0x540] sm:$0xff] }
 0x726   :  { %5098 = vmatpush1.bf16.msra.mxu1 %v9669_v47  ;;  %v4399_v47 = vld [vmem:[#allocation10 + $0x260] sm:$0xff] }
 0x727   :  { %5099 = vmatprep.subr.bf16.mxu1 %v9678_v48  ;;  %v9775_v48 = vcombine.low %v4387_v42, %v4391_v43  ;;  %v9784_v49 = vcombine.high %v4395_v46, %v4399_v47  ;;  %v4499_v43 = vld [vmem:[#allocation10 + $0x580] sm:$0xff] }
 0x72a   :  { %5100 = vmatpush1.bf16.msra.mxu1 %v9677_v51  ;;  %v4407_v51 = vld [vmem:[#allocation10 + $0x2a0] sm:$0xff] }
 0x72b   :  { %5101 = vmatprep.subr.bf16.mxu1 %v9686_v52  ;;  %v9783_v52 = vcombine.low %v4395_v46, %v4399_v47  ;;  %v9792_v58 = vcombine.high %v4403_v50, %v4407_v51  ;;  %v4507_v47 = vld [vmem:[#allocation10 + $0x5c0] sm:$0xff] }
 0x72e   :  { %5102 = vmatpush1.bf16.msra.mxu1 %v9685_v60  ;;  %v4415_v60 = vld [vmem:[#allocation10 + $0x2e0] sm:$0xff] }
 0x72f   :  { %5103 = vmatprep.subr.bf16.mxu1 %v9694_v61  ;;  %v9791_v61 = vcombine.low %v4403_v50, %v4407_v51  ;;  %v9800_v62 = vcombine.high %v4411_v59, %v4415_v60  ;;  %v4515_v51 = vld [vmem:[#allocation10 + $0x600] sm:$0xff] }
 0x732   :  { %5104 = vmatpush1.bf16.msra.mxu1 %v9693_v0  ;;  %v4423_v0 = vld [vmem:[#allocation10 + $0x320] sm:$0xff] }
 0x733   :  { %5105 = vmatprep.subr.bf16.mxu1 %v9702_v1  ;;  %v9799_v1 = vcombine.low %v4411_v59, %v4415_v60  ;;  %v9808_v2 = vcombine.high %v4419_v63, %v4423_v0  ;;  %v4523_v60 = vld [vmem:[#allocation10 + $0x640] sm:$0xff] }
 0x736   :  { %5106 = vmatpush1.bf16.msra.mxu1 %v9701_v4  ;;  %v4431_v4 = vld [vmem:[#allocation10 + $0x360] sm:$0xff] }
 0x737   :  { %5107 = vmatprep.subr.bf16.mxu1 %v9710_v5  ;;  %v9807_v5 = vcombine.low %v4419_v63, %v4423_v0  ;;  %v9816_v6 = vcombine.high %v4427_v3, %v4431_v4  ;;  %v4531_v0 = vld [vmem:[#allocation10 + $0x680] sm:$0xff] }
 0x73a   :  { %5108 = vmatpush1.bf16.msra.mxu1 %v9709_v7  ;;  %v4439_v7 = vld [vmem:[#allocation10 + $0x3a0] sm:$0xff] }
 0x73b   :  { %6416 = vmatprep.subr.bf16.mxu1 %v9712_v8  ;;  %v9815_v8 = vcombine.low %v4427_v3, %v4431_v4  ;;  %v9824_v9 = vcombine.high %v4435_v54, %v4439_v7  ;;  %v4539_v4 = vld [vmem:[#allocation10 + $0x6c0] sm:$0xff] }
 0x73d   :  { %5126 = vmatmul.mubr.bf16.vlgmr.msra.gmra.mrb[32].mxu1 %v12585_v28  ;;  %v4367_v28 = vld [vmem:[#allocation10 + $0x160] sm:$0xff] }
 0x73e   :  { %6417 = vmatpush1.bf16.msra.mxu1 %v9711_v11  ;;  %6448 = vmatprep.mubr.bf16.mxu1 %v12551_v56  ;;  %v9752_v33 = vcombine.high %v4363_v31, %v4367_v28  ;;  %v9751_v36 = vcombine.low %v4363_v31, %v4367_v28  ;;  %v4447_v11 = vld [vmem:[#allocation10 + $0x3e0] sm:$0xff] }
 0x73f   :  { %6418 = vmatprep.subr.bf16.mxu1 %v9720_v12  ;;  %v9823_v12 = vcombine.low %v4435_v54, %v4439_v7  ;;  %v9832_v13 = vcombine.high %v4443_v10, %v4447_v11  ;;  %v4475_v28 = vld [vmem:[#allocation10 + $0x4c0] sm:$0xff] }
 0x740   :  { %v4547_v7 = vld [vmem:[#allocation10 + $0x700] sm:$0xff] }
 0x742   :  { %6419 = vmatpush1.bf16.msra.mxu1 %v9719_v17  ;;  %v4455_v17 = vld [vmem:[#allocation10 + $0x420] sm:$0xff] }
 0x743   :  { %6420 = vmatprep.subr.bf16.mxu1 %v9728_v20  ;;  %v9831_v20 = vcombine.low %v4443_v10, %v4447_v11  ;;  %v9840_v21 = vcombine.high %v4451_v16, %v4455_v17  ;;  %v4555_v11 = vld [vmem:[#allocation10 + $0x740] sm:$0xff] }
 0x746   :  { %6421 = vmatpush1.bf16.msra.mxu1 %v9727_v24  ;;  %v4463_v24 = vld [vmem:[#allocation10 + $0x460] sm:$0xff] }
 0x747   :  { %6422 = vmatprep.subr.bf16.mxu1 %v9736_v25  ;;  %v9839_v25 = vcombine.low %v4451_v16, %v4455_v17  ;;  %v9848_v26 = vcombine.high %v4459_v22, %v4463_v24  ;;  %v4563_v17 = vld [vmem:[#allocation10 + $0x780] sm:$0xff] }
 0x74a   :  { %6423 = vmatpush1.bf16.msra.mxu1 %v9735_v29  ;;  %v4471_v29 = vld [vmem:[#allocation10 + $0x4a0] sm:$0xff] }
 0x74b   :  { %6424 = vmatprep.subr.bf16.mxu1 %v9744_v30  ;;  %v9847_v30 = vcombine.low %v4459_v22, %v4463_v24  ;;  %v9856_v31 = vcombine.high %v4467_v27, %v4471_v29  ;;  %v4571_v24 = vld [vmem:[#allocation10 + $0x7c0] sm:$0xff] }
 0x74e   :  { %6425 = vmatpush1.bf16.msra.mxu1 %v9743_v32  ;;  %v4479_v32 = vld [vmem:[#allocation10 + $0x4e0] sm:$0xff] }
 0x74f   :  { %6426 = vmatprep.subr.bf16.mxu1 %v9752_v33  ;;  %v9855_v33 = vcombine.low %v4467_v27, %v4471_v29  ;;  %v9864_v34 = vcombine.high %v4475_v28, %v4479_v32  ;;  %v4324_v29 = vld [vmem:[#allocation10 + $0x8] sm:$0xff] }
 0x752   :  { %6427 = vmatpush1.bf16.msra.mxu1 %v9751_v36  ;;  %v4487_v36 = vld [vmem:[#allocation10 + $0x520] sm:$0xff] }
 0x753   :  { %6428 = vmatprep.subr.bf16.mxu1 %v9760_v37  ;;  %v9863_v37 = vcombine.low %v4475_v28, %v4479_v32  ;;  %v9872_v38 = vcombine.high %v4483_v35, %v4487_v36  ;;  %v4332_v32 = vld [vmem:[#allocation10 + $0x48] sm:$0xff] }
 0x756   :  { %6429 = vmatpush1.bf16.msra.mxu1 %v9759_v40  ;;  %v4495_v40 = vld [vmem:[#allocation10 + $0x560] sm:$0xff] }
 0x757   :  { %6430 = vmatprep.subr.bf16.mxu1 %v9768_v41  ;;  %v9871_v41 = vcombine.low %v4483_v35, %v4487_v36  ;;  %v9880_v42 = vcombine.high %v4491_v39, %v4495_v40  ;;  %v4340_v36 = vld [vmem:[#allocation10 + $0x88] sm:$0xff] }
 0x75a   :  { %6431 = vmatpush1.bf16.msra.mxu1 %v9767_v44  ;;  %v4503_v44 = vld [vmem:[#allocation10 + $0x5a0] sm:$0xff] }
 0x75b   :  { %6432 = vmatprep.subr.bf16.mxu1 %v9776_v45  ;;  %v9879_v45 = vcombine.low %v4491_v39, %v4495_v40  ;;  %v9888_v46 = vcombine.high %v4499_v43, %v4503_v44  ;;  %v4348_v40 = vld [vmem:[#allocation10 + $0xc8] sm:$0xff] }
 0x75e   :  { %6433 = vmatpush1.bf16.msra.mxu1 %v9775_v48  ;;  %v4511_v48 = vld [vmem:[#allocation10 + $0x5e0] sm:$0xff] }
 0x75f   :  { %6434 = vmatprep.subr.bf16.mxu1 %v9784_v49  ;;  %v9887_v49 = vcombine.low %v4499_v43, %v4503_v44  ;;  %v9896_v50 = vcombine.high %v4507_v47, %v4511_v48  ;;  %v4356_v44 = vld [vmem:[#allocation10 + $0x108] sm:$0xff] }
 0x762   :  { %6435 = vmatpush1.bf16.msra.mxu1 %v9783_v52  ;;  %v4519_v52 = vld [vmem:[#allocation10 + $0x620] sm:$0xff] }
 0x763   :  { %6436 = vmatprep.subr.bf16.mxu1 %v9792_v58  ;;  %v9895_v58 = vcombine.low %v4507_v47, %v4511_v48  ;;  %v9904_v59 = vcombine.high %v4515_v51, %v4519_v52  ;;  %v4364_v48 = vld [vmem:[#allocation10 + $0x148] sm:$0xff] }
 0x766   :  { %6437 = vmatpush1.bf16.msra.mxu1 %v9791_v61  ;;  %v4527_v61 = vld [vmem:[#allocation10 + $0x660] sm:$0xff] }
 0x767   :  { %6438 = vmatprep.subr.bf16.mxu1 %v9800_v62  ;;  %v9903_v62 = vcombine.low %v4515_v51, %v4519_v52  ;;  %v9912_v63 = vcombine.high %v4523_v60, %v4527_v61  ;;  %v4372_v52 = vld [vmem:[#allocation10 + $0x188] sm:$0xff] }
 0x76a   :  { %6439 = vmatpush1.bf16.msra.mxu1 %v9799_v1  ;;  %v4535_v1 = vld [vmem:[#allocation10 + $0x6a0] sm:$0xff] }
 0x76b   :  { %6440 = vmatprep.subr.bf16.mxu1 %v9808_v2  ;;  %v9911_v2 = vcombine.low %v4523_v60, %v4527_v61  ;;  %v9920_v3 = vcombine.high %v4531_v0, %v4535_v1  ;;  %v4380_v61 = vld [vmem:[#allocation10 + $0x1c8] sm:$0xff] }
 0x76e   :  { %6441 = vmatpush1.bf16.msra.mxu1 %v9807_v5  ;;  %v4543_v5 = vld [vmem:[#allocation10 + $0x6e0] sm:$0xff] }
 0x76f   :  { %6442 = vmatprep.subr.bf16.mxu1 %v9816_v6  ;;  %v9919_v6 = vcombine.low %v4531_v0, %v4535_v1  ;;  %v9928_v54 = vcombine.high %v4539_v4, %v4543_v5  ;;  %v4388_v1 = vld [vmem:[#allocation10 + $0x208] sm:$0xff] }
 0x772   :  { %6443 = vmatpush1.bf16.msra.mxu1 %v9815_v8  ;;  %v4551_v8 = vld [vmem:[#allocation10 + $0x720] sm:$0xff] }
 0x773   :  { %6444 = vmatprep.subr.bf16.mxu1 %v9824_v9  ;;  %v9927_v9 = vcombine.low %v4539_v4, %v4543_v5  ;;  %v9936_v10 = vcombine.high %v4547_v7, %v4551_v8  ;;  %v11252_v5 = vld [vmem:[#allocation13] ss:$16 sps:$4 sm:$0xff]  }
 0x776   :  { %6445 = vmatpush1.bf16.msra.mxu1 %v9823_v12  ;;  %v4559_v12 = vld [vmem:[#allocation10 + $0x760] sm:$0xff] }
 0x777   :  { %6446 = vmatprep.subr.bf16.mxu1 %v9832_v13  ;;  %v9935_v13 = vcombine.low %v4547_v7, %v4551_v8  ;;  %v9944_v16 = vcombine.high %v4555_v11, %v4559_v12  ;;  %v4400_v7 = vld [vmem:[#allocation10 + $0x268] sm:$0xff] }
 0x77a   :  { %6447 = vmatpush1.bf16.msra.mxu1 %v9831_v20  ;;  %v4567_v20 = vld [vmem:[#allocation10 + $0x7a0] sm:$0xff] }
 0x77b   :  { %6459 = vmatprep.subr.bf16.mxu1 %v9840_v21  ;;  %v9943_v21 = vcombine.low %v4555_v11, %v4559_v12  ;;  %v9952_v22 = vcombine.high %v4563_v17, %v4567_v20  ;;  %v11257_v11 = vld [vmem:[#allocation13 + $0x24] ss:$16 sps:$4 sm:$0xff]   ;;  %v4404_v12 = vld [vmem:[#allocation10 + $0x288] sm:$0xff] }
 0x77d   :  { %6449 = vmatmul.mubr.bf16.vlgmr.msra.gmra.mrb[20].mxu1 %v12547_v53 }
 0x77e   :  { %6460 = vmatpush1.bf16.msra.mxu1 %v9839_v25  ;;  %6491 = vmatprep.mubr.bf16.mxu1 %v12553_v57  ;;  %v4575_v25 = vld [vmem:[#allocation10 + $0x7e0] sm:$0xff] }
 0x77f   :  { %6461 = vmatprep.subr.bf16.mxu1 %v9848_v26  ;;  %v9951_v26 = vcombine.low %v4563_v17, %v4567_v20  ;;  %v9960_v27 = vcombine.high %v4571_v24, %v4575_v25  ;;  %v11258_v20 = vld [vmem:[#allocation13 + $0x40] ss:$16 sps:$4 sm:$0xff]  }
 0x782   :  { %6462 = vmatpush1.bf16.msra.mxu1 %v9847_v30  ;;  %v4328_v30 = vld [vmem:[#allocation10 + $0x28] sm:$0xff] }
 0x783   :  { %6463 = vmatprep.subr.bf16.mxu1 %v9856_v31  ;;  %v9959_v31 = vcombine.low %v4571_v24, %v4575_v25  ;;  %v9714_v28 = vcombine.high %v4324_v29, %v4328_v30  ;;  %v4416_v24 = vld [vmem:[#allocation10 + $0x2e8] sm:$0xff] }
 0x786   :  { %6464 = vmatpush1.bf16.msra.mxu1 %v9855_v33  ;;  %v4336_v33 = vld [vmem:[#allocation10 + $0x68] sm:$0xff] }
 0x787   :  { %6465 = vmatprep.subr.bf16.mxu1 %v9864_v34  ;;  %v9713_v34 = vcombine.low %v4324_v29, %v4328_v30  ;;  %v9722_v35 = vcombine.high %v4332_v32, %v4336_v33  ;;  %v11263_v29 = vld [vmem:[#allocation13 + $0x64] ss:$16 sps:$4 sm:$0xff]   ;;  %v4420_v30 = vld [vmem:[#allocation10 + $0x308] sm:$0xff] }
 0x78a   :  { %6466 = vmatpush1.bf16.msra.mxu1 %v9863_v37  ;;  %v4344_v37 = vld [vmem:[#allocation10 + $0xa8] sm:$0xff] }
 0x78b   :  { %6467 = vmatprep.subr.bf16.mxu1 %v9872_v38  ;;  %v9721_v38 = vcombine.low %v4332_v32, %v4336_v33  ;;  %v9730_v39 = vcombine.high %v4340_v36, %v4344_v37  ;;  %v11264_v33 = vld [vmem:[#allocation13 + $0x80] ss:$16 sps:$4 sm:$0xff]  }
 0x78e   :  { %6468 = vmatpush1.bf16.msra.mxu1 %v9871_v41  ;;  %v4352_v41 = vld [vmem:[#allocation10 + $0xe8] sm:$0xff] }
 0x78f   :  { %6469 = vmatprep.subr.bf16.mxu1 %v9880_v42  ;;  %v9729_v42 = vcombine.low %v4340_v36, %v4344_v37  ;;  %v9738_v43 = vcombine.high %v4348_v40, %v4352_v41  ;;  %v4432_v36 = vld [vmem:[#allocation10 + $0x368] sm:$0xff] }
 0x792   :  { %6470 = vmatpush1.bf16.msra.mxu1 %v9879_v45  ;;  %v4360_v45 = vld [vmem:[#allocation10 + $0x128] sm:$0xff] }
 0x793   :  { %6471 = vmatprep.subr.bf16.mxu1 %v9888_v46  ;;  %v9737_v46 = vcombine.low %v4348_v40, %v4352_v41  ;;  %v9746_v47 = vcombine.high %v4356_v44, %v4360_v45  ;;  %v11269_v40 = vld [vmem:[#allocation13 + $0xa4] ss:$16 sps:$4 sm:$0xff]   ;;  %v4436_v41 = vld [vmem:[#allocation10 + $0x388] sm:$0xff] }
 0x796   :  { %6472 = vmatpush1.bf16.msra.mxu1 %v9887_v49  ;;  %v4368_v49 = vld [vmem:[#allocation10 + $0x168] sm:$0xff] }
 0x797   :  { %6473 = vmatprep.subr.bf16.mxu1 %v9896_v50  ;;  %v9745_v50 = vcombine.low %v4356_v44, %v4360_v45  ;;  %v9754_v51 = vcombine.high %v4364_v48, %v4368_v49  ;;  %v11270_v45 = vld [vmem:[#allocation13 + $0xc0] ss:$16 sps:$4 sm:$0xff]  }
 0x79a   :  { %6474 = vmatpush1.bf16.msra.mxu1 %v9895_v58  ;;  %v4376_v58 = vld [vmem:[#allocation10 + $0x1a8] sm:$0xff] }
 0x79b   :  { %6475 = vmatprep.subr.bf16.mxu1 %v9904_v59  ;;  %v9753_v59 = vcombine.low %v4364_v48, %v4368_v49  ;;  %v9762_v60 = vcombine.high %v4372_v52, %v4376_v58  ;;  %v4448_v48 = vld [vmem:[#allocation10 + $0x3e8] sm:$0xff] }
 0x79e   :  { %6476 = vmatpush1.bf16.msra.mxu1 %v9903_v62  ;;  %v4384_v62 = vld [vmem:[#allocation10 + $0x1e8] sm:$0xff] }
 0x79f   :  { %6477 = vmatprep.subr.bf16.mxu1 %v9912_v63  ;;  %v9761_v63 = vcombine.low %v4372_v52, %v4376_v58  ;;  %v9770_v0 = vcombine.high %v4380_v61, %v4384_v62  ;;  %v11275_v52 = vld [vmem:[#allocation13 + $0xe4] ss:$16 sps:$4 sm:$0xff]   ;;  %v4452_v58 = vld [vmem:[#allocation10 + $0x408] sm:$0xff] }
 0x7a2   :  { %6478 = vmatpush1.bf16.msra.mxu1 %v9911_v2  ;;  %v4392_v2 = vld [vmem:[#allocation10 + $0x228] sm:$0xff] }
 0x7a3   :  { %6479 = vmatprep.subr.bf16.mxu1 %v9920_v3  ;;  %v9769_v3 = vcombine.low %v4380_v61, %v4384_v62  ;;  %v9778_v4 = vcombine.high %v4388_v1, %v4392_v2  ;;  %v9777_v8 = vcombine.low %v4388_v1, %v4392_v2  ;;  %v11276_v62 = vld [vmem:[#allocation13 + $0x100] ss:$16 sps:$4 sm:$0xff]   ;;  %v4464_v1 = vld [vmem:[#allocation10 + $0x468] sm:$0xff] }
 0x7a6   :  { %6480 = vmatpush1.bf16.msra.mxu1 %v9919_v6  ;;  %v11254_v6 = vld [vmem:[#allocation13 + $0x4] ss:$16 sps:$4 sm:$0xff]  }
 0x7a7   :  { %6481 = vmatprep.subr.bf16.mxu1 %v9928_v54  ;;  %v4396_v54 = vld [vmem:[#allocation10 + $0x248] sm:$0xff]  ;;  %8384 = vmatprep.subr.bf16.mxu0 %v11254_v6 }
 0x7a8   :  { %8385 = vmatpush1.bf16.msra.mxu0 %v11252_v5  ;;  %v4468_v5 = vld [vmem:[#allocation10 + $0x488] sm:$0xff] }
 0x7a9   :  { %8386 = vmatprep.subr.bf16.mxu0 %v11257_v11  ;;  %v4472_v6 = vld [vmem:[#allocation10 + $0x4a8] sm:$0xff] }
 0x7aa   :  { %6482 = vmatpush1.bf16.msra.mxu1 %v9927_v9  ;;  %v9786_v9 = vcombine.high %v4396_v54, %v4400_v7  ;;  %v4476_v11 = vld [vmem:[#allocation10 + $0x4c8] sm:$0xff] }
 0x7ab   :  { %6483 = vmatprep.subr.bf16.mxu1 %v9936_v10  ;;  %v11255_v10 = vld [vmem:[#allocation13 + $0x20] ss:$16 sps:$4 sm:$0xff]  }
 0x7ac   :  { %8387 = vmatpush1.bf16.msra.mxu0 %v11255_v10  ;;  %v11284_v10 = vld [vmem:[#allocation13 + $0x144] ss:$16 sps:$4 sm:$0xff]  }
 0x7ae   :  { %6484 = vmatpush1.bf16.msra.mxu1 %v9935_v13  ;;  %v4408_v13 = vld [vmem:[#allocation10 + $0x2a8] sm:$0xff] }
 0x7af   :  { %6485 = vmatprep.subr.bf16.mxu1 %v9944_v16  ;;  %v9785_v16 = vcombine.low %v4396_v54, %v4400_v7  ;;  %v9794_v17 = vcombine.high %v4404_v12, %v4408_v13  ;;  %v9793_v25 = vcombine.low %v4404_v12, %v4408_v13  ;;  %v11279_v54 = vld [vmem:[#allocation13 + $0x120] ss:$16 sps:$4 sm:$0xff]   ;;  %v4480_v12 = vld [vmem:[#allocation10 + $0x4e8] sm:$0xff]  ;;  %v9857_v13 = vcombine.low %v4468_v5, %v4472_v6 }
 0x7b2   :  { %6486 = vmatpush1.bf16.msra.mxu1 %v9943_v21  ;;  %v11260_v21 = vld [vmem:[#allocation13 + $0x44] ss:$16 sps:$4 sm:$0xff]  }
 0x7b3   :  { %6487 = vmatprep.subr.bf16.mxu1 %v9952_v22  ;;  %v4412_v22 = vld [vmem:[#allocation10 + $0x2c8] sm:$0xff]  ;;  %8388 = vmatprep.subr.bf16.mxu0 %v11260_v21 }
 0x7b4   :  { %8389 = vmatpush1.bf16.msra.mxu0 %v11258_v20  ;;  %v11287_v20 = vld [vmem:[#allocation13 + $0x164] ss:$16 sps:$4 sm:$0xff]   ;;  %v4484_v21 = vld [vmem:[#allocation10 + $0x508] sm:$0xff] }
 0x7b5   :  { %8390 = vmatprep.subr.bf16.mxu0 %v11263_v29  ;;  %v4492_v29 = vld [vmem:[#allocation10 + $0x548] sm:$0xff] }
 0x7b6   :  { %6488 = vmatpush1.bf16.msra.mxu1 %v9951_v26  ;;  %v9802_v26 = vcombine.high %v4412_v22, %v4416_v24 }
 0x7b7   :  { %6489 = vmatprep.subr.bf16.mxu1 %v9960_v27  ;;  %v11261_v27 = vld [vmem:[#allocation13 + $0x60] ss:$16 sps:$4 sm:$0xff]  }
 0x7b8   :  { %8391 = vmatpush1.bf16.msra.mxu0 %v11261_v27  ;;  %v11290_v27 = vld [vmem:[#allocation13 + $0x184] ss:$16 sps:$4 sm:$0xff]  }
 0x7ba   :  { %6490 = vmatpush1.bf16.msra.mxu1 %v9959_v31  ;;  %v4424_v31 = vld [vmem:[#allocation10 + $0x328] sm:$0xff] }
 0x7bb   :  { %6502 = vmatprep.subr.bf16.mxu1 %v9714_v28  ;;  %v9801_v28 = vcombine.low %v4412_v22, %v4416_v24  ;;  %v9810_v32 = vcombine.high %v4420_v30, %v4424_v31  ;;  %v9809_v37 = vcombine.low %v4420_v30, %v4424_v31  ;;  %v4488_v22 = vld [vmem:[#allocation10 + $0x528] sm:$0xff]  ;;  %v9865_v24 = vcombine.low %v4476_v11, %v4480_v12 }
 0x7bc   :  { %v4496_v30 = vld [vmem:[#allocation10 + $0x568] sm:$0xff]  ;;  %v9873_v31 = vcombine.low %v4484_v21, %v4488_v22 }
 0x7bd   :  { %6492 = vmatmul.mubr.bf16.vlgmr.msra.gmra.mrb[20].mxu1 %v12549_v55 }
 0x7be   :  { %6503 = vmatpush1.bf16.msra.mxu1 %v9713_v34  ;;  %6534 = vmatprep.mubr.bf16.mxu1 %v12551_v56  ;;  %v11266_v34 = vld [vmem:[#allocation13 + $0x84] ss:$16 sps:$4 sm:$0xff]  }
 0x7bf   :  { %6504 = vmatprep.subr.bf16.mxu1 %v9722_v35  ;;  %v4428_v35 = vld [vmem:[#allocation10 + $0x348] sm:$0xff]  ;;  %8392 = vmatprep.subr.bf16.mxu0 %v11266_v34 }
 0x7c0   :  { %8393 = vmatpush1.bf16.msra.mxu0 %v11264_v33  ;;  %v11293_v33 = vld [vmem:[#allocation13 + $0x1a4] ss:$16 sps:$4 sm:$0xff]   ;;  %v4500_v34 = vld [vmem:[#allocation10 + $0x588] sm:$0xff] }
 0x7c1   :  { %8394 = vmatprep.subr.bf16.mxu0 %v11269_v40  ;;  %v4512_v40 = vld [vmem:[#allocation10 + $0x5e8] sm:$0xff] }
 0x7c2   :  { %6505 = vmatpush1.bf16.msra.mxu1 %v9721_v38  ;;  %v9818_v38 = vcombine.high %v4428_v35, %v4432_v36 }
 0x7c3   :  { %6506 = vmatprep.subr.bf16.mxu1 %v9730_v39  ;;  %v11267_v39 = vld [vmem:[#allocation13 + $0xa0] ss:$16 sps:$4 sm:$0xff]  }
 0x7c4   :  { %8395 = vmatpush1.bf16.msra.mxu0 %v11267_v39  ;;  %v4508_v39 = vld [vmem:[#allocation10 + $0x5c8] sm:$0xff] }
 0x7c6   :  { %6507 = vmatpush1.bf16.msra.mxu1 %v9729_v42  ;;  %v4440_v42 = vld [vmem:[#allocation10 + $0x3a8] sm:$0xff] }
 0x7c7   :  { %6508 = vmatprep.subr.bf16.mxu1 %v9738_v43  ;;  %v9817_v43 = vcombine.low %v4428_v35, %v4432_v36  ;;  %v9826_v44 = vcombine.high %v4436_v41, %v4440_v42  ;;  %v9825_v49 = vcombine.low %v4436_v41, %v4440_v42  ;;  %v4504_v35 = vld [vmem:[#allocation10 + $0x5a8] sm:$0xff]  ;;  %v9881_v36 = vcombine.low %v4492_v29, %v4496_v30  ;;  %v11294_v41 = vld [vmem:[#allocation13 + $0x1c0] ss:$16 sps:$4 sm:$0xff]  }
 0x7c8   :  { %v9889_v42 = vcombine.low %v4500_v34, %v4504_v35 }
 0x7ca   :  { %6509 = vmatpush1.bf16.msra.mxu1 %v9737_v46  ;;  %v11272_v46 = vld [vmem:[#allocation13 + $0xc4] ss:$16 sps:$4 sm:$0xff]  }
 0x7cb   :  { %6510 = vmatprep.subr.bf16.mxu1 %v9746_v47  ;;  %v4444_v47 = vld [vmem:[#allocation10 + $0x3c8] sm:$0xff]  ;;  %8396 = vmatprep.subr.bf16.mxu0 %v11272_v46 }
 0x7cc   :  { %8397 = vmatpush1.bf16.msra.mxu0 %v11270_v45  ;;  %v4516_v45 = vld [vmem:[#allocation10 + $0x608] sm:$0xff] }
 0x7cd   :  { %8398 = vmatprep.subr.bf16.mxu0 %v11275_v52  ;;  %v4520_v46 = vld [vmem:[#allocation10 + $0x628] sm:$0xff] }
 0x7ce   :  { %6511 = vmatpush1.bf16.msra.mxu1 %v9745_v50  ;;  %v9834_v50 = vcombine.high %v4444_v47, %v4448_v48  ;;  %v9905_v52 = vcombine.low %v4516_v45, %v4520_v46 }
 0x7cf   :  { %6512 = vmatprep.subr.bf16.mxu1 %v9754_v51  ;;  %v11273_v51 = vld [vmem:[#allocation13 + $0xe0] ss:$16 sps:$4 sm:$0xff]  }
 0x7d0   :  { %8399 = vmatpush1.bf16.msra.mxu0 %v11273_v51  ;;  %v4528_v51 = vld [vmem:[#allocation10 + $0x668] sm:$0xff] }
 0x7d2   :  { %6513 = vmatpush1.bf16.msra.mxu1 %v9753_v59  ;;  %v4456_v59 = vld [vmem:[#allocation10 + $0x428] sm:$0xff] }
 0x7d3   :  { %6514 = vmatprep.subr.bf16.mxu1 %v9762_v60  ;;  %v9833_v60 = vcombine.low %v4444_v47, %v4448_v48  ;;  %v9842_v61 = vcombine.high %v4452_v58, %v4456_v59  ;;  %v9841_v2 = vcombine.low %v4452_v58, %v4456_v59  ;;  %v11297_v47 = vld [vmem:[#allocation13 + $0x1e0] ss:$16 sps:$4 sm:$0xff]   ;;  %v9897_v48 = vcombine.low %v4508_v39, %v4512_v40  ;;  %v4532_v59 = vld [vmem:[#allocation10 + $0x688] sm:$0xff] }
 0x7d6   :  { %6515 = vmatpush1.bf16.msra.mxu1 %v9761_v63  ;;  %v11278_v63 = vld [vmem:[#allocation13 + $0x104] ss:$16 sps:$4 sm:$0xff]  }
 0x7d7   :  { %6516 = vmatprep.subr.bf16.mxu1 %v9770_v0  ;;  %v4460_v0 = vld [vmem:[#allocation10 + $0x448] sm:$0xff]  ;;  %8400 = vmatprep.subr.bf16.mxu0 %v11278_v63 }
 0x7d8   :  { %8401 = vmatpush1.bf16.msra.mxu0 %v11276_v62  ;;  %v9849_v7 = vcombine.low %v4460_v0, %v4464_v1  ;;  %v4540_v63 = vld [vmem:[#allocation10 + $0x6c8] sm:$0xff] }
 0x7da   :  { %6517 = vmatpush1.bf16.msra.mxu1 %v9769_v3  ;;  %v9850_v3 = vcombine.high %v4460_v0, %v4464_v1  ;;  %v4544_v0 = vld [vmem:[#allocation10 + $0x6e8] sm:$0xff] }
 0x7db   :  { %6518 = vmatprep.subr.bf16.mxu1 %v9778_v4  ;;  %v11281_v4 = vld [vmem:[#allocation13 + $0x124] ss:$16 sps:$4 sm:$0xff]  }
 0x7dc   :  { %8402 = vmatprep.subr.bf16.mxu0 %v11281_v4  ;;  %v4552_v4 = vld [vmem:[#allocation10 + $0x728] sm:$0xff] }
 0x7dd   :  { %8403 = vmatpush1.bf16.msra.mxu0 %v11279_v54  ;;  %v4556_v54 = vld [vmem:[#allocation10 + $0x748] sm:$0xff] }
 0x7de   :  { %6519 = vmatpush1.bf16.msra.mxu1 %v9777_v8  ;;  %v9858_v8 = vcombine.high %v4468_v5, %v4472_v6  ;;  %8404 = vmatprep.subr.bf16.mxu0 %v11284_v10  ;;  %v9929_v5 = vcombine.low %v4540_v63, %v4544_v0  ;;  %v4564_v10 = vld [vmem:[#allocation10 + $0x788] sm:$0xff] }
 0x7df   :  { %6520 = vmatprep.subr.bf16.mxu1 %v9786_v9  ;;  %v11282_v9 = vld [vmem:[#allocation13 + $0x140] ss:$16 sps:$4 sm:$0xff]  }
 0x7e1   :  { %8405 = vmatpush1.bf16.msra.mxu0 %v11282_v9 }
 0x7e2   :  { %6521 = vmatpush1.bf16.msra.mxu1 %v9785_v16  ;;  %v9866_v16 = vcombine.high %v4476_v11, %v4480_v12  ;;  %8406 = vmatprep.subr.bf16.mxu0 %v11287_v20  ;;  %v4568_v11 = vld [vmem:[#allocation10 + $0x7a8] sm:$0xff] }
 0x7e3   :  { %6522 = vmatprep.subr.bf16.mxu1 %v9794_v17  ;;  %v11285_v17 = vld [vmem:[#allocation13 + $0x160] ss:$16 sps:$4 sm:$0xff]   ;;  %v9953_v20 = vcombine.low %v4564_v10, %v4568_v11 }
 0x7e5   :  { %8407 = vmatpush1.bf16.msra.mxu0 %v11285_v17  ;;  %v4576_v17 = vld [vmem:[#allocation10 + $0x7e8] sm:$0xff] }
 0x7e6   :  { %6523 = vmatpush1.bf16.msra.mxu1 %v9793_v25  ;;  %v9874_v25 = vcombine.high %v4484_v21, %v4488_v22  ;;  %8408 = vmatprep.subr.bf16.mxu0 %v11290_v27  ;;  %v4325_v22 = vld [vmem:[#allocation10 + $0x10] sm:$0xff] }
 0x7e7   :  { %6524 = vmatprep.subr.bf16.mxu1 %v9802_v26  ;;  %v11288_v26 = vld [vmem:[#allocation13 + $0x180] ss:$16 sps:$4 sm:$0xff]  }
 0x7e8   :  { %v4333_v27 = vld [vmem:[#allocation10 + $0x50] sm:$0xff] }
 0x7e9   :  { %8409 = vmatpush1.bf16.msra.mxu0 %v11288_v26 }
 0x7ea   :  { %6525 = vmatpush1.bf16.msra.mxu1 %v9801_v28  ;;  %v9882_v28 = vcombine.high %v4492_v29, %v4496_v30  ;;  %8410 = vmatprep.subr.bf16.mxu0 %v11293_v33  ;;  %v4337_v29 = vld [vmem:[#allocation10 + $0x70] sm:$0xff] }
 0x7eb   :  { %6526 = vmatprep.subr.bf16.mxu1 %v9810_v32  ;;  %v11291_v32 = vld [vmem:[#allocation13 + $0x1a0] ss:$16 sps:$4 sm:$0xff]   ;;  %v9723_v33 = vcombine.low %v4333_v27, %v4337_v29 }
 0x7ed   :  { %8411 = vmatpush1.bf16.msra.mxu0 %v11291_v32  ;;  %v4345_v32 = vld [vmem:[#allocation10 + $0xb0] sm:$0xff] }
 0x7ee   :  { %6527 = vmatpush1.bf16.msra.mxu1 %v9809_v37  ;;  %v9890_v37 = vcombine.high %v4500_v34, %v4504_v35  ;;  %v4349_v35 = vld [vmem:[#allocation10 + $0xd0] sm:$0xff] }
 0x7ef   :  { %6528 = vmatprep.subr.bf16.mxu1 %v9818_v38  ;;  %v11296_v38 = vld [vmem:[#allocation13 + $0x1c4] ss:$16 sps:$4 sm:$0xff]  }
 0x7f0   :  { %8412 = vmatprep.subr.bf16.mxu0 %v11296_v38 }
 0x7f1   :  { %8413 = vmatpush1.bf16.msra.mxu0 %v11294_v41 }
 0x7f2   :  { %6529 = vmatpush1.bf16.msra.mxu1 %v9817_v43  ;;  %v9898_v43 = vcombine.high %v4508_v39, %v4512_v40  ;;  %v4357_v39 = vld [vmem:[#allocation10 + $0x110] sm:$0xff] }
 0x7f3   :  { %6530 = vmatprep.subr.bf16.mxu1 %v9826_v44  ;;  %v11299_v44 = vld [vmem:[#allocation13 + $0x1e4] ss:$16 sps:$4 sm:$0xff]  }
 0x7f4   :  { %8414 = vmatprep.subr.bf16.mxu0 %v11299_v44  ;;  %v4361_v40 = vld [vmem:[#allocation10 + $0x130] sm:$0xff] }
 0x7f5   :  { %8415 = vmatpush1.bf16.msra.mxu0 %v11297_v47  ;;  %v4369_v44 = vld [vmem:[#allocation10 + $0x170] sm:$0xff] }
 0x7f6   :  { %6531 = vmatpush1.bf16.msra.mxu1 %v9825_v49  ;;  %v9906_v49 = vcombine.high %v4516_v45, %v4520_v46  ;;  %v9747_v45 = vcombine.low %v4357_v39, %v4361_v40  ;;  %v4373_v47 = vld [vmem:[#allocation10 + $0x190] sm:$0xff] }
 0x7f7   :  { %6532 = vmatprep.subr.bf16.mxu1 %v9834_v50  ;;  %v4524_v50 = vld [vmem:[#allocation10 + $0x648] sm:$0xff] }
 0x7f8   :  { %v9914_v58 = vcombine.high %v4524_v50, %v4528_v51 }
 0x7fa   :  { %6533 = vmatpush1.bf16.msra.mxu1 %v9833_v60  ;;  %v4536_v60 = vld [vmem:[#allocation10 + $0x6a8] sm:$0xff] }
 0x7fb   :  { %6545 = vmatprep.subr.bf16.mxu1 %v9842_v61  ;;  %v9913_v61 = vcombine.low %v4524_v50, %v4528_v51  ;;  %v9922_v62 = vcombine.high %v4532_v59, %v4536_v60  ;;  %v9921_v1 = vcombine.low %v4532_v59, %v4536_v60  ;;  %v4381_v51 = vld [vmem:[#allocation10 + $0x1d0] sm:$0xff] }
 0x7fc   :  { %v4389_v60 = vld [vmem:[#allocation10 + $0x210] sm:$0xff] }
 0x7fd   :  { %6535 = vmatmul.mubr.bf16.vlgmr.msra.gmra.mrb[24].mxu1 %v12547_v53 }
 0x7fe   :  { %6546 = vmatpush1.bf16.msra.mxu1 %v9841_v2  ;;  %6577 = vmatprep.mubr.bf16.mxu1 %v12553_v57  ;;  %v9930_v2 = vcombine.high %v4540_v63, %v4544_v0  ;;  %v11302_v0 = vld [vmem:[#allocation13 + $0x204] ss:$16 sps:$4 sm:$0xff]  }
 0x7ff   :  { %6547 = vmatprep.subr.bf16.mxu1 %v9850_v3  ;;  %v4548_v3 = vld [vmem:[#allocation10 + $0x708] sm:$0xff]  ;;  %8427 = vmatprep.subr.bf16.mxu0 %v11302_v0  ;;  %v4505_v0 = vld [vmem:[#allocation10 + $0x5b0] sm:$0xff] }
 0x800   :  { %v9938_v6 = vcombine.high %v4548_v3, %v4552_v4 }
 0x802   :  { %6548 = vmatpush1.bf16.msra.mxu1 %v9849_v7  ;;  %v4560_v7 = vld [vmem:[#allocation10 + $0x768] sm:$0xff] }
 0x803   :  { %6549 = vmatprep.subr.bf16.mxu1 %v9858_v8  ;;  %v9937_v8 = vcombine.low %v4548_v3, %v4552_v4  ;;  %v9946_v9 = vcombine.high %v4556_v54, %v4560_v7  ;;  %v9945_v12 = vcombine.low %v4556_v54, %v4560_v7 }
 0x806   :  { %6550 = vmatpush1.bf16.msra.mxu1 %v9857_v13  ;;  %v9954_v13 = vcombine.high %v4564_v10, %v4568_v11 }
 0x807   :  { %6551 = vmatprep.subr.bf16.mxu1 %v9866_v16  ;;  %v4572_v16 = vld [vmem:[#allocation10 + $0x7c8] sm:$0xff] }
 0x808   :  { %v9962_v21 = vcombine.high %v4572_v16, %v4576_v17 }
 0x80a   :  { %6552 = vmatpush1.bf16.msra.mxu1 %v9865_v24  ;;  %v4329_v24 = vld [vmem:[#allocation10 + $0x30] sm:$0xff] }
 0x80b   :  { %6553 = vmatprep.subr.bf16.mxu1 %v9874_v25  ;;  %v9961_v25 = vcombine.low %v4572_v16, %v4576_v17  ;;  %v9716_v26 = vcombine.high %v4325_v22, %v4329_v24  ;;  %v9715_v30 = vcombine.low %v4325_v22, %v4329_v24 }
 0x80e   :  { %6554 = vmatpush1.bf16.msra.mxu1 %v9873_v31  ;;  %v9724_v31 = vcombine.high %v4333_v27, %v4337_v29 }
 0x80f   :  { %6555 = vmatprep.subr.bf16.mxu1 %v9882_v28  ;;  %v4341_v28 = vld [vmem:[#allocation10 + $0x90] sm:$0xff] }
 0x810   :  { %v9732_v34 = vcombine.high %v4341_v28, %v4345_v32 }
 0x812   :  { %6556 = vmatpush1.bf16.msra.mxu1 %v9881_v36  ;;  %v4353_v36 = vld [vmem:[#allocation10 + $0xf0] sm:$0xff] }
 0x813   :  { %6557 = vmatprep.subr.bf16.mxu1 %v9890_v37  ;;  %v9731_v37 = vcombine.low %v4341_v28, %v4345_v32  ;;  %v9740_v38 = vcombine.high %v4349_v35, %v4353_v36  ;;  %v9739_v41 = vcombine.low %v4349_v35, %v4353_v36 }
 0x816   :  { %6558 = vmatpush1.bf16.msra.mxu1 %v9889_v42  ;;  %v9748_v42 = vcombine.high %v4357_v39, %v4361_v40 }
 0x817   :  { %6559 = vmatprep.subr.bf16.mxu1 %v9898_v43  ;;  %v4365_v43 = vld [vmem:[#allocation10 + $0x150] sm:$0xff] }
 0x818   :  { %v9756_v46 = vcombine.high %v4365_v43, %v4369_v44 }
 0x81a   :  { %6560 = vmatpush1.bf16.msra.mxu1 %v9897_v48  ;;  %v4377_v48 = vld [vmem:[#allocation10 + $0x1b0] sm:$0xff] }
 0x81b   :  { %6561 = vmatprep.subr.bf16.mxu1 %v9906_v49  ;;  %v9755_v49 = vcombine.low %v4365_v43, %v4369_v44  ;;  %v9764_v50 = vcombine.high %v4373_v47, %v4377_v48 }
 0x81e   :  { %6562 = vmatpush1.bf16.msra.mxu1 %v9905_v52  ;;  %v4385_v52 = vld [vmem:[#allocation10 + $0x1f0] sm:$0xff] }
 0x81f   :  { %6563 = vmatprep.subr.bf16.mxu1 %v9914_v58  ;;  %v9763_v58 = vcombine.low %v4373_v47, %v4377_v48  ;;  %v9772_v59 = vcombine.high %v4381_v51, %v4385_v52 }
 0x822   :  { %6564 = vmatpush1.bf16.msra.mxu1 %v9913_v61  ;;  %v4393_v61 = vld [vmem:[#allocation10 + $0x230] sm:$0xff] }
 0x823   :  { %6565 = vmatprep.subr.bf16.mxu1 %v9922_v62  ;;  %v9771_v62 = vcombine.low %v4381_v51, %v4385_v52  ;;  %v9780_v63 = vcombine.high %v4389_v60, %v4393_v61  ;;  %v9779_v3 = vcombine.low %v4389_v60, %v4393_v61 }
 0x826   :  { %6566 = vmatpush1.bf16.msra.mxu1 %v9921_v1  ;;  %v4397_v1 = vld [vmem:[#allocation10 + $0x250] sm:$0xff] }
 0x827   :  { %6567 = vmatprep.subr.bf16.mxu1 %v9930_v2  ;;  %v4401_v2 = vld [vmem:[#allocation10 + $0x270] sm:$0xff] }
 0x828   :  { %v9788_v4 = vcombine.high %v4397_v1, %v4401_v2  ;;  %v9787_v54 = vcombine.low %v4397_v1, %v4401_v2 }
 0x82a   :  { %6568 = vmatpush1.bf16.msra.mxu1 %v9929_v5  ;;  %v4405_v5 = vld [vmem:[#allocation10 + $0x290] sm:$0xff] }
 0x82b   :  { %6569 = vmatprep.subr.bf16.mxu1 %v9938_v6  ;;  %v4409_v6 = vld [vmem:[#allocation10 + $0x2b0] sm:$0xff] }
 0x82c   :  { %v9796_v7 = vcombine.high %v4405_v5, %v4409_v6  ;;  %v9795_v10 = vcombine.low %v4405_v5, %v4409_v6  ;;  %v4509_v6 = vld [vmem:[#allocation10 + $0x5d0] sm:$0xff] }
 0x82e   :  { %6570 = vmatpush1.bf16.msra.mxu1 %v9937_v8  ;;  %v4413_v8 = vld [vmem:[#allocation10 + $0x2d0] sm:$0xff] }
 0x82f   :  { %6571 = vmatprep.subr.bf16.mxu1 %v9946_v9  ;;  %v4417_v9 = vld [vmem:[#allocation10 + $0x2f0] sm:$0xff] }
 0x830   :  { %v9804_v11 = vcombine.high %v4413_v8, %v4417_v9  ;;  %v9803_v16 = vcombine.low %v4413_v8, %v4417_v9 }
 0x832   :  { %6572 = vmatpush1.bf16.msra.mxu1 %v9945_v12  ;;  %v4421_v12 = vld [vmem:[#allocation10 + $0x310] sm:$0xff] }
 0x833   :  { %6573 = vmatprep.subr.bf16.mxu1 %v9954_v13  ;;  %v4425_v13 = vld [vmem:[#allocation10 + $0x330] sm:$0xff] }
 0x834   :  { %v9812_v17 = vcombine.high %v4421_v12, %v4425_v13  ;;  %v9811_v22 = vcombine.low %v4421_v12, %v4425_v13 }
 0x836   :  { %6574 = vmatpush1.bf16.msra.mxu1 %v9953_v20  ;;  %v4429_v20 = vld [vmem:[#allocation10 + $0x350] sm:$0xff] }
 0x837   :  { %6575 = vmatprep.subr.bf16.mxu1 %v9962_v21  ;;  %v4433_v21 = vld [vmem:[#allocation10 + $0x370] sm:$0xff] }
 0x838   :  { %v9820_v24 = vcombine.high %v4429_v20, %v4433_v21  ;;  %v9819_v27 = vcombine.low %v4429_v20, %v4433_v21  ;;  %v4517_v20 = vld [vmem:[#allocation10 + $0x610] sm:$0xff] }
 0x839   :  { %v4521_v21 = vld [vmem:[#allocation10 + $0x630] sm:$0xff] }
 0x83a   :  { %6576 = vmatpush1.bf16.msra.mxu1 %v9961_v25  ;;  %v4437_v25 = vld [vmem:[#allocation10 + $0x390] sm:$0xff] }
 0x83b   :  { %6588 = vmatprep.subr.bf16.mxu1 %v9716_v26  ;;  %v4441_v26 = vld [vmem:[#allocation10 + $0x3b0] sm:$0xff] }
 0x83c   :  { %v9828_v29 = vcombine.high %v4437_v25, %v4441_v26  ;;  %v9827_v28 = vcombine.low %v4437_v25, %v4441_v26  ;;  %v11300_v26 = vld [vmem:[#allocation13 + $0x200] ss:$16 sps:$4 sm:$0xff]  }
 0x83d   :  { %6578 = vmatmul.mubr.bf16.vlgmr.msra.gmra.mrb[24].mxu1 %v12549_v55 }
 0x83e   :  { %6589 = vmatpush1.bf16.msra.mxu1 %v9715_v30  ;;  %6620 = vmatprep.mubr.bf16.mxu1 %v12551_v56  ;;  %v4445_v30 = vld [vmem:[#allocation10 + $0x3d0] sm:$0xff] }
 0x83f   :  { %6590 = vmatprep.subr.bf16.mxu1 %v9724_v31  ;;  %v4449_v31 = vld [vmem:[#allocation10 + $0x3f0] sm:$0xff] }
 0x840   :  { %v9836_v32 = vcombine.high %v4445_v30, %v4449_v31  ;;  %v9835_v35 = vcombine.low %v4445_v30, %v4449_v31  ;;  %v4525_v30 = vld [vmem:[#allocation10 + $0x650] sm:$0xff] }
 0x841   :  { %v4529_v31 = vld [vmem:[#allocation10 + $0x670] sm:$0xff] }
 0x842   :  { %6591 = vmatpush1.bf16.msra.mxu1 %v9723_v33  ;;  %v4453_v33 = vld [vmem:[#allocation10 + $0x410] sm:$0xff] }
 0x843   :  { %6592 = vmatprep.subr.bf16.mxu1 %v9732_v34  ;;  %v4457_v34 = vld [vmem:[#allocation10 + $0x430] sm:$0xff] }
 0x844   :  { %v9844_v36 = vcombine.high %v4453_v33, %v4457_v34  ;;  %v9843_v39 = vcombine.low %v4453_v33, %v4457_v34  ;;  %v9916_v33 = vcombine.high %v4525_v30, %v4529_v31  ;;  %v11308_v34 = vld [vmem:[#allocation13 + $0x244] ss:$16 sps:$4 sm:$0xff]  }
 0x846   :  { %6593 = vmatpush1.bf16.msra.mxu1 %v9731_v37  ;;  %v4461_v37 = vld [vmem:[#allocation10 + $0x450] sm:$0xff] }
 0x847   :  { %6594 = vmatprep.subr.bf16.mxu1 %v9740_v38  ;;  %v4465_v38 = vld [vmem:[#allocation10 + $0x470] sm:$0xff] }
 0x848   :  { %v9852_v40 = vcombine.high %v4461_v37, %v4465_v38  ;;  %v9851_v43 = vcombine.low %v4461_v37, %v4465_v38  ;;  %v9915_v37 = vcombine.low %v4525_v30, %v4529_v31  ;;  %v11306_v38 = vld [vmem:[#allocation13 + $0x240] ss:$16 sps:$4 sm:$0xff]   ;;  %v4342_v31 = vld [vmem:[#allocation10 + $0x98] sm:$0xff] }
 0x849   :  { %v11327_v30 = vld [vmem:[#allocation13 + $0x320] ss:$16 sps:$4 sm:$0xff]  }
 0x84a   :  { %6595 = vmatpush1.bf16.msra.mxu1 %v9739_v41  ;;  %v4469_v41 = vld [vmem:[#allocation10 + $0x490] sm:$0xff] }
 0x84b   :  { %6596 = vmatprep.subr.bf16.mxu1 %v9748_v42  ;;  %v4473_v42 = vld [vmem:[#allocation10 + $0x4b0] sm:$0xff] }
 0x84c   :  { %v9860_v44 = vcombine.high %v4469_v41, %v4473_v42  ;;  %v9859_v47 = vcombine.low %v4469_v41, %v4473_v42  ;;  %v4541_v41 = vld [vmem:[#allocation10 + $0x6d0] sm:$0xff] }
 0x84d   :  { %v4545_v42 = vld [vmem:[#allocation10 + $0x6f0] sm:$0xff] }
 0x84e   :  { %6597 = vmatpush1.bf16.msra.mxu1 %v9747_v45  ;;  %v4477_v45 = vld [vmem:[#allocation10 + $0x4d0] sm:$0xff] }
 0x84f   :  { %6598 = vmatprep.subr.bf16.mxu1 %v9756_v46  ;;  %v4481_v46 = vld [vmem:[#allocation10 + $0x4f0] sm:$0xff] }
 0x850   :  { %v9868_v48 = vcombine.high %v4477_v45, %v4481_v46  ;;  %v9867_v51 = vcombine.low %v4477_v45, %v4481_v46  ;;  %v9932_v45 = vcombine.high %v4541_v41, %v4545_v42  ;;  %v11314_v46 = vld [vmem:[#allocation13 + $0x284] ss:$16 sps:$4 sm:$0xff]  }
 0x852   :  { %6599 = vmatpush1.bf16.msra.mxu1 %v9755_v49  ;;  %v4485_v49 = vld [vmem:[#allocation10 + $0x510] sm:$0xff] }
 0x853   :  { %6600 = vmatprep.subr.bf16.mxu1 %v9764_v50  ;;  %v4489_v50 = vld [vmem:[#allocation10 + $0x530] sm:$0xff] }
 0x854   :  { %v9876_v52 = vcombine.high %v4485_v49, %v4489_v50  ;;  %v9875_v60 = vcombine.low %v4485_v49, %v4489_v50  ;;  %v9931_v49 = vcombine.low %v4541_v41, %v4545_v42  ;;  %v11312_v50 = vld [vmem:[#allocation13 + $0x280] ss:$16 sps:$4 sm:$0xff]   ;;  %v4358_v42 = vld [vmem:[#allocation10 + $0x118] sm:$0xff] }
 0x855   :  { %v11333_v41 = vld [vmem:[#allocation13 + $0x360] ss:$16 sps:$4 sm:$0xff]  }
 0x856   :  { %6601 = vmatpush1.bf16.msra.mxu1 %v9763_v58  ;;  %v4493_v58 = vld [vmem:[#allocation10 + $0x550] sm:$0xff] }
 0x857   :  { %6602 = vmatprep.subr.bf16.mxu1 %v9772_v59  ;;  %v4497_v59 = vld [vmem:[#allocation10 + $0x570] sm:$0xff] }
 0x858   :  { %v9884_v61 = vcombine.high %v4493_v58, %v4497_v59  ;;  %v9883_v1 = vcombine.low %v4493_v58, %v4497_v59  ;;  %v4557_v58 = vld [vmem:[#allocation10 + $0x750] sm:$0xff] }
 0x859   :  { %v4561_v59 = vld [vmem:[#allocation10 + $0x770] sm:$0xff] }
 0x85a   :  { %6603 = vmatpush1.bf16.msra.mxu1 %v9771_v62  ;;  %v12608_v62 = vld [vmem:[%s12803_s13] sm:$0xff] }
 0x85b   :  { %6604 = vmatprep.subr.bf16.mxu1 %v9780_v63  ;;  %v4501_v63 = vld [vmem:[#allocation10 + $0x590] sm:$0xff]  ;;  %v6765_v2 = vrot.slane %v12608_v62, %v12331_v15  ;;  %v6769_v5 = vrot.slane %v12608_v62, %v12340_v18 }
 0x85c   :  { %v9891_v9 = vcombine.low %v4501_v63, %v4505_v0 }
 0x85e   :  { %6605 = vmatpush1.bf16.msra.mxu1 %v9779_v3  ;;  %v9892_v3 = vcombine.high %v4501_v63, %v4505_v0  ;;  %v9948_v63 = vcombine.high %v4557_v58, %v4561_v59  ;;  %v11320_v0 = vld [vmem:[#allocation13 + $0x2c4] ss:$16 sps:$4 sm:$0xff]  }
 0x85f   :  { %6606 = vmatprep.subr.bf16.mxu1 %v9788_v4 }
 0x862   :  { %6607 = vmatpush1.bf16.msra.mxu1 %v9787_v54  ;;  %v4513_v54 = vld [vmem:[#allocation10 + $0x5f0] sm:$0xff] }
 0x863   :  { %6608 = vmatprep.subr.bf16.mxu1 %v9796_v7  ;;  %v9900_v13 = vcombine.high %v4509_v6, %v4513_v54  ;;  %v9899_v25 = vcombine.low %v4509_v6, %v4513_v54  ;;  %v11323_v6 = vld [vmem:[#allocation13 + $0x2e4] ss:$16 sps:$4 sm:$0xff]  }
 0x864   :  { %v4573_v54 = vld [vmem:[#allocation10 + $0x7d0] sm:$0xff] }
 0x866   :  { %6609 = vmatpush1.bf16.msra.mxu1 %v9795_v10 }
 0x867   :  { %6610 = vmatprep.subr.bf16.mxu1 %v9804_v11 }
 0x86a   :  { %6611 = vmatpush1.bf16.msra.mxu1 %v9803_v16 }
 0x86b   :  { %6612 = vmatprep.subr.bf16.mxu1 %v9812_v17 }
 0x86e   :  { %6613 = vmatpush1.bf16.msra.mxu1 %v9811_v22 }
 0x86f   :  { %6614 = vmatprep.subr.bf16.mxu1 %v9820_v24 }
 0x872   :  { %6615 = vmatpush1.bf16.msra.mxu1 %v9819_v27  ;;  %v9908_v27 = vcombine.high %v4517_v20, %v4521_v21 }
 0x873   :  { %6616 = vmatprep.subr.bf16.mxu1 %v9828_v29  ;;  %v11305_v29 = vld [vmem:[#allocation13 + $0x224] ss:$16 sps:$4 sm:$0xff]  }
 0x876   :  { %6617 = vmatpush1.bf16.msra.mxu1 %v9827_v28  ;;  %v9907_v28 = vcombine.low %v4517_v20, %v4521_v21  ;;  %v11329_v21 = vld [vmem:[#allocation13 + $0x324] ss:$16 sps:$4 sm:$0xff]  }
 0x877   :  { %6618 = vmatprep.subr.bf16.mxu1 %v9836_v32  ;;  %v11303_v32 = vld [vmem:[#allocation13 + $0x220] ss:$16 sps:$4 sm:$0xff]  }
 0x87a   :  { %6619 = vmatpush1.bf16.msra.mxu1 %v9835_v35  ;;  %v4533_v35 = vld [vmem:[#allocation10 + $0x690] sm:$0xff] }
 0x87b   :  { %6631 = vmatprep.subr.bf16.mxu1 %v9844_v36  ;;  %v4537_v36 = vld [vmem:[#allocation10 + $0x6b0] sm:$0xff] }
 0x87d   :  { %6621 = vmatmul.mubr.bf16.vlgmr.msra.gmra.mrb[28].mxu1 %v12547_v53 }
 0x87e   :  { %6632 = vmatpush1.bf16.msra.mxu1 %v9843_v39  ;;  %6663 = vmatprep.mubr.bf16.mxu1 %v12553_v57  ;;  %v9924_v39 = vcombine.high %v4533_v35, %v4537_v36 }
 0x87f   :  { %6633 = vmatprep.subr.bf16.mxu1 %v9852_v40  ;;  %v11311_v40 = vld [vmem:[#allocation13 + $0x264] ss:$16 sps:$4 sm:$0xff]  }
 0x882   :  { %6634 = vmatpush1.bf16.msra.mxu1 %v9851_v43  ;;  %v9923_v43 = vcombine.low %v4533_v35, %v4537_v36  ;;  %v11330_v35 = vld [vmem:[#allocation13 + $0x340] ss:$16 sps:$4 sm:$0xff]   ;;  %v4350_v36 = vld [vmem:[#allocation10 + $0xd8] sm:$0xff] }
 0x883   :  { %6635 = vmatprep.subr.bf16.mxu1 %v9860_v44  ;;  %v11309_v44 = vld [vmem:[#allocation13 + $0x260] ss:$16 sps:$4 sm:$0xff]  }
 0x886   :  { %6636 = vmatpush1.bf16.msra.mxu1 %v9859_v47  ;;  %v4549_v47 = vld [vmem:[#allocation10 + $0x710] sm:$0xff] }
 0x887   :  { %6637 = vmatprep.subr.bf16.mxu1 %v9868_v48  ;;  %v4553_v48 = vld [vmem:[#allocation10 + $0x730] sm:$0xff] }
 0x88a   :  { %6638 = vmatpush1.bf16.msra.mxu1 %v9867_v51  ;;  %v9940_v51 = vcombine.high %v4549_v47, %v4553_v48 }
 0x88b   :  { %6639 = vmatprep.subr.bf16.mxu1 %v9876_v52  ;;  %v11317_v52 = vld [vmem:[#allocation13 + $0x2a4] ss:$16 sps:$4 sm:$0xff]  }
 0x88e   :  { %6640 = vmatpush1.bf16.msra.mxu1 %v9875_v60  ;;  %v9939_v60 = vcombine.low %v4549_v47, %v4553_v48  ;;  %v4366_v47 = vld [vmem:[#allocation10 + $0x158] sm:$0xff] }
 0x88f   :  { %6641 = vmatprep.subr.bf16.mxu1 %v9884_v61  ;;  %v11315_v61 = vld [vmem:[#allocation13 + $0x2a0] ss:$16 sps:$4 sm:$0xff]   ;;  %v4370_v48 = vld [vmem:[#allocation10 + $0x178] sm:$0xff] }
 0x890   :  { %v6493_v4 = vpop.f32.mrb[20].mxu1 }
 0x891   :  { %v6495_v7 = vpop.f32.mrb[21].mxu1  ;;  %v6802_v10 = vadd.f32 %v6765_v2, %v6493_v4  ;;  %v11318_v4 = vld [vmem:[#allocation13 + $0x2c0] ss:$16 sps:$4 sm:$0xff]  }
 0x892   :  { %v6497_v8 = vpop.f32.mrb[22].mxu1  ;;  %6642 = vmatpush1.bf16.msra.mxu1 %v9883_v1  ;;  %v6803_v16 = vadd.f32 %v6769_v5, %v6495_v7  ;;  %v4565_v1 = vld [vmem:[#allocation10 + $0x790] sm:$0xff] }
 0x893   :  { %v6810_v11 = vadd.f32 %v6765_v2, %v6497_v8  ;;  %v6499_v12 = vpop.f32.mrb[23].mxu1  ;;  %6643 = vmatprep.subr.bf16.mxu1 %v9892_v3  ;;  %v4569_v2 = vld [vmem:[#allocation10 + $0x7b0] sm:$0xff]  ;;  %v9947_v3 = vcombine.low %v4557_v58, %v4561_v59  ;;  %v4374_v58 = vld [vmem:[#allocation10 + $0x198] sm:$0xff] }
 0x894   :  { %v6811_v17 = vadd.f32 %v6769_v5, %v6499_v12  ;;  %v9956_v5 = vcombine.high %v4565_v1, %v4569_v2  ;;  %v4577_v7 = vld [vmem:[#allocation10 + $0x7f0] sm:$0xff]  ;;  %v9955_v8 = vcombine.low %v4565_v1, %v4569_v2  ;;  %v4326_v12 = vld [vmem:[#allocation10 + $0x18] sm:$0xff] }
 0x895   :  { %v12614_v22 = vpack.c.bf16 %v6810_v11, %v6802_v10  ;;  %v9964_v10 = vcombine.high %v4573_v54, %v4577_v7  ;;  %v11326_v11 = vld [vmem:[#allocation13 + $0x304] ss:$16 sps:$4 sm:$0xff]   ;;  %v4378_v59 = vld [vmem:[#allocation10 + $0x1b8] sm:$0xff] }
 0x896   :  { %v12616_v24 = vpack.c.bf16 %v6811_v17, %v6803_v16  ;;  %6644 = vmatpush1.bf16.msra.mxu1 %v9891_v9  ;;  %v11321_v9 = vld [vmem:[#allocation13 + $0x2e0] ss:$16 sps:$4 sm:$0xff]   ;;  %v9963_v16 = vcombine.low %v4573_v54, %v4577_v7  ;;  %v4382_v1 = vld [vmem:[#allocation10 + $0x1d8] sm:$0xff] }
 0x897   :  { %6645 = vmatprep.subr.bf16.mxu1 %v9900_v13  ;;  %v4330_v13 = vld [vmem:[#allocation10 + $0x38] sm:$0xff]  ;;  %v11324_v17 = vld [vmem:[#allocation13 + $0x300] ss:$16 sps:$4 sm:$0xff]  }
 0x898   :  { %8416 = vmatprep.mubr.bf16.mxu0 %v12616_v24  ;;  %v9718_v20 = vcombine.high %v4326_v12, %v4330_v13  ;;  %v4386_v2 = vld [vmem:[#allocation10 + $0x1f8] sm:$0xff] }
 0x899   :  { %8417 = vmatmul.mubr.bf16.vlgmr.msra.gmra.mrb[12].mxu0 %v12614_v22  ;;  %v4390_v54 = vld [vmem:[#allocation10 + $0x218] sm:$0xff] }
 0x89a   :  { %6646 = vmatpush1.bf16.msra.mxu1 %v9899_v25  ;;  %8428 = vmatpush1.bf16.msra.mxu0 %v11300_v26  ;;  %v4334_v25 = vld [vmem:[#allocation10 + $0x58] sm:$0xff] }
 0x89b   :  { %6647 = vmatprep.subr.bf16.mxu1 %v9908_v27  ;;  %8429 = vmatprep.subr.bf16.mxu0 %v11305_v29  ;;  %v4338_v26 = vld [vmem:[#allocation10 + $0x78] sm:$0xff]  ;;  %v9717_v27 = vcombine.low %v4326_v12, %v4330_v13 }
 0x89c   :  { %v9726_v29 = vcombine.high %v4334_v25, %v4338_v26  ;;  %v4394_v7 = vld [vmem:[#allocation10 + $0x238] sm:$0xff] }
 0x89d   :  { %v4402_v12 = vld [vmem:[#allocation10 + $0x278] sm:$0xff]  ;;  %v9781_v13 = vcombine.low %v4390_v54, %v4394_v7 }
 0x89e   :  { %6648 = vmatpush1.bf16.msra.mxu1 %v9907_v28  ;;  %8430 = vmatpush1.bf16.msra.mxu0 %v11303_v32  ;;  %v4346_v28 = vld [vmem:[#allocation10 + $0xb8] sm:$0xff]  ;;  %v11332_v32 = vld [vmem:[#allocation13 + $0x344] ss:$16 sps:$4 sm:$0xff]  }
 0x89f   :  { %6649 = vmatprep.subr.bf16.mxu1 %v9916_v33  ;;  %8431 = vmatprep.subr.bf16.mxu0 %v11308_v34  ;;  %v9725_v33 = vcombine.low %v4334_v25, %v4338_v26  ;;  %v9734_v34 = vcombine.high %v4342_v31, %v4346_v28  ;;  %v4414_v26 = vld [vmem:[#allocation10 + $0x2d8] sm:$0xff] }
 0x8a2   :  { %6650 = vmatpush1.bf16.msra.mxu1 %v9915_v37  ;;  %8432 = vmatpush1.bf16.msra.mxu0 %v11306_v38  ;;  %v4354_v37 = vld [vmem:[#allocation10 + $0xf8] sm:$0xff]  ;;  %v11335_v38 = vld [vmem:[#allocation13 + $0x364] ss:$16 sps:$4 sm:$0xff]  }
 0x8a3   :  { %6651 = vmatprep.subr.bf16.mxu1 %v9924_v39  ;;  %8433 = vmatprep.subr.bf16.mxu0 %v11311_v40  ;;  %v9733_v39 = vcombine.low %v4342_v31, %v4346_v28  ;;  %v9742_v40 = vcombine.high %v4350_v36, %v4354_v37  ;;  %v4422_v31 = vld [vmem:[#allocation10 + $0x318] sm:$0xff] }
 0x8a4   :  { %v4426_v28 = vld [vmem:[#allocation10 + $0x338] sm:$0xff] }
 0x8a6   :  { %6652 = vmatpush1.bf16.msra.mxu1 %v9923_v43  ;;  %8434 = vmatpush1.bf16.msra.mxu0 %v11309_v44  ;;  %v4362_v43 = vld [vmem:[#allocation10 + $0x138] sm:$0xff]  ;;  %v11338_v44 = vld [vmem:[#allocation13 + $0x384] ss:$16 sps:$4 sm:$0xff]  }
 0x8a7   :  { %6653 = vmatprep.subr.bf16.mxu1 %v9932_v45  ;;  %8435 = vmatprep.subr.bf16.mxu0 %v11314_v46  ;;  %v9750_v45 = vcombine.high %v4358_v42, %v4362_v43  ;;  %v11336_v46 = vld [vmem:[#allocation13 + $0x380] ss:$16 sps:$4 sm:$0xff]  }
 0x8aa   :  { %6654 = vmatpush1.bf16.msra.mxu1 %v9931_v49  ;;  %8436 = vmatpush1.bf16.msra.mxu0 %v11312_v50  ;;  %v11341_v49 = vld [vmem:[#allocation13 + $0x3a4] ss:$16 sps:$4 sm:$0xff]   ;;  %v9749_v50 = vcombine.low %v4358_v42, %v4362_v43  ;;  %v4446_v42 = vld [vmem:[#allocation10 + $0x3d8] sm:$0xff] }
 0x8ab   :  { %6655 = vmatprep.subr.bf16.mxu1 %v9940_v51  ;;  %8437 = vmatprep.subr.bf16.mxu0 %v11317_v52  ;;  %v9758_v51 = vcombine.high %v4366_v47, %v4370_v48  ;;  %v11339_v52 = vld [vmem:[#allocation13 + $0x3a0] ss:$16 sps:$4 sm:$0xff]   ;;  %v4450_v43 = vld [vmem:[#allocation10 + $0x3f8] sm:$0xff] }
 0x8ae   :  { %6656 = vmatpush1.bf16.msra.mxu1 %v9939_v60  ;;  %8438 = vmatpush1.bf16.msra.mxu0 %v11315_v61  ;;  %v11344_v60 = vld [vmem:[#allocation13 + $0x3c4] ss:$16 sps:$4 sm:$0xff]   ;;  %v9757_v61 = vcombine.low %v4366_v47, %v4370_v48  ;;  %v9837_v47 = vcombine.low %v4446_v42, %v4450_v43 }
 0x8af   :  { %6657 = vmatprep.subr.bf16.mxu1 %v9948_v63  ;;  %8439 = vmatprep.subr.bf16.mxu0 %v11320_v0  ;;  %v9766_v63 = vcombine.high %v4374_v58, %v4378_v59  ;;  %v11342_v0 = vld [vmem:[#allocation13 + $0x3c0] ss:$16 sps:$4 sm:$0xff]  }
 0x8b2   :  { %6658 = vmatpush1.bf16.msra.mxu1 %v9947_v3  ;;  %8440 = vmatpush1.bf16.msra.mxu0 %v11318_v4  ;;  %v11347_v3 = vld [vmem:[#allocation13 + $0x3e4] ss:$16 sps:$4 sm:$0xff]   ;;  %v9765_v4 = vcombine.low %v4374_v58, %v4378_v59  ;;  %v4470_v58 = vld [vmem:[#allocation10 + $0x498] sm:$0xff] }
 0x8b3   :  { %6659 = vmatprep.subr.bf16.mxu1 %v9956_v5  ;;  %8441 = vmatprep.subr.bf16.mxu0 %v11323_v6  ;;  %v9774_v5 = vcombine.high %v4382_v1, %v4386_v2  ;;  %v11345_v6 = vld [vmem:[#allocation13 + $0x3e0] ss:$16 sps:$4 sm:$0xff]   ;;  %v4474_v59 = vld [vmem:[#allocation10 + $0x4b8] sm:$0xff] }
 0x8b6   :  { %6660 = vmatpush1.bf16.msra.mxu1 %v9955_v8  ;;  %8442 = vmatpush1.bf16.msra.mxu0 %v11321_v9  ;;  %v11350_v8 = vld [vmem:[#allocation13 + $0x404] ss:$16 sps:$4 sm:$0xff]   ;;  %v9773_v9 = vcombine.low %v4382_v1, %v4386_v2  ;;  %v9861_v1 = vcombine.low %v4470_v58, %v4474_v59 }
 0x8b7   :  { %6661 = vmatprep.subr.bf16.mxu1 %v9964_v10  ;;  %8443 = vmatprep.subr.bf16.mxu0 %v11326_v11  ;;  %v9782_v10 = vcombine.high %v4390_v54, %v4394_v7  ;;  %v4398_v11 = vld [vmem:[#allocation10 + $0x258] sm:$0xff] }
 0x8b8   :  { %v4494_v54 = vld [vmem:[#allocation10 + $0x558] sm:$0xff] }
 0x8ba   :  { %6662 = vmatpush1.bf16.msra.mxu1 %v9963_v16  ;;  %8444 = vmatpush1.bf16.msra.mxu0 %v11324_v17  ;;  %v9790_v16 = vcombine.high %v4398_v11, %v4402_v12  ;;  %v4406_v17 = vld [vmem:[#allocation10 + $0x298] sm:$0xff] }
 0x8bb   :  { %6674 = vmatprep.subr.bf16.mxu1 %v9718_v20  ;;  %8445 = vmatprep.subr.bf16.mxu0 %v11329_v21  ;;  %v4410_v20 = vld [vmem:[#allocation10 + $0x2b8] sm:$0xff]  ;;  %v9789_v21 = vcombine.low %v4398_v11, %v4402_v12  ;;  %v6773_v11 = vrot.slane %v12608_v62, %v12334_v23 }
 0x8bc   :  { %v9798_v25 = vcombine.high %v4406_v17, %v4410_v20 }
 0x8bd   :  { %6664 = vmatmul.mubr.bf16.vlgmr.msra.gmra.mrb[28].mxu1 %v12549_v55 }
 0x8be   :  { %6675 = vmatpush1.bf16.msra.mxu1 %v9717_v27  ;;  %6706 = vmatprep.mubr.bf16.mxu1 %v12551_v56  ;;  %v9741_v56 = vcombine.low %v4350_v36, %v4354_v37  ;;  %v4418_v27 = vld [vmem:[#allocation10 + $0x2f8] sm:$0xff]  ;;  %v9813_v36 = vcombine.low %v4422_v31, %v4426_v28 }
 0x8bf   :  { %6676 = vmatprep.subr.bf16.mxu1 %v9726_v29  ;;  %8446 = vmatpush1.bf16.msra.mxu0 %v11327_v30  ;;  %v9797_v29 = vcombine.low %v4406_v17, %v4410_v20  ;;  %v9806_v30 = vcombine.high %v4414_v26, %v4418_v27  ;;  %v4510_v17 = vld [vmem:[#allocation10 + $0x5d8] sm:$0xff] }
 0x8c0   :  { %8447 = vmatprep.subr.bf16.mxu0 %v11332_v32  ;;  %v9805_v32 = vcombine.low %v4414_v26, %v4418_v27  ;;  %v4514_v20 = vld [vmem:[#allocation10 + $0x5f8] sm:$0xff] }
 0x8c2   :  { %6677 = vmatpush1.bf16.msra.mxu1 %v9725_v33  ;;  %v9814_v33 = vcombine.high %v4422_v31, %v4426_v28  ;;  %v9902_v31 = vcombine.high %v4510_v17, %v4514_v20 }
 0x8c3   :  { %6678 = vmatprep.subr.bf16.mxu1 %v9734_v34  ;;  %8448 = vmatpush1.bf16.msra.mxu0 %v11330_v35  ;;  %v4430_v34 = vld [vmem:[#allocation10 + $0x358] sm:$0xff] }
 0x8c4   :  { %8449 = vmatprep.subr.bf16.mxu0 %v11335_v38  ;;  %v4434_v35 = vld [vmem:[#allocation10 + $0x378] sm:$0xff] }
 0x8c5   :  { %v9822_v37 = vcombine.high %v4430_v34, %v4434_v35  ;;  %v4438_v38 = vld [vmem:[#allocation10 + $0x398] sm:$0xff] }
 0x8c6   :  { %6679 = vmatpush1.bf16.msra.mxu1 %v9733_v39  ;;  %v4442_v39 = vld [vmem:[#allocation10 + $0x3b8] sm:$0xff] }
 0x8c7   :  { %6680 = vmatprep.subr.bf16.mxu1 %v9742_v40  ;;  %8450 = vmatpush1.bf16.msra.mxu0 %v11333_v41  ;;  %v9821_v40 = vcombine.low %v4430_v34, %v4434_v35  ;;  %v9830_v41 = vcombine.high %v4438_v38, %v4442_v39  ;;  %v4522_v34 = vld [vmem:[#allocation10 + $0x638] sm:$0xff] }
 0x8c8   :  { %8451 = vmatprep.subr.bf16.mxu0 %v11338_v44  ;;  %v9829_v44 = vcombine.low %v4438_v38, %v4442_v39  ;;  %v11348_v38 = vld [vmem:[#allocation13 + $0x400] ss:$16 sps:$4 sm:$0xff]  }
 0x8ca   :  { %6681 = vmatpush1.bf16.msra.mxu1 %v9741_v56  ;;  %v9838_v56 = vcombine.high %v4446_v42, %v4450_v43  ;;  %v4530_v42 = vld [vmem:[#allocation10 + $0x678] sm:$0xff] }
 0x8cb   :  { %6682 = vmatprep.subr.bf16.mxu1 %v9750_v45  ;;  %8452 = vmatpush1.bf16.msra.mxu0 %v11336_v46  ;;  %v4454_v45 = vld [vmem:[#allocation10 + $0x418] sm:$0xff] }
 0x8cc   :  { %8453 = vmatprep.subr.bf16.mxu0 %v11341_v49  ;;  %v4458_v46 = vld [vmem:[#allocation10 + $0x438] sm:$0xff] }
 0x8cd   :  { %v9846_v48 = vcombine.high %v4454_v45, %v4458_v46  ;;  %v4462_v49 = vld [vmem:[#allocation10 + $0x458] sm:$0xff] }
 0x8ce   :  { %6683 = vmatpush1.bf16.msra.mxu1 %v9749_v50  ;;  %v4466_v50 = vld [vmem:[#allocation10 + $0x478] sm:$0xff] }
 0x8cf   :  { %6684 = vmatprep.subr.bf16.mxu1 %v9758_v51  ;;  %8454 = vmatpush1.bf16.msra.mxu0 %v11339_v52  ;;  %v9845_v51 = vcombine.low %v4454_v45, %v4458_v46  ;;  %v9854_v52 = vcombine.high %v4462_v49, %v4466_v50  ;;  %v11356_v45 = vld [vmem:[#allocation13 + $0x444] ss:$16 sps:$4 sm:$0xff]   ;;  %v4534_v46 = vld [vmem:[#allocation10 + $0x698] sm:$0xff] }
 0x8d0   :  { %8455 = vmatprep.subr.bf16.mxu0 %v11344_v60  ;;  %v9853_v60 = vcombine.low %v4462_v49, %v4466_v50  ;;  %v11354_v49 = vld [vmem:[#allocation13 + $0x440] ss:$16 sps:$4 sm:$0xff]  }
 0x8d2   :  { %6685 = vmatpush1.bf16.msra.mxu1 %v9757_v61  ;;  %v9862_v61 = vcombine.high %v4470_v58, %v4474_v59  ;;  %v4546_v58 = vld [vmem:[#allocation10 + $0x6f8] sm:$0xff] }
 0x8d3   :  { %6686 = vmatprep.subr.bf16.mxu1 %v9766_v63  ;;  %8456 = vmatpush1.bf16.msra.mxu0 %v11342_v0  ;;  %v4478_v63 = vld [vmem:[#allocation10 + $0x4d8] sm:$0xff] }
 0x8d4   :  { %8457 = vmatprep.subr.bf16.mxu0 %v11347_v3  ;;  %v4482_v0 = vld [vmem:[#allocation10 + $0x4f8] sm:$0xff] }
 0x8d5   :  { %v9870_v2 = vcombine.high %v4478_v63, %v4482_v0  ;;  %v4486_v3 = vld [vmem:[#allocation10 + $0x518] sm:$0xff] }
 0x8d6   :  { %6687 = vmatpush1.bf16.msra.mxu1 %v9765_v4  ;;  %v4490_v4 = vld [vmem:[#allocation10 + $0x538] sm:$0xff] }
 0x8d7   :  { %6688 = vmatprep.subr.bf16.mxu1 %v9774_v5  ;;  %8458 = vmatpush1.bf16.msra.mxu0 %v11345_v6  ;;  %v9869_v5 = vcombine.low %v4478_v63, %v4482_v0  ;;  %v9878_v6 = vcombine.high %v4486_v3, %v4490_v4  ;;  %v9877_v7 = vcombine.low %v4486_v3, %v4490_v4  ;;  %v11362_v63 = vld [vmem:[#allocation13 + $0x484] ss:$16 sps:$4 sm:$0xff]   ;;  %v4550_v0 = vld [vmem:[#allocation10 + $0x718] sm:$0xff]  ;;  %v11360_v3 = vld [vmem:[#allocation13 + $0x480] ss:$16 sps:$4 sm:$0xff]  }
 0x8d8   :  { %8470 = vmatprep.subr.bf16.mxu0 %v11350_v8  ;;  %v4502_v8 = vld [vmem:[#allocation10 + $0x598] sm:$0xff] }
 0x8da   :  { %6689 = vmatpush1.bf16.msra.mxu1 %v9773_v9  ;;  %v4506_v9 = vld [vmem:[#allocation10 + $0x5b8] sm:$0xff] }
 0x8db   :  { %6690 = vmatprep.subr.bf16.mxu1 %v9782_v10  ;;  %v9894_v12 = vcombine.high %v4502_v8, %v4506_v9  ;;  %v9893_v26 = vcombine.low %v4502_v8, %v4506_v9  ;;  %v11368_v8 = vld [vmem:[#allocation13 + $0x4c4] ss:$16 sps:$4 sm:$0xff]   ;;  %v4566_v9 = vld [vmem:[#allocation10 + $0x798] sm:$0xff] }
 0x8de   :  { %6691 = vmatpush1.bf16.msra.mxu1 %v9781_v13 }
 0x8df   :  { %6692 = vmatprep.subr.bf16.mxu1 %v9790_v16  ;;  %v6777_v16 = vrot.slane %v12608_v62, %v12343_v19 }
 0x8e2   :  { %6693 = vmatpush1.bf16.msra.mxu1 %v9789_v21 }
 0x8e3   :  { %6694 = vmatprep.subr.bf16.mxu1 %v9798_v25 }
 0x8e6   :  { %6695 = vmatpush1.bf16.msra.mxu1 %v9797_v29 }
 0x8e7   :  { %6696 = vmatprep.subr.bf16.mxu1 %v9806_v30 }
 0x8ea   :  { %6697 = vmatpush1.bf16.msra.mxu1 %v9805_v32 }
 0x8eb   :  { %6698 = vmatprep.subr.bf16.mxu1 %v9814_v33  ;;  %v4518_v33 = vld [vmem:[#allocation10 + $0x618] sm:$0xff] }
 0x8ec   :  { %v9910_v39 = vcombine.high %v4518_v33, %v4522_v34  ;;  %v9909_v43 = vcombine.low %v4518_v33, %v4522_v34  ;;  %v11378_v33 = vld [vmem:[#allocation13 + $0x540] ss:$16 sps:$4 sm:$0xff]   ;;  %v11383_v34 = vld [vmem:[#allocation13 + $0x564] ss:$16 sps:$4 sm:$0xff]  }
 0x8ee   :  { %6699 = vmatpush1.bf16.msra.mxu1 %v9813_v36 }
 0x8ef   :  { %6700 = vmatprep.subr.bf16.mxu1 %v9822_v37  ;;  %v9901_v37 = vcombine.low %v4510_v17, %v4514_v20  ;;  %v4574_v17 = vld [vmem:[#allocation10 + $0x7d8] sm:$0xff] }
 0x8f0   :  { %v4578_v20 = vld [vmem:[#allocation10 + $0x7f8] sm:$0xff] }
 0x8f2   :  { %6701 = vmatpush1.bf16.msra.mxu1 %v9821_v40  ;;  %v11353_v40 = vld [vmem:[#allocation13 + $0x424] ss:$16 sps:$4 sm:$0xff]  }
 0x8f3   :  { %6702 = vmatprep.subr.bf16.mxu1 %v9830_v41  ;;  %v4526_v41 = vld [vmem:[#allocation10 + $0x658] sm:$0xff] }
 0x8f6   :  { %6703 = vmatpush1.bf16.msra.mxu1 %v9829_v44  ;;  %v11351_v44 = vld [vmem:[#allocation13 + $0x420] ss:$16 sps:$4 sm:$0xff]  }
 0x8f7   :  { %6704 = vmatprep.subr.bf16.mxu1 %v9838_v56  ;;  %v9918_v56 = vcombine.high %v4526_v41, %v4530_v42 }
 0x8fa   :  { %6705 = vmatpush1.bf16.msra.mxu1 %v9837_v47  ;;  %v4538_v47 = vld [vmem:[#allocation10 + $0x6b8] sm:$0xff] }
 0x8fb   :  { %6717 = vmatprep.subr.bf16.mxu1 %v9846_v48  ;;  %v9917_v48 = vcombine.low %v4526_v41, %v4530_v42  ;;  %v9926_v50 = vcombine.high %v4534_v46, %v4538_v47  ;;  %v9925_v59 = vcombine.low %v4534_v46, %v4538_v47  ;;  %v11387_v41 = vld [vmem:[#allocation13 + $0x5a0] ss:$16 sps:$4 sm:$0xff]   ;;  %v11392_v42 = vld [vmem:[#allocation13 + $0x5c4] ss:$16 sps:$4 sm:$0xff]   ;;  %v6784_v46 = vsub.s32 5, %v12328_v14 }
 0x8fd   :  { %6707 = vmatmul.mubr.bf16.vlgmr.msra.gmra.mrb[32].mxu1 %v12547_v53  ;;  %v4498_v53 = vld [vmem:[#allocation10 + $0x578] sm:$0xff] }
 0x8fe   :  { %6718 = vmatpush1.bf16.msra.mxu1 %v9845_v51  ;;  %6749 = vmatprep.mubr.bf16.mxu1 %v12553_v57  ;;  %v9886_v57 = vcombine.high %v4494_v54, %v4498_v53  ;;  %v9885_v10 = vcombine.low %v4494_v54, %v4498_v53  ;;  %v11359_v51 = vld [vmem:[#allocation13 + $0x464] ss:$16 sps:$4 sm:$0xff]   ;;  %v4562_v54 = vld [vmem:[#allocation10 + $0x778] sm:$0xff] }
 0x8ff   :  { %6719 = vmatprep.subr.bf16.mxu1 %v9854_v52  ;;  %v4542_v52 = vld [vmem:[#allocation10 + $0x6d8] sm:$0xff] }
 0x902   :  { %6720 = vmatpush1.bf16.msra.mxu1 %v9853_v60  ;;  %v11357_v60 = vld [vmem:[#allocation13 + $0x460] ss:$16 sps:$4 sm:$0xff]  }
 0x903   :  { %6721 = vmatprep.subr.bf16.mxu1 %v9862_v61  ;;  %v9934_v61 = vcombine.high %v4542_v52, %v4546_v58 }
 0x906   :  { %6722 = vmatpush1.bf16.msra.mxu1 %v9861_v1  ;;  %v4554_v1 = vld [vmem:[#allocation10 + $0x738] sm:$0xff] }
 0x907   :  { %6723 = vmatprep.subr.bf16.mxu1 %v9870_v2  ;;  %v9933_v2 = vcombine.low %v4542_v52, %v4546_v58  ;;  %v9942_v4 = vcombine.high %v4550_v0, %v4554_v1  ;;  %v9941_v53 = vcombine.low %v4550_v0, %v4554_v1  ;;  %v11396_v1 = vld [vmem:[#allocation13 + $0x600] ss:$16 sps:$4 sm:$0xff]  }
 0x90a   :  { %6724 = vmatpush1.bf16.msra.mxu1 %v9869_v5  ;;  %v11365_v5 = vld [vmem:[#allocation13 + $0x4a4] ss:$16 sps:$4 sm:$0xff]  }
 0x90b   :  { %6725 = vmatprep.subr.bf16.mxu1 %v9878_v6  ;;  %v4558_v6 = vld [vmem:[#allocation10 + $0x758] sm:$0xff] }
 0x90e   :  { %6726 = vmatpush1.bf16.msra.mxu1 %v9877_v7  ;;  %v11363_v7 = vld [vmem:[#allocation13 + $0x4a0] ss:$16 sps:$4 sm:$0xff]  }
 0x90f   :  { %6727 = vmatprep.subr.bf16.mxu1 %v9886_v57  ;;  %v9950_v57 = vcombine.high %v4558_v6, %v4562_v54 }
 0x910   :  { %v6579_v13 = vpop.f32.mrb[24].mxu1 }
 0x911   :  { %v6581_v21 = vpop.f32.mrb[25].mxu1  ;;  %v6804_v27 = vadd.f32 %v6773_v11, %v6579_v13 }
 0x912   :  { %v6583_v25 = vpop.f32.mrb[26].mxu1  ;;  %6728 = vmatpush1.bf16.msra.mxu1 %v9885_v10  ;;  %v6805_v28 = vadd.f32 %v6777_v16, %v6581_v21  ;;  %v4570_v10 = vld [vmem:[#allocation10 + $0x7b8] sm:$0xff] }
 0x913   :  { %v6812_v29 = vadd.f32 %v6773_v11, %v6583_v25  ;;  %v6585_v30 = vpop.f32.mrb[27].mxu1  ;;  %6729 = vmatprep.subr.bf16.mxu1 %v9894_v12  ;;  %v9949_v11 = vcombine.low %v4558_v6, %v4562_v54  ;;  %v11366_v12 = vld [vmem:[#allocation13 + $0x4c0] ss:$16 sps:$4 sm:$0xff]   ;;  %v9958_v13 = vcombine.high %v4566_v9, %v4570_v10  ;;  %v9957_v21 = vcombine.low %v4566_v9, %v4570_v10  ;;  %v11407_v6 = vld [vmem:[#allocation13 + $0x664] ss:$16 sps:$4 sm:$0xff]  }
 0x914   :  { %v6813_v32 = vadd.f32 %v6777_v16, %v6585_v30  ;;  %v11371_v16 = vld [vmem:[#allocation13 + $0x4e4] ss:$16 sps:$4 sm:$0xff]   ;;  %v11369_v25 = vld [vmem:[#allocation13 + $0x4e0] ss:$16 sps:$4 sm:$0xff]  }
 0x915   :  { %v12628_v35 = vpack.c.bf16 %v6812_v29, %v6804_v27  ;;  %v11374_v27 = vld [vmem:[#allocation13 + $0x504] ss:$16 sps:$4 sm:$0xff]   ;;  %v9965_v29 = vcombine.low %v4574_v17, %v4578_v20  ;;  %v11372_v30 = vld [vmem:[#allocation13 + $0x500] ss:$16 sps:$4 sm:$0xff]  }
 0x916   :  { %v12630_v36 = vpack.c.bf16 %v6813_v32, %v6805_v28  ;;  %6730 = vmatpush1.bf16.msra.mxu1 %v9893_v26  ;;  %v9966_v26 = vcombine.high %v4574_v17, %v4578_v20  ;;  %v11375_v28 = vld [vmem:[#allocation13 + $0x520] ss:$16 sps:$4 sm:$0xff]   ;;  %v11380_v32 = vld [vmem:[#allocation13 + $0x544] ss:$16 sps:$4 sm:$0xff]  }
 0x917   :  { %6731 = vmatprep.subr.bf16.mxu1 %v9902_v31  ;;  %v11377_v31 = vld [vmem:[#allocation13 + $0x524] ss:$16 sps:$4 sm:$0xff]   ;;  %v11405_v54 = vld [vmem:[#allocation13 + $0x660] ss:$16 sps:$4 sm:$0xff]  }
 0x918   :  { %8459 = vmatprep.mubr.bf16.mxu0 %v12630_v36  ;;  %v11416_v9 = vld [vmem:[#allocation13 + $0x6c4] ss:$16 sps:$4 sm:$0xff]   ;;  %v11414_v10 = vld [vmem:[#allocation13 + $0x6c0] ss:$16 sps:$4 sm:$0xff]  }
 0x919   :  { %8460 = vmatmul.mubr.bf16.vlgmr.msra.gmra.mrb[12].mxu0 %v12628_v35  ;;  %v11425_v17 = vld [vmem:[#allocation13 + $0x724] ss:$16 sps:$4 sm:$0xff]   ;;  %v11423_v20 = vld [vmem:[#allocation13 + $0x720] ss:$16 sps:$4 sm:$0xff]  }
 0x91a   :  { %6732 = vmatpush1.bf16.msra.mxu1 %v9901_v37  ;;  %8471 = vmatpush1.bf16.msra.mxu0 %v11348_v38  ;;  %v11381_v37 = vld [vmem:[#allocation13 + $0x560] ss:$16 sps:$4 sm:$0xff]   ;;  %v11386_v38 = vld [vmem:[#allocation13 + $0x584] ss:$16 sps:$4 sm:$0xff]  }
 0x91b   :  { %6733 = vmatprep.subr.bf16.mxu1 %v9910_v39  ;;  %8472 = vmatprep.subr.bf16.mxu0 %v11353_v40  ;;  %v11384_v39 = vld [vmem:[#allocation13 + $0x580] ss:$16 sps:$4 sm:$0xff]   ;;  %v11389_v40 = vld [vmem:[#allocation13 + $0x5a4] ss:$16 sps:$4 sm:$0xff]  }
 0x91e   :  { %6734 = vmatpush1.bf16.msra.mxu1 %v9909_v43  ;;  %8473 = vmatpush1.bf16.msra.mxu0 %v11351_v44  ;;  %v11390_v43 = vld [vmem:[#allocation13 + $0x5c0] ss:$16 sps:$4 sm:$0xff]  }
 0x91f   :  { %6735 = vmatprep.subr.bf16.mxu1 %v9918_v56  ;;  %8474 = vmatprep.subr.bf16.mxu0 %v11356_v45  ;;  %v11393_v44 = vld [vmem:[#allocation13 + $0x5e0] ss:$16 sps:$4 sm:$0xff]   ;;  %v11398_v56 = vld [vmem:[#allocation13 + $0x604] ss:$16 sps:$4 sm:$0xff]   ;;  %v6780_v45 = vsub.s32 4, %v12328_v14 }
 0x921   :  { %v6781_v47 = vrot.slane %v12608_v62, %v6780_v45 }
 0x922   :  { %6736 = vmatpush1.bf16.msra.mxu1 %v9917_v48  ;;  %8475 = vmatpush1.bf16.msra.mxu0 %v11354_v49  ;;  %v6785_v49 = vrot.slane %v12608_v62, %v6784_v46 }
 0x923   :  { %6737 = vmatprep.subr.bf16.mxu1 %v9926_v50  ;;  %8476 = vmatprep.subr.bf16.mxu0 %v11359_v51 }
 0x926   :  { %6738 = vmatpush1.bf16.msra.mxu1 %v9925_v59  ;;  %8477 = vmatpush1.bf16.msra.mxu0 %v11357_v60 }
 0x927   :  { %6739 = vmatprep.subr.bf16.mxu1 %v9934_v61  ;;  %8478 = vmatprep.subr.bf16.mxu0 %v11362_v63 }
 0x92a   :  { %6740 = vmatpush1.bf16.msra.mxu1 %v9933_v2  ;;  %8479 = vmatpush1.bf16.msra.mxu0 %v11360_v3  ;;  %v11401_v2 = vld [vmem:[#allocation13 + $0x624] ss:$16 sps:$4 sm:$0xff]   ;;  %v11399_v3 = vld [vmem:[#allocation13 + $0x620] ss:$16 sps:$4 sm:$0xff]  }
 0x92b   :  { %6741 = vmatprep.subr.bf16.mxu1 %v9942_v4  ;;  %8480 = vmatprep.subr.bf16.mxu0 %v11365_v5  ;;  %v11404_v4 = vld [vmem:[#allocation13 + $0x644] ss:$16 sps:$4 sm:$0xff]   ;;  %v11402_v5 = vld [vmem:[#allocation13 + $0x640] ss:$16 sps:$4 sm:$0xff]  }
 0x92e   :  { %6742 = vmatpush1.bf16.msra.mxu1 %v9941_v53  ;;  %8481 = vmatpush1.bf16.msra.mxu0 %v11363_v7  ;;  %v11410_v53 = vld [vmem:[#allocation13 + $0x684] ss:$16 sps:$4 sm:$0xff]   ;;  %v11408_v7 = vld [vmem:[#allocation13 + $0x680] ss:$16 sps:$4 sm:$0xff]  }
 0x92f   :  { %6743 = vmatprep.subr.bf16.mxu1 %v9950_v57  ;;  %8482 = vmatprep.subr.bf16.mxu0 %v11368_v8  ;;  %v11413_v57 = vld [vmem:[#allocation13 + $0x6a4] ss:$16 sps:$4 sm:$0xff]   ;;  %v11411_v8 = vld [vmem:[#allocation13 + $0x6a0] ss:$16 sps:$4 sm:$0xff]  }
 0x932   :  { %6744 = vmatpush1.bf16.msra.mxu1 %v9949_v11  ;;  %8483 = vmatpush1.bf16.msra.mxu0 %v11366_v12  ;;  %v11419_v11 = vld [vmem:[#allocation13 + $0x6e4] ss:$16 sps:$4 sm:$0xff]   ;;  %v11417_v12 = vld [vmem:[#allocation13 + $0x6e0] ss:$16 sps:$4 sm:$0xff]  }
 0x933   :  { %6745 = vmatprep.subr.bf16.mxu1 %v9958_v13  ;;  %8484 = vmatprep.subr.bf16.mxu0 %v11371_v16  ;;  %v11422_v13 = vld [vmem:[#allocation13 + $0x704] ss:$16 sps:$4 sm:$0xff]   ;;  %v11420_v16 = vld [vmem:[#allocation13 + $0x700] ss:$16 sps:$4 sm:$0xff]  }
 0x936   :  { %6746 = vmatpush1.bf16.msra.mxu1 %v9957_v21  ;;  %8485 = vmatpush1.bf16.msra.mxu0 %v11369_v25  ;;  %v11428_v21 = vld [vmem:[#allocation13 + $0x744] ss:$16 sps:$4 sm:$0xff]   ;;  %v11426_v25 = vld [vmem:[#allocation13 + $0x740] ss:$16 sps:$4 sm:$0xff]  }
 0x937   :  { %6747 = vmatprep.subr.bf16.mxu1 %v9966_v26  ;;  %8486 = vmatprep.subr.bf16.mxu0 %v11374_v27  ;;  %v11431_v26 = vld [vmem:[#allocation13 + $0x764] ss:$16 sps:$4 sm:$0xff]   ;;  %v11429_v27 = vld [vmem:[#allocation13 + $0x760] ss:$16 sps:$4 sm:$0xff]  }
 0x93a   :  { %6748 = vmatpush1.bf16.msra.mxu1 %v9965_v29  ;;  %8487 = vmatpush1.bf16.msra.mxu0 %v11372_v30  ;;  %v11434_v29 = vld [vmem:[#allocation13 + $0x784] ss:$16 sps:$4 sm:$0xff]   ;;  %v11432_v30 = vld [vmem:[#allocation13 + $0x780] ss:$16 sps:$4 sm:$0xff]  }
 0x93b   :  { %8488 = vmatprep.subr.bf16.mxu0 %v11377_v31  ;;  %v11437_v31 = vld [vmem:[#allocation13 + $0x7a4] ss:$16 sps:$4 sm:$0xff]  }
 0x93d   :  { %6750 = vmatmul.mubr.bf16.vlgmr.msra.gmra.mrb[32].mxu1 %v12549_v55  ;;  %v11395_v55 = vld [vmem:[#allocation13 + $0x5e4] ss:$16 sps:$4 sm:$0xff]  }
 0x93e   :  { %8489 = vmatpush1.bf16.msra.mxu0 %v11375_v28  ;;  %v11435_v28 = vld [vmem:[#allocation13 + $0x7a0] ss:$16 sps:$4 sm:$0xff]  }
 0x93f   :  { %8490 = vmatprep.subr.bf16.mxu0 %v11380_v32  ;;  %v11440_v32 = vld [vmem:[#allocation13 + $0x7c4] ss:$16 sps:$4 sm:$0xff]  }
 0x942   :  { %8491 = vmatpush1.bf16.msra.mxu0 %v11378_v33  ;;  %v11438_v33 = vld [vmem:[#allocation13 + $0x7c0] ss:$16 sps:$4 sm:$0xff]  }
 0x943   :  { %8492 = vmatprep.subr.bf16.mxu0 %v11383_v34  ;;  %v11443_v34 = vld [vmem:[#allocation13 + $0x7e4] ss:$16 sps:$4 sm:$0xff]  }
 0x946   :  { %8493 = vmatpush1.bf16.msra.mxu0 %v11381_v37  ;;  %v11441_v37 = vld [vmem:[#allocation13 + $0x7e0] ss:$16 sps:$4 sm:$0xff]  }
 0x947   :  { %8494 = vmatprep.subr.bf16.mxu0 %v11386_v38  ;;  %v11446_v38 = vld [vmem:[#allocation13 + $0xc] ss:$16 sps:$4 sm:$0xff]  }
 0x94a   :  { %8495 = vmatpush1.bf16.msra.mxu0 %v11384_v39  ;;  %v6788_v39 = vsub.s32 6, %v12328_v14 }
 0x94b   :  { %8496 = vmatprep.subr.bf16.mxu0 %v11389_v40  ;;  %v6792_v40 = vsub.s32 7, %v12328_v14  ;;  %v11447_v14 = vld [vmem:[#allocation13 + $0x28] ss:$16 sps:$4 sm:$0xff]  }
 0x94e   :  { %8497 = vmatpush1.bf16.msra.mxu0 %v11387_v41  ;;  %v6789_v41 = vrot.slane %v12608_v62, %v6788_v39  ;;  %v11602_v39 = vld [vmem:[%s12806_s16 + $0x10] sm:$0xff]  }
 0x94f   :  { %8498 = vmatprep.subr.bf16.mxu0 %v11392_v42 }
 0x952   :  { %8499 = vmatpush1.bf16.msra.mxu0 %v11390_v43  ;;  %v6793_v43 = vrot.slane %v12608_v62, %v6792_v40  ;;  %v11452_v62 = vld [vmem:[#allocation13 + $0x4c] ss:$16 sps:$4 sm:$0xff]   ;;  %v11501_v40 = vld [vmem:[#allocation13 + $0x268] ss:$16 sps:$4 sm:$0xff]  }
 0x953   :  { %8500 = vmatprep.subr.bf16.mxu0 %v11395_v55 }
 0x956   :  { %8501 = vmatpush1.bf16.msra.mxu0 %v11393_v44 }
 0x957   :  { %8513 = vmatprep.subr.bf16.mxu0 %v11398_v56 }
 0x990   :  { %v6665_v48 = vpop.f32.mrb[28].mxu1 }
 0x991   :  { %v6667_v50 = vpop.f32.mrb[29].mxu1  ;;  %v6806_v52 = vadd.f32 %v6781_v47, %v6665_v48 }
 0x992   :  { %v6669_v51 = vpop.f32.mrb[30].mxu1  ;;  %v6807_v60 = vadd.f32 %v6785_v49, %v6667_v50 }
 0x993   :  { %v6814_v58 = vadd.f32 %v6781_v47, %v6669_v51  ;;  %v6671_v59 = vpop.f32.mrb[31].mxu1  ;;  %v11444_v51 = vld [vmem:[#allocation13 + $0x8] ss:$16 sps:$4 sm:$0xff]  }
 0x994   :  { %v6815_v61 = vadd.f32 %v6785_v49, %v6671_v59  ;;  %v11455_v59 = vld [vmem:[#allocation13 + $0x6c] ss:$16 sps:$4 sm:$0xff]  }
 0x995   :  { %v12639_v63 = vpack.c.bf16 %v6814_v58, %v6806_v52  ;;  %v11449_v52 = vld [vmem:[#allocation13 + $0x2c] ss:$16 sps:$4 sm:$0xff]   ;;  %v11450_v58 = vld [vmem:[#allocation13 + $0x48] ss:$16 sps:$4 sm:$0xff]  }
 0x996   :  { %v12641_v0 = vpack.c.bf16 %v6815_v61, %v6807_v60  ;;  %v11453_v60 = vld [vmem:[#allocation13 + $0x68] ss:$16 sps:$4 sm:$0xff]   ;;  %v11458_v61 = vld [vmem:[#allocation13 + $0x8c] ss:$16 sps:$4 sm:$0xff]  }
 0x998   :  { %8502 = vmatprep.mubr.bf16.mxu0 %v12641_v0 }
 0x999   :  { %8503 = vmatmul.mubr.bf16.vlgmr.msra.gmra.mrb[12].mxu0 %v12639_v63 }
 0x99a   :  { %8514 = vmatpush1.bf16.msra.mxu0 %v11396_v1  ;;  %v11456_v1 = vld [vmem:[#allocation13 + $0x88] ss:$16 sps:$4 sm:$0xff]  }
 0x99b   :  { %8515 = vmatprep.subr.bf16.mxu0 %v11401_v2  ;;  %v11461_v2 = vld [vmem:[#allocation13 + $0xac] ss:$16 sps:$4 sm:$0xff]  }
 0x99e   :  { %8516 = vmatpush1.bf16.msra.mxu0 %v11399_v3  ;;  %v11459_v3 = vld [vmem:[#allocation13 + $0xa8] ss:$16 sps:$4 sm:$0xff]  }
 0x99f   :  { %8517 = vmatprep.subr.bf16.mxu0 %v11404_v4  ;;  %v11464_v4 = vld [vmem:[#allocation13 + $0xcc] ss:$16 sps:$4 sm:$0xff]  }
 0x9a2   :  { %8518 = vmatpush1.bf16.msra.mxu0 %v11402_v5  ;;  %v11467_v5 = vld [vmem:[#allocation13 + $0xec] ss:$16 sps:$4 sm:$0xff]  }
 0x9a3   :  { %8519 = vmatprep.subr.bf16.mxu0 %v11407_v6  ;;  %v11465_v6 = vld [vmem:[#allocation13 + $0xe8] ss:$16 sps:$4 sm:$0xff]  }
 0x9a6   :  { %8520 = vmatpush1.bf16.msra.mxu0 %v11405_v54  ;;  %v11470_v54 = vld [vmem:[#allocation13 + $0x10c] ss:$16 sps:$4 sm:$0xff]  }
 0x9a7   :  { %8521 = vmatprep.subr.bf16.mxu0 %v11410_v53  ;;  %v11468_v53 = vld [vmem:[#allocation13 + $0x108] ss:$16 sps:$4 sm:$0xff]  }
 0x9aa   :  { %8522 = vmatpush1.bf16.msra.mxu0 %v11408_v7  ;;  %v11473_v7 = vld [vmem:[#allocation13 + $0x12c] ss:$16 sps:$4 sm:$0xff]  }
 0x9ab   :  { %8523 = vmatprep.subr.bf16.mxu0 %v11413_v57  ;;  %v11471_v57 = vld [vmem:[#allocation13 + $0x128] ss:$16 sps:$4 sm:$0xff]  }
 0x9ae   :  { %8524 = vmatpush1.bf16.msra.mxu0 %v11411_v8  ;;  %v11476_v8 = vld [vmem:[#allocation13 + $0x14c] ss:$16 sps:$4 sm:$0xff]  }
 0x9af   :  { %8525 = vmatprep.subr.bf16.mxu0 %v11416_v9  ;;  %v11474_v9 = vld [vmem:[#allocation13 + $0x148] ss:$16 sps:$4 sm:$0xff]  }
 0x9b2   :  { %8526 = vmatpush1.bf16.msra.mxu0 %v11414_v10  ;;  %v11479_v10 = vld [vmem:[#allocation13 + $0x16c] ss:$16 sps:$4 sm:$0xff]  }
 0x9b3   :  { %8527 = vmatprep.subr.bf16.mxu0 %v11419_v11  ;;  %v11477_v11 = vld [vmem:[#allocation13 + $0x168] ss:$16 sps:$4 sm:$0xff]  }
 0x9b6   :  { %8528 = vmatpush1.bf16.msra.mxu0 %v11417_v12  ;;  %v11482_v12 = vld [vmem:[#allocation13 + $0x18c] ss:$16 sps:$4 sm:$0xff]  }
 0x9b7   :  { %8529 = vmatprep.subr.bf16.mxu0 %v11422_v13  ;;  %v11480_v13 = vld [vmem:[#allocation13 + $0x188] ss:$16 sps:$4 sm:$0xff]  }
 0x9ba   :  { %8530 = vmatpush1.bf16.msra.mxu0 %v11420_v16  ;;  %v11485_v16 = vld [vmem:[#allocation13 + $0x1ac] ss:$16 sps:$4 sm:$0xff]  }
 0x9bb   :  { %8531 = vmatprep.subr.bf16.mxu0 %v11425_v17  ;;  %v11483_v17 = vld [vmem:[#allocation13 + $0x1a8] ss:$16 sps:$4 sm:$0xff]  }
 0x9be   :  { %8532 = vmatpush1.bf16.msra.mxu0 %v11423_v20  ;;  %v11488_v20 = vld [vmem:[#allocation13 + $0x1cc] ss:$16 sps:$4 sm:$0xff]  }
 0x9bf   :  { %8533 = vmatprep.subr.bf16.mxu0 %v11428_v21  ;;  %v11486_v21 = vld [vmem:[#allocation13 + $0x1c8] ss:$16 sps:$4 sm:$0xff]  }
 0x9c2   :  { %8534 = vmatpush1.bf16.msra.mxu0 %v11426_v25  ;;  %v11491_v25 = vld [vmem:[#allocation13 + $0x1ec] ss:$16 sps:$4 sm:$0xff]  }
 0x9c3   :  { %8535 = vmatprep.subr.bf16.mxu0 %v11431_v26  ;;  %v11489_v26 = vld [vmem:[#allocation13 + $0x1e8] ss:$16 sps:$4 sm:$0xff]  }
 0x9c6   :  { %8536 = vmatpush1.bf16.msra.mxu0 %v11429_v27  ;;  %v11494_v27 = vld [vmem:[#allocation13 + $0x20c] ss:$16 sps:$4 sm:$0xff]  }
 0x9c7   :  { %8537 = vmatprep.subr.bf16.mxu0 %v11434_v29  ;;  %v11492_v29 = vld [vmem:[#allocation13 + $0x208] ss:$16 sps:$4 sm:$0xff]  }
 0x9ca   :  { %8538 = vmatpush1.bf16.msra.mxu0 %v11432_v30  ;;  %v11588_v30 = vld [vmem:[%s12806_s16 + $0x40] sm:$0xff]  }
 0x9cb   :  { %8539 = vmatprep.subr.bf16.mxu0 %v11437_v31  ;;  %v11497_v31 = vld [vmem:[#allocation13 + $0x22c] ss:$16 sps:$4 sm:$0xff]   ;;  %10278 = vmatprep.subr.bf16.mxu1 %v11588_v30  ;;  %v11552_v30 = vld [vmem:[#allocation13 + $0x488] ss:$16 sps:$4 sm:$0xff]  }
 0x9ce   :  { %8540 = vmatpush1.bf16.msra.mxu0 %v11435_v28  ;;  %v11592_v28 = vld [vmem:[%s12806_s16] sm:$0xff]  }
 0x9cf   :  { %8541 = vmatprep.subr.bf16.mxu0 %v11440_v32  ;;  %10279 = vmatpush3.bf16.msra.mxu1 %v11592_v28  ;;  %v11495_v32 = vld [vmem:[#allocation13 + $0x228] ss:$16 sps:$4 sm:$0xff]   ;;  %v11560_v28 = vld [vmem:[#allocation13 + $0x4cc] ss:$16 sps:$4 sm:$0xff]  }
 0x9d2   :  { %8542 = vmatpush1.bf16.msra.mxu0 %v11438_v33  ;;  %v11593_v33 = vld [vmem:[%s12806_s16 + $0x48] sm:$0xff]  }
 0x9d3   :  { %8543 = vmatprep.subr.bf16.mxu0 %v11443_v34  ;;  %v11500_v34 = vld [vmem:[#allocation13 + $0x24c] ss:$16 sps:$4 sm:$0xff]   ;;  %10280 = vmatprep.subr.bf16.mxu1 %v11593_v33  ;;  %v11561_v33 = vld [vmem:[#allocation13 + $0x4e8] ss:$16 sps:$4 sm:$0xff]  }
 0x9d6   :  { %8544 = vmatpush1.bf16.msra.mxu0 %v11441_v37  ;;  %v11597_v37 = vld [vmem:[%s12806_s16 + $0x8] sm:$0xff]  }
 0x9d7   :  { %8556 = vmatprep.subr.bf16.mxu0 %v11446_v38  ;;  %10281 = vmatpush3.bf16.msra.mxu1 %v11597_v37  ;;  %v11498_v38 = vld [vmem:[#allocation13 + $0x248] ss:$16 sps:$4 sm:$0xff]  }
 0x9d8   :  { %v11564_v37 = vld [vmem:[#allocation13 + $0x508] ss:$16 sps:$4 sm:$0xff]  }
 0xa10   :  { %v6751_v42 = vpop.f32.mrb[32].mxu1 }
 0xa11   :  { %v6753_v55 = vpop.f32.mrb[33].mxu1  ;;  %v6808_v56 = vadd.f32 %v6789_v41, %v6751_v42  ;;  %v11506_v42 = vld [vmem:[#allocation13 + $0x28c] ss:$16 sps:$4 sm:$0xff]  }
 0xa12   :  { %v6755_v44 = vpop.f32.mrb[34].mxu1  ;;  %v6809_v47 = vadd.f32 %v6793_v43, %v6753_v55  ;;  %v11504_v55 = vld [vmem:[#allocation13 + $0x288] ss:$16 sps:$4 sm:$0xff]  }
 0xa13   :  { %v6816_v45 = vadd.f32 %v6789_v41, %v6755_v44  ;;  %v6757_v46 = vpop.f32.mrb[35].mxu1  ;;  %v11603_v41 = vld [vmem:[%s12806_s16 + $0x58] sm:$0xff]   ;;  %v11608_v44 = vld [vmem:[%s12806_s16 + $0x60] sm:$0xff]  }
 0xa14   :  { %v6817_v48 = vadd.f32 %v6793_v43, %v6757_v46  ;;  %v11607_v43 = vld [vmem:[%s12806_s16 + $0x18] sm:$0xff]  }
 0xa15   :  { %v12649_v49 = vpack.c.bf16 %v6816_v45, %v6808_v56  ;;  %v11509_v56 = vld [vmem:[#allocation13 + $0x2ac] ss:$16 sps:$4 sm:$0xff]   ;;  %v11612_v45 = vld [vmem:[%s12806_s16 + $0x20] sm:$0xff]   ;;  %v11507_v46 = vld [vmem:[#allocation13 + $0x2a8] ss:$16 sps:$4 sm:$0xff]  }
 0xa16   :  { %v12651_v50 = vpack.c.bf16 %v6817_v48, %v6809_v47  ;;  %v11613_v47 = vld [vmem:[%s12806_s16 + $0x68] sm:$0xff]  }
 0xa17   :  { %v11512_v48 = vld [vmem:[#allocation13 + $0x2cc] ss:$16 sps:$4 sm:$0xff]  }
 0xa18   :  { %8545 = vmatprep.mubr.bf16.mxu0 %v12651_v50 }
 0xa19   :  { %8546 = vmatmul.mubr.bf16.vlgmr.msra.gmra.mrb[12].mxu0 %v12649_v49 }
 0xa1a   :  { %8557 = vmatpush1.bf16.msra.mxu0 %v11444_v51  ;;  %8588 = vmatprep.mubr.bf16.mxu0 %v12616_v24  ;;  %v11462_v24 = vld [vmem:[#allocation13 + $0xc8] ss:$16 sps:$4 sm:$0xff]  }
 0xa1b   :  { %8558 = vmatprep.subr.bf16.mxu0 %v11449_v52  ;;  %v11617_v51 = vld [vmem:[%s12806_s16 + $0x28] sm:$0xff]  }
 0xa1c   :  { %v11510_v52 = vld [vmem:[#allocation13 + $0x2c8] ss:$16 sps:$4 sm:$0xff]  }
 0xa1e   :  { %8559 = vmatpush1.bf16.msra.mxu0 %v11447_v14  ;;  %v11618_v14 = vld [vmem:[%s12806_s16 + $0x70] sm:$0xff]  }
 0xa1f   :  { %8560 = vmatprep.subr.bf16.mxu0 %v11452_v62  ;;  %v11515_v62 = vld [vmem:[#allocation13 + $0x2ec] ss:$16 sps:$4 sm:$0xff]  }
 0xa22   :  { %8561 = vmatpush1.bf16.msra.mxu0 %v11450_v58  ;;  %v11622_v58 = vld [vmem:[%s12806_s16 + $0x30] sm:$0xff]  }
 0xa23   :  { %8562 = vmatprep.subr.bf16.mxu0 %v11455_v59  ;;  %v11513_v59 = vld [vmem:[#allocation13 + $0x2e8] ss:$16 sps:$4 sm:$0xff]  }
 0xa26   :  { %8563 = vmatpush1.bf16.msra.mxu0 %v11453_v60  ;;  %v11623_v60 = vld [vmem:[%s12806_s16 + $0x78] sm:$0xff]  }
 0xa27   :  { %8564 = vmatprep.subr.bf16.mxu0 %v11458_v61  ;;  %v11518_v61 = vld [vmem:[#allocation13 + $0x30c] ss:$16 sps:$4 sm:$0xff]  }
 0xa2a   :  { %8565 = vmatpush1.bf16.msra.mxu0 %v11456_v1  ;;  %v11627_v1 = vld [vmem:[%s12806_s16 + $0x38] sm:$0xff]  }
 0xa2b   :  { %8566 = vmatprep.subr.bf16.mxu0 %v11461_v2  ;;  %v11516_v2 = vld [vmem:[#allocation13 + $0x308] ss:$16 sps:$4 sm:$0xff]  }
 0xa2e   :  { %8567 = vmatpush1.bf16.msra.mxu0 %v11459_v3  ;;  %v11521_v3 = vld [vmem:[#allocation13 + $0x32c] ss:$16 sps:$4 sm:$0xff]  }
 0xa2f   :  { %8568 = vmatprep.subr.bf16.mxu0 %v11464_v4  ;;  %v11519_v4 = vld [vmem:[#allocation13 + $0x328] ss:$16 sps:$4 sm:$0xff]  }
 0xa32   :  { %8569 = vmatpush1.bf16.msra.mxu0 %v11462_v24  ;;  %v11524_v24 = vld [vmem:[#allocation13 + $0x34c] ss:$16 sps:$4 sm:$0xff]  }
 0xa33   :  { %8570 = vmatprep.subr.bf16.mxu0 %v11467_v5  ;;  %v11522_v5 = vld [vmem:[#allocation13 + $0x348] ss:$16 sps:$4 sm:$0xff]  }
 0xa36   :  { %8571 = vmatpush1.bf16.msra.mxu0 %v11465_v6  ;;  %v11527_v6 = vld [vmem:[#allocation13 + $0x36c] ss:$16 sps:$4 sm:$0xff]  }
 0xa37   :  { %8572 = vmatprep.subr.bf16.mxu0 %v11470_v54  ;;  %v11525_v54 = vld [vmem:[#allocation13 + $0x368] ss:$16 sps:$4 sm:$0xff]  }
 0xa3a   :  { %8573 = vmatpush1.bf16.msra.mxu0 %v11468_v53  ;;  %v11530_v53 = vld [vmem:[#allocation13 + $0x38c] ss:$16 sps:$4 sm:$0xff]  }
 0xa3b   :  { %8574 = vmatprep.subr.bf16.mxu0 %v11473_v7  ;;  %v11528_v7 = vld [vmem:[#allocation13 + $0x388] ss:$16 sps:$4 sm:$0xff]  }
 0xa3e   :  { %8575 = vmatpush1.bf16.msra.mxu0 %v11471_v57  ;;  %v11533_v57 = vld [vmem:[#allocation13 + $0x3ac] ss:$16 sps:$4 sm:$0xff]  }
 0xa3f   :  { %8576 = vmatprep.subr.bf16.mxu0 %v11476_v8  ;;  %v11531_v8 = vld [vmem:[#allocation13 + $0x3a8] ss:$16 sps:$4 sm:$0xff]  }
 0xa42   :  { %8577 = vmatpush1.bf16.msra.mxu0 %v11474_v9  ;;  %v11536_v9 = vld [vmem:[#allocation13 + $0x3cc] ss:$16 sps:$4 sm:$0xff]  }
 0xa43   :  { %8578 = vmatprep.subr.bf16.mxu0 %v11479_v10  ;;  %v11534_v10 = vld [vmem:[#allocation13 + $0x3c8] ss:$16 sps:$4 sm:$0xff]  }
 0xa46   :  { %8579 = vmatpush1.bf16.msra.mxu0 %v11477_v11  ;;  %v11539_v11 = vld [vmem:[#allocation13 + $0x3ec] ss:$16 sps:$4 sm:$0xff]  }
 0xa47   :  { %8580 = vmatprep.subr.bf16.mxu0 %v11482_v12  ;;  %v11537_v12 = vld [vmem:[#allocation13 + $0x3e8] ss:$16 sps:$4 sm:$0xff]  }
 0xa4a   :  { %8581 = vmatpush1.bf16.msra.mxu0 %v11480_v13  ;;  %v11542_v13 = vld [vmem:[#allocation13 + $0x40c] ss:$16 sps:$4 sm:$0xff]  }
 0xa4b   :  { %8582 = vmatprep.subr.bf16.mxu0 %v11485_v16  ;;  %v11540_v16 = vld [vmem:[#allocation13 + $0x408] ss:$16 sps:$4 sm:$0xff]  }
 0xa4e   :  { %8583 = vmatpush1.bf16.msra.mxu0 %v11483_v17  ;;  %v11545_v17 = vld [vmem:[#allocation13 + $0x42c] ss:$16 sps:$4 sm:$0xff]  }
 0xa4f   :  { %8584 = vmatprep.subr.bf16.mxu0 %v11488_v20  ;;  %v11543_v20 = vld [vmem:[#allocation13 + $0x428] ss:$16 sps:$4 sm:$0xff]  }
 0xa52   :  { %8585 = vmatpush1.bf16.msra.mxu0 %v11486_v21  ;;  %v11548_v21 = vld [vmem:[#allocation13 + $0x44c] ss:$16 sps:$4 sm:$0xff]  }
 0xa53   :  { %8586 = vmatprep.subr.bf16.mxu0 %v11491_v25  ;;  %v11546_v25 = vld [vmem:[#allocation13 + $0x448] ss:$16 sps:$4 sm:$0xff]  }
 0xa56   :  { %8587 = vmatpush1.bf16.msra.mxu0 %v11489_v26  ;;  %v11551_v26 = vld [vmem:[#allocation13 + $0x46c] ss:$16 sps:$4 sm:$0xff]  }
 0xa57   :  { %8599 = vmatprep.subr.bf16.mxu0 %v11494_v27  ;;  %v11549_v27 = vld [vmem:[#allocation13 + $0x468] ss:$16 sps:$4 sm:$0xff]  }
 0xa59   :  { %8589 = vmatmul.mubr.bf16.vlgmr.msra.gmra.mrb[16].mxu0 %v12614_v22  ;;  %v11598_v22 = vld [vmem:[%s12806_s16 + $0x50] sm:$0xff]  }
 0xa5a   :  { %8600 = vmatpush1.bf16.msra.mxu0 %v11492_v29  ;;  %8631 = vmatprep.mubr.bf16.mxu0 %v12630_v36  ;;  %v11503_v36 = vld [vmem:[#allocation13 + $0x26c] ss:$16 sps:$4 sm:$0xff]  }
 0xa5b   :  { %8601 = vmatprep.subr.bf16.mxu0 %v11497_v31  ;;  %10282 = vmatprep.subr.bf16.mxu1 %v11598_v22  ;;  %v11554_v29 = vld [vmem:[#allocation13 + $0x48c] ss:$16 sps:$4 sm:$0xff]   ;;  %v11567_v22 = vld [vmem:[#allocation13 + $0x528] ss:$16 sps:$4 sm:$0xff]  }
 0xa5c   :  { %10283 = vmatpush3.bf16.msra.mxu1 %v11602_v39  ;;  %v11557_v31 = vld [vmem:[#allocation13 + $0x4ac] ss:$16 sps:$4 sm:$0xff]   ;;  %v11570_v39 = vld [vmem:[#allocation13 + $0x548] ss:$16 sps:$4 sm:$0xff]  }
 0xa5d   :  { %10284 = vmatprep.subr.bf16.mxu1 %v11603_v41  ;;  %v11573_v41 = vld [vmem:[#allocation13 + $0x568] ss:$16 sps:$4 sm:$0xff]  }
 0xa5e   :  { %8602 = vmatpush1.bf16.msra.mxu0 %v11495_v32  ;;  %v11563_v32 = vld [vmem:[#allocation13 + $0x4ec] ss:$16 sps:$4 sm:$0xff]  }
 0xa5f   :  { %8603 = vmatprep.subr.bf16.mxu0 %v11500_v34  ;;  %v11566_v34 = vld [vmem:[#allocation13 + $0x50c] ss:$16 sps:$4 sm:$0xff]  }
 0xa60   :  { %10285 = vmatpush3.bf16.msra.mxu1 %v11607_v43  ;;  %v11576_v43 = vld [vmem:[#allocation13 + $0x588] ss:$16 sps:$4 sm:$0xff]  }
 0xa61   :  { %10286 = vmatprep.subr.bf16.mxu1 %v11608_v44  ;;  %v11579_v44 = vld [vmem:[#allocation13 + $0x5a8] ss:$16 sps:$4 sm:$0xff]  }
 0xa62   :  { %8604 = vmatpush1.bf16.msra.mxu0 %v11498_v38  ;;  %v11569_v38 = vld [vmem:[#allocation13 + $0x52c] ss:$16 sps:$4 sm:$0xff]  }
 0xa63   :  { %8605 = vmatprep.subr.bf16.mxu0 %v11503_v36  ;;  %v11572_v36 = vld [vmem:[#allocation13 + $0x54c] ss:$16 sps:$4 sm:$0xff]  }
 0xa64   :  { %10287 = vmatpush3.bf16.msra.mxu1 %v11612_v45  ;;  %v11582_v45 = vld [vmem:[#allocation13 + $0x5c8] ss:$16 sps:$4 sm:$0xff]  }
 0xa65   :  { %10288 = vmatprep.subr.bf16.mxu1 %v11613_v47  ;;  %v11585_v47 = vld [vmem:[#allocation13 + $0x5e8] ss:$16 sps:$4 sm:$0xff]  }
 0xa66   :  { %8606 = vmatpush1.bf16.msra.mxu0 %v11501_v40  ;;  %v11575_v40 = vld [vmem:[#allocation13 + $0x56c] ss:$16 sps:$4 sm:$0xff]  }
 0xa67   :  { %8607 = vmatprep.subr.bf16.mxu0 %v11506_v42  ;;  %v11578_v42 = vld [vmem:[#allocation13 + $0x58c] ss:$16 sps:$4 sm:$0xff]  }
 0xa68   :  { %10289 = vmatpush3.bf16.msra.mxu1 %v11617_v51  ;;  %v11589_v51 = vld [vmem:[#allocation13 + $0x608] ss:$16 sps:$4 sm:$0xff]  }
 0xa69   :  { %10290 = vmatprep.subr.bf16.mxu1 %v11618_v14  ;;  %v11594_v14 = vld [vmem:[#allocation13 + $0x628] ss:$16 sps:$4 sm:$0xff]  }
 0xa6a   :  { %8608 = vmatpush1.bf16.msra.mxu0 %v11504_v55  ;;  %v11581_v55 = vld [vmem:[#allocation13 + $0x5ac] ss:$16 sps:$4 sm:$0xff]  }
 0xa6b   :  { %8609 = vmatprep.subr.bf16.mxu0 %v11509_v56  ;;  %v11584_v56 = vld [vmem:[#allocation13 + $0x5cc] ss:$16 sps:$4 sm:$0xff]  }
 0xa6c   :  { %10291 = vmatpush3.bf16.msra.mxu1 %v11622_v58  ;;  %v11599_v58 = vld [vmem:[#allocation13 + $0x648] ss:$16 sps:$4 sm:$0xff]  }
 0xa6d   :  { %10292 = vmatprep.subr.bf16.mxu1 %v11623_v60  ;;  %v11604_v60 = vld [vmem:[#allocation13 + $0x668] ss:$16 sps:$4 sm:$0xff]  }
 0xa6e   :  { %8610 = vmatpush1.bf16.msra.mxu0 %v11507_v46  ;;  %v11587_v46 = vld [vmem:[#allocation13 + $0x5ec] ss:$16 sps:$4 sm:$0xff]  }
 0xa6f   :  { %8611 = vmatprep.subr.bf16.mxu0 %v11512_v48  ;;  %v11591_v48 = vld [vmem:[#allocation13 + $0x60c] ss:$16 sps:$4 sm:$0xff]  }
 0xa70   :  { %10293 = vmatpush3.bf16.msra.mxu1 %v11627_v1  ;;  %v11609_v1 = vld [vmem:[#allocation13 + $0x688] ss:$16 sps:$4 sm:$0xff]  }
 0xa72   :  { %8612 = vmatpush1.bf16.msra.mxu0 %v11510_v52  ;;  %v11596_v52 = vld [vmem:[#allocation13 + $0x62c] ss:$16 sps:$4 sm:$0xff]  }
 0xa73   :  { %8613 = vmatprep.subr.bf16.mxu0 %v11515_v62  ;;  %v11601_v62 = vld [vmem:[#allocation13 + $0x64c] ss:$16 sps:$4 sm:$0xff]  }
 0xa76   :  { %8614 = vmatpush1.bf16.msra.mxu0 %v11513_v59  ;;  %v11606_v59 = vld [vmem:[#allocation13 + $0x66c] ss:$16 sps:$4 sm:$0xff]  }
 0xa77   :  { %8615 = vmatprep.subr.bf16.mxu0 %v11518_v61  ;;  %v11611_v61 = vld [vmem:[#allocation13 + $0x68c] ss:$16 sps:$4 sm:$0xff]  }
 0xa7a   :  { %8616 = vmatpush1.bf16.msra.mxu0 %v11516_v2 }
 0xa7b   :  { %8617 = vmatprep.subr.bf16.mxu0 %v11521_v3  ;;  %v11614_v3 = vld [vmem:[#allocation13 + $0x6a8] ss:$16 sps:$4 sm:$0xff]  }
 0xa7e   :  { %8618 = vmatpush1.bf16.msra.mxu0 %v11519_v4 }
 0xa7f   :  { %8619 = vmatprep.subr.bf16.mxu0 %v11524_v24  ;;  %v11621_v24 = vld [vmem:[#allocation13 + $0x6cc] ss:$16 sps:$4 sm:$0xff]  }
 0xa82   :  { %8620 = vmatpush1.bf16.msra.mxu0 %v11522_v5 }
 0xa83   :  { %8621 = vmatprep.subr.bf16.mxu0 %v11527_v6 }
 0xa86   :  { %8622 = vmatpush1.bf16.msra.mxu0 %v11525_v54 }
 0xa87   :  { %8623 = vmatprep.subr.bf16.mxu0 %v11530_v53 }
 0xa8a   :  { %8624 = vmatpush1.bf16.msra.mxu0 %v11528_v7 }
 0xa8b   :  { %8625 = vmatprep.subr.bf16.mxu0 %v11533_v57  ;;  %v11619_v57 = vld [vmem:[#allocation13 + $0x6c8] ss:$16 sps:$4 sm:$0xff]  }
 0xa8e   :  { %8626 = vmatpush1.bf16.msra.mxu0 %v11531_v8 }
 0xa8f   :  { %8627 = vmatprep.subr.bf16.mxu0 %v11536_v9 }
 0xa92   :  { %8628 = vmatpush1.bf16.msra.mxu0 %v11534_v10  ;;  %v11626_v10 = vld [vmem:[#allocation13 + $0x6ec] ss:$16 sps:$4 sm:$0xff]  }
 0xa93   :  { %8629 = vmatprep.subr.bf16.mxu0 %v11539_v11 }
 0xa96   :  { %8630 = vmatpush1.bf16.msra.mxu0 %v11537_v12 }
 0xa97   :  { %8642 = vmatprep.subr.bf16.mxu0 %v11542_v13 }
 0xa99   :  { %8632 = vmatmul.mubr.bf16.vlgmr.msra.gmra.mrb[16].mxu0 %v12628_v35  ;;  %v11555_v35 = vld [vmem:[#allocation13 + $0x4a8] ss:$16 sps:$4 sm:$0xff]  }
 0xa9a   :  { %8643 = vmatpush1.bf16.msra.mxu0 %v11540_v16  ;;  %8674 = vmatprep.mubr.bf16.mxu0 %v12641_v0  ;;  %v11558_v0 = vld [vmem:[#allocation13 + $0x4c8] ss:$16 sps:$4 sm:$0xff]  }
 0xa9b   :  { %8644 = vmatprep.subr.bf16.mxu0 %v11545_v17 }
 0xa9e   :  { %8645 = vmatpush1.bf16.msra.mxu0 %v11543_v20  ;;  %v11630_v20 = vld [vmem:[#allocation13 + $0x70c] ss:$16 sps:$4 sm:$0xff]  }
 0xa9f   :  { %8646 = vmatprep.subr.bf16.mxu0 %v11548_v21 }
 0xaa2   :  { %8647 = vmatpush1.bf16.msra.mxu0 %v11546_v25  ;;  %v11628_v25 = vld [vmem:[#allocation13 + $0x708] ss:$16 sps:$4 sm:$0xff]  }
 0xaa3   :  { %8648 = vmatprep.subr.bf16.mxu0 %v11551_v26  ;;  %v11633_v26 = vld [vmem:[#allocation13 + $0x72c] ss:$16 sps:$4 sm:$0xff]  }
 0xaa6   :  { %8649 = vmatpush1.bf16.msra.mxu0 %v11549_v27  ;;  %v11631_v27 = vld [vmem:[#allocation13 + $0x728] ss:$16 sps:$4 sm:$0xff]  }
 0xaa7   :  { %8650 = vmatprep.subr.bf16.mxu0 %v11554_v29  ;;  %v11636_v29 = vld [vmem:[#allocation13 + $0x74c] ss:$16 sps:$4 sm:$0xff]  }
 0xaaa   :  { %8651 = vmatpush1.bf16.msra.mxu0 %v11552_v30  ;;  %v11634_v30 = vld [vmem:[#allocation13 + $0x748] ss:$16 sps:$4 sm:$0xff]  }
 0xaab   :  { %8652 = vmatprep.subr.bf16.mxu0 %v11557_v31  ;;  %v11639_v31 = vld [vmem:[#allocation13 + $0x76c] ss:$16 sps:$4 sm:$0xff]  }
 0xaae   :  { %8653 = vmatpush1.bf16.msra.mxu0 %v11555_v35  ;;  %v11637_v35 = vld [vmem:[#allocation13 + $0x768] ss:$16 sps:$4 sm:$0xff]  }
 0xaaf   :  { %8654 = vmatprep.subr.bf16.mxu0 %v11560_v28  ;;  %v11642_v28 = vld [vmem:[#allocation13 + $0x78c] ss:$16 sps:$4 sm:$0xff]  }
 0xab2   :  { %8655 = vmatpush1.bf16.msra.mxu0 %v11558_v0  ;;  %v11640_v0 = vld [vmem:[#allocation13 + $0x788] ss:$16 sps:$4 sm:$0xff]  }
 0xab3   :  { %8656 = vmatprep.subr.bf16.mxu0 %v11563_v32  ;;  %v11645_v32 = vld [vmem:[#allocation13 + $0x7ac] ss:$16 sps:$4 sm:$0xff]  }
 0xab6   :  { %8657 = vmatpush1.bf16.msra.mxu0 %v11561_v33  ;;  %v11643_v33 = vld [vmem:[#allocation13 + $0x7a8] ss:$16 sps:$4 sm:$0xff]  }
 0xab7   :  { %8658 = vmatprep.subr.bf16.mxu0 %v11566_v34  ;;  %v11648_v34 = vld [vmem:[#allocation13 + $0x7cc] ss:$16 sps:$4 sm:$0xff]  }
 0xaba   :  { %8659 = vmatpush1.bf16.msra.mxu0 %v11564_v37  ;;  %v11646_v37 = vld [vmem:[#allocation13 + $0x7c8] ss:$16 sps:$4 sm:$0xff]  }
 0xabb   :  { %8660 = vmatprep.subr.bf16.mxu0 %v11569_v38  ;;  %v11651_v38 = vld [vmem:[#allocation13 + $0x7ec] ss:$16 sps:$4 sm:$0xff]  }
 0xabe   :  { %8661 = vmatpush1.bf16.msra.mxu0 %v11567_v22  ;;  %v11649_v22 = vld [vmem:[#allocation13 + $0x7e8] ss:$16 sps:$4 sm:$0xff]  }
 0xabf   :  { %8662 = vmatprep.subr.bf16.mxu0 %v11572_v36  ;;  %v11652_v36 = vld [vmem:[%s12806_s16 + $0xc0] sm:$0xff]  }
 0xac0   :  { %10300 = vmatprep.subr.bf16.mxu1 %v11652_v36 }
 0xac2   :  { %8663 = vmatpush1.bf16.msra.mxu0 %v11570_v39  ;;  %v11653_v39 = vld [vmem:[%s12806_s16 + $0x80] sm:$0xff]  }
 0xac3   :  { %8664 = vmatprep.subr.bf16.mxu0 %v11575_v40  ;;  %v11654_v40 = vld [vmem:[%s12806_s16 + $0xc8] sm:$0xff]  }
 0xac6   :  { %8665 = vmatpush1.bf16.msra.mxu0 %v11573_v41  ;;  %v11655_v41 = vld [vmem:[%s12806_s16 + $0x88] sm:$0xff]  }
 0xac7   :  { %8666 = vmatprep.subr.bf16.mxu0 %v11578_v42  ;;  %v11657_v42 = vld [vmem:[%s12806_s16 + $0x90] sm:$0xff]  }
 0xaca   :  { %8667 = vmatpush1.bf16.msra.mxu0 %v11576_v43  ;;  %v11658_v43 = vld [vmem:[%s12806_s16 + $0xd8] sm:$0xff]  }
 0xacb   :  { %8668 = vmatprep.subr.bf16.mxu0 %v11581_v55  ;;  %v11659_v55 = vld [vmem:[%s12806_s16 + $0x98] sm:$0xff]  }
 0xace   :  { %8669 = vmatpush1.bf16.msra.mxu0 %v11579_v44  ;;  %v11660_v44 = vld [vmem:[%s12806_s16 + $0xe0] sm:$0xff]  }
 0xacf   :  { %8670 = vmatprep.subr.bf16.mxu0 %v11584_v56  ;;  %v11661_v56 = vld [vmem:[%s12806_s16 + $0xa0] sm:$0xff]  }
 0xad2   :  { %8671 = vmatpush1.bf16.msra.mxu0 %v11582_v45  ;;  %v11662_v45 = vld [vmem:[%s12806_s16 + $0xe8] sm:$0xff]  }
 0xad3   :  { %8672 = vmatprep.subr.bf16.mxu0 %v11587_v46  ;;  %v11663_v46 = vld [vmem:[%s12806_s16 + $0xa8] sm:$0xff]  }
 0xad6   :  { %8673 = vmatpush1.bf16.msra.mxu0 %v11585_v47  ;;  %v11664_v47 = vld [vmem:[%s12806_s16 + $0xf0] sm:$0xff]  }
 0xad7   :  { %8685 = vmatprep.subr.bf16.mxu0 %v11591_v48  ;;  %v11665_v48 = vld [vmem:[%s12806_s16 + $0xb0] sm:$0xff]  }
 0xad9   :  { %8675 = vmatmul.mubr.bf16.vlgmr.msra.gmra.mrb[16].mxu0 %v12639_v63  ;;  %v12713_v63 = vld [vmem:[%s12805_s15] sm:$0xf] }
 0xada   :  { %8686 = vmatpush1.bf16.msra.mxu0 %v11589_v51  ;;  %8717 = vmatprep.mubr.bf16.mxu0 %v12651_v50  ;;  %v11616_v50 = vld [vmem:[#allocation13 + $0x6ac] ss:$16 sps:$4 sm:$0xff]   ;;  %v7087_v2 = vrot.slane %v12713_v63, %v12331_v15  ;;  %v7091_v4 = vrot.slane %v12713_v63, %v12340_v18  ;;  %v11624_v18 = vld [vmem:[#allocation13 + $0x6e8] ss:$16 sps:$4 sm:$0xff]  }
 0xadb   :  { %8687 = vmatprep.subr.bf16.mxu0 %v11596_v52  ;;  %v11666_v51 = vld [vmem:[%s12806_s16 + $0xf8] sm:$0xff]  }
 0xadc   :  { %v11667_v52 = vld [vmem:[%s12806_s16 + $0xb8] sm:$0xff]  }
 0xade   :  { %8688 = vmatpush1.bf16.msra.mxu0 %v11594_v14 }
 0xadf   :  { %8689 = vmatprep.subr.bf16.mxu0 %v11601_v62 }
 0xae2   :  { %8690 = vmatpush1.bf16.msra.mxu0 %v11599_v58 }
 0xae3   :  { %8691 = vmatprep.subr.bf16.mxu0 %v11606_v59 }
 0xae6   :  { %8692 = vmatpush1.bf16.msra.mxu0 %v11604_v60 }
 0xae7   :  { %8693 = vmatprep.subr.bf16.mxu0 %v11611_v61 }
 0xaea   :  { %8694 = vmatpush1.bf16.msra.mxu0 %v11609_v1  ;;  %v7095_v1 = vrot.slane %v12713_v63, %v12334_v23  ;;  %v10223_v23 = vld [vmem:[%s12807_s17] ss:$0 sm:$0xff] }
 0xaeb   :  { %8695 = vmatprep.subr.bf16.mxu0 %v11616_v50  ;;  %v7099_v50 = vrot.slane %v12713_v63, %v12343_v19 }
 0xaec   :  { %v8547_v5 = vpop.f32.mrb[12].mxu0 }
 0xaed   :  { %v10342_v6 = vadd.f32 %v8547_v5, %v7087_v2  ;;  %v8549_v54 = vpop.f32.mrb[13].mxu0 }
 0xaee   :  { %v10343_v53 = vadd.f32 %v8549_v54, %v7091_v4  ;;  %8696 = vmatpush1.bf16.msra.mxu0 %v11614_v3  ;;  %v8551_v7 = vpop.f32.mrb[14].mxu0 }
 0xaef   :  { %v10344_v8 = vadd.f32 %v8551_v7, %v7087_v2  ;;  %v8553_v9 = vpop.f32.mrb[15].mxu0  ;;  %8697 = vmatprep.subr.bf16.mxu0 %v11621_v24  ;;  %v8728_v15 = vmax.f32 %v10342_v6, 0.0 }
 0xaf0   :  { %v10345_v11 = vadd.f32 %v8553_v9, %v7091_v4  ;;  %v8729_v13 = vmax.f32 %v10343_v53, 0.0 }
 0xaf1   :  { %v8732_v12 = vmax.f32 %v10344_v8, 0.0 }
 0xaf2   :  { %v8733_v16 = vmax.f32 %v10345_v11, 0.0  ;;  %8698 = vmatpush1.bf16.msra.mxu0 %v11619_v57 }
 0xaf3   :  { %v8736_v17 = vpack.c.bf16 %v8732_v12, %v8728_v15  ;;  %8699 = vmatprep.subr.bf16.mxu0 %v11626_v10 }
 0xaf4   :  { %v8737_v21 = vpack.c.bf16 %v8733_v16, %v8729_v13 }
 0xaf6   :  { %8700 = vmatpush1.bf16.msra.mxu0 %v11624_v18  ;;  %9035 = vmatprep.mubr.bf16.mxu1 %v8737_v21 }
 0xaf7   :  { %9036 = vmatmul.mubr.bf16.vlgmr.msra.gmra.mrb[36].mxu1 %v8736_v17  ;;  %8701 = vmatprep.subr.bf16.mxu0 %v11630_v20 }
 0xaf8   :  { %10301 = vmatpush3.bf16.msra.mxu1 %v11653_v39 }
 0xaf9   :  { %10302 = vmatprep.subr.bf16.mxu1 %v11654_v40 }
 0xafa   :  { %8702 = vmatpush1.bf16.msra.mxu0 %v11628_v25 }
 0xafb   :  { %8703 = vmatprep.subr.bf16.mxu0 %v11633_v26 }
 0xafc   :  { %10303 = vmatpush3.bf16.msra.mxu1 %v11655_v41 }
 0xafe   :  { %8704 = vmatpush1.bf16.msra.mxu0 %v11631_v27 }
 0xaff   :  { %8705 = vmatprep.subr.bf16.mxu0 %v11636_v29 }
 0xb02   :  { %8706 = vmatpush1.bf16.msra.mxu0 %v11634_v30 }
 0xb03   :  { %8707 = vmatprep.subr.bf16.mxu0 %v11639_v31 }
 0xb06   :  { %8708 = vmatpush1.bf16.msra.mxu0 %v11637_v35 }
 0xb07   :  { %8709 = vmatprep.subr.bf16.mxu0 %v11642_v28 }
 0xb0a   :  { %8710 = vmatpush1.bf16.msra.mxu0 %v11640_v0 }
 0xb0b   :  { %8711 = vmatprep.subr.bf16.mxu0 %v11645_v32 }
 0xb0e   :  { %8712 = vmatpush1.bf16.msra.mxu0 %v11643_v33 }
 0xb0f   :  { %8713 = vmatprep.subr.bf16.mxu0 %v11648_v34 }
 0xb12   :  { %8714 = vmatpush1.bf16.msra.mxu0 %v11646_v37 }
 0xb13   :  { %8715 = vmatprep.subr.bf16.mxu0 %v11651_v38 }
 0xb16   :  { %8716 = vmatpush1.bf16.msra.mxu0 %v11649_v22 }
 0xb19   :  { %8718 = vmatmul.mubr.bf16.vlgmr.msra.gmra.mrb[16].mxu0 %v12649_v49  ;;  %v11656_v49 = vld [vmem:[%s12806_s16 + $0xd0] sm:$0xff]  }
 0xb1a   :  { %10304 = vmatprep.subr.bf16.mxu1 %v11656_v49 }
 0xb1b   :  { %10305 = vmatpush3.bf16.msra.mxu1 %v11657_v42 }
 0xb1c   :  { %10306 = vmatprep.subr.bf16.mxu1 %v11658_v43 }
 0xb1f   :  { %10307 = vmatpush3.bf16.msra.mxu1 %v11659_v55 }
 0xb20   :  { %10308 = vmatprep.subr.bf16.mxu1 %v11660_v44 }
 0xb23   :  { %10309 = vmatpush3.bf16.msra.mxu1 %v11661_v56 }
 0xb24   :  { %10310 = vmatprep.subr.bf16.mxu1 %v11662_v45 }
 0xb27   :  { %10311 = vmatpush3.bf16.msra.mxu1 %v11663_v46 }
 0xb28   :  { %10312 = vmatprep.subr.bf16.mxu1 %v11664_v47 }
 0xb2b   :  { %10313 = vmatpush3.bf16.msra.mxu1 %v11665_v48 }
 0xb2c   :  { %10314 = vmatprep.subr.bf16.mxu1 %v11666_v51 }
 0xb2f   :  { %10315 = vmatpush3.bf16.msra.mxu1 %v11667_v52 }
 0xbca   :  { %v10294_v14 = vpop.f32.mrb[36].mxu1 }
 0xbcb   :  { %v10295_v62 = vpop.f32.mrb[37].mxu1 }
 0xbcc   :  { %v10296_v58 = vadd.f32 %v10295_v62, %v10294_v14  ;;  %v10297_v59 = vpop.f32.mrb[38].mxu1 }
 0xbcd   :  { %v10298_v60 = vpop.f32.mrb[39].mxu1 }
 0xbce   :  { %v10299_v61 = vadd.f32 %v10298_v60, %v10297_v59  ;;  %v9038_v15 = vadd.f32 %v10296_v58, %v10223_v23 }
 0xbd0   :  { %v9041_v18 = vadd.f32 %v10299_v61, %v10223_v23 }
 0xbec   :  { %v8719_v2 = vpop.f32.mrb[16].mxu0 }
 0xbed   :  { %v10346_v3 = vadd.f32 %v8719_v2, %v7095_v1  ;;  %v8721_v4 = vpop.f32.mrb[17].mxu0 }
 0xbee   :  { %v10347_v24 = vadd.f32 %v8721_v4, %v7099_v50  ;;  %v8723_v5 = vpop.f32.mrb[18].mxu0 }
 0xbef   :  { %v10348_v6 = vadd.f32 %v8723_v5, %v7095_v1  ;;  %v8725_v54 = vpop.f32.mrb[19].mxu0  ;;  %v8730_v7 = vmax.f32 %v10346_v3, 0.0 }
 0xbf0   :  { %v10349_v53 = vadd.f32 %v8725_v54, %v7099_v50  ;;  %v8731_v8 = vmax.f32 %v10347_v24, 0.0 }
 0xbf1   :  { %v8734_v57 = vmax.f32 %v10348_v6, 0.0 }
 0xbf2   :  { %v8735_v9 = vmax.f32 %v10349_v53, 0.0 }
 0xbf3   :  { %v8738_v10 = vpack.c.bf16 %v8734_v57, %v8730_v7 }
 0xbf4   :  { %v8739_v11 = vpack.c.bf16 %v8735_v9, %v8731_v8 }
 0xbf6   :  { %9076 = vmatprep.mubr.bf16.mxu1 %v8739_v11 }
 0xbf7   :  { %9077 = vmatmul.mubr.bf16.vlgmr.msra.gmra.mrb[40].mxu1 %v8738_v10 }
 0xcca   :  { %v10316_v19 = vpop.f32.mrb[40].mxu1 }
 0xccb   :  { %v10317_v63 = vpop.f32.mrb[41].mxu1 }
 0xccc   :  { %v10318_v12 = vadd.f32 %v10317_v63, %v10316_v19  ;;  %v10319_v13 = vpop.f32.mrb[42].mxu1 }
 0xccd   :  { %v10320_v16 = vpop.f32.mrb[43].mxu1 }
 0xcce   :  { %v9079_v17 = vadd.f32 %v10318_v12, %v9038_v15  ;;  %v10321_v20 = vadd.f32 %v10320_v16, %v10319_v13 }
 0xcd0   :  { %9085 = vst [vmem:[#allocation14] sm:$0xff] %v9079_v17  ;;  %v9082_v21 = vadd.f32 %v10321_v20, %v9041_v18 }
 0xcd2   :  { %9086 = vst [vmem:[#allocation14 + $0x8] sm:$0xff] %v9082_v21 }
 0xcd3   :  { %11833 = shalt.err (!%p11830_p4)
}
 0xcd4   :  { %s11834_s24 = scalar_lea.hbm %s12808_s18, 256 }
 0xcd5   :  { %p11835_p5 = scmp.ne.s32.totalorder %s12808_s18, %s11834_s24  ;;  %p11838_p6 = scmp.lt.u32.totalorder %s11834_s24, %s12808_s18 }
 0xcd7   :  { %p11840_p7 = pnand %p11838_p6, %p11835_p5 }
 0xcd9   :  { %11843 = shalt.err (!%p11840_p7)
}
 0xcda   :  { %9098 = dma.vmem_to_hbm [thread:$0]  %s9093_s5, 256, %s12808_s18, [#allocation4], %s12821_s22, %s12821_s22, %s12820_s25  }
 0xcdb   :  { %11852 = dma.done.wait [#allocation4], 256  }
 0xcdc   :  { %11853 = vsyncadd [#allocation4], 4294967040 }
 0xcdd   :  { %9102 = vsyncpa [#allocation3], 1 }
 0xcde   :  { %9103 = vsyncpa [#allocation6], 1 }
 0xcdf   :  { %9104 = vsyncpa [#allocation9], 1 }
 0xce0   :  { %9105 = vsyncpa [#allocation12], 1 }
 0xce1   :  { %9106 = vsyncpa [#allocation4], 1 }

</bundles_post_ra>
